<compile_context>
chip_gen: v5e
topology: v5e:2x2
jax: 0.10.0
libtpu: 0.0.40
codegen_flags: <defaults>
</compile_context>

<pallas_src>
import math

import jax
import jax.numpy as jnp
import numpy as np
from jax import lax
from jax.experimental import pallas as pl
from jax.experimental.pallas import tpu as pltpu


# ----------------------------------------------------------------------------
# Config (small shapes)
# ----------------------------------------------------------------------------
V_SRC = 32          # source vocab size
V_TGT = 32          # target vocab size
PAD = 0             # <pad> index in both vocabs
E_ENC = 16          # encoder_embed_size
H_ENC = 16          # encoder_hidden_size
E_DEC = 16          # decoder_embed_size
H_DEC = 32          # decoder_hidden_size
B = 2               # batch
T_SRC = 8           # source length (all equal)
T_TGT = 8           # target length (incl. BOS/EOS); 7 decode steps


# ----------------------------------------------------------------------------
# The fused Pallas kernel
# ----------------------------------------------------------------------------
def seq2seq_kernel(src_emb_ref, tgt_emb_ref, tgt_ref,
                   wih_enc_ref, b_enc_ref, whh_f_ref, whh_b_ref,
                   init_w_ref, init_b_ref, proj_ref,
                   wih_x_ref, b_dec_ref, w_avh_ref, comb_ref, out_w_ref,
                   loss_ref):
    f32 = jnp.float32
    He, Hd, V = H_ENC, H_DEC, V_TGT
    TsB = src_emb_ref.shape[0]
    TdB = tgt_emb_ref.shape[0]
    Ts = TsB // B
    Td = TdB // B

    def mm(a, b):
        return jnp.dot(a, b, preferred_element_type=f32)

    def lstm_gates(gates, H):
        # gates: (B, 4H), PyTorch order [i|f|g|o] packed in one lane span.
        # One full-vreg sigmoid + one full-vreg tanh, gates extracted with
        # static lane slices (no per-gate 128-lane spans, no rolls).
        sig = jax.nn.sigmoid(gates)
        th = jnp.tanh(gates)
        i = sig[:, 0 * H:1 * H]
        f = sig[:, 1 * H:2 * H]
        g = th[:, 2 * H:3 * H]
        o = sig[:, 3 * H:4 * H]
        return i, f, g, o

    # ------------------------- encoder (bi-LSTM) -------------------------
    # Single hoisted input matmul for BOTH directions (fwd gates in lanes
    # [0,4He), bwd in [4He,8He)); biases pre-folded.
    xg_all = mm(src_emb_ref[...], wih_enc_ref[...]) + b_enc_ref[...]    # (Ts*B, 8He)
    xg_f = xg_all[:, :4 * He]
    xg_b = xg_all[:, 4 * He:8 * He]

    whh_f = whh_f_ref[...]
    whh_b = whh_b_ref[...]

    h_f = jnp.zeros((B, He), f32)
    c_f = jnp.zeros((B, He), f32)
    h_b = jnp.zeros((B, He), f32)
    c_b = jnp.zeros((B, He), f32)
    hs_f = [None] * Ts
    hs_b = [None] * Ts

    # Fully unrolled; fwd and bwd recurrence chains interleaved.
    for s in range(Ts):
        tb = Ts - 1 - s

        gf = xg_f[s * B:(s + 1) * B, :] + mm(h_f, whh_f)
        i, f, g, o = lstm_gates(gf, He)
        c_f = f * c_f + i * g
        h_f = o * jnp.tanh(c_f)

        gb = xg_b[tb * B:(tb + 1) * B, :] + mm(h_b, whh_b)
        i, f, g, o = lstm_gates(gb, He)
        c_b = f * c_b + i * g
        h_b = o * jnp.tanh(c_b)

        hs_f[s] = h_f
        hs_b[tb] = h_b

    # Batch-major encoder outputs (B*Ts, 2He), rows = b*Ts + t, [fwd | bwd].
    # Assembled off the serial chain from the unrolled values (no scratch).
    enc_steps = [jnp.concatenate([hs_f[t], hs_b[t]], axis=-1) for t in range(Ts)]
    enc_rows = [enc_steps[t][b:b + 1, :] for b in range(B) for t in range(Ts)]
    enc_bm2d = jnp.concatenate(enc_rows, axis=0)                        # (B*Ts, 2He)
    enc_bm = enc_bm2d.reshape(B, Ts, 2 * He)

    # Attention projection of all source positions in ONE matmul.
    attn_bm = mm(enc_bm2d, proj_ref[...]).reshape(B, Ts, Hd)            # (B, Ts, Hd)

    # ------------------------- decoder.init_state ------------------------
    c_cat = jnp.concatenate([c_f, c_b], axis=-1)                        # (B, 2He)
    cell0 = mm(c_cat, init_w_ref[...]) + init_b_ref[...]                # (B, Hd)
    h = jnp.tanh(cell0)
    c = cell0

    # Hoisted word-embedding part of the decoder LSTMCell input matmul.
    xg_d = mm(tgt_emb_ref[...], wih_x_ref[...]) + b_dec_ref[...]        # (Td*B, 4Hd)

    w_avh = w_avh_ref[...]
    comb = comb_ref[...]

    av = jnp.zeros((B, Hd), f32)
    av_list = []

    for t in range(Td):
        # LSTMCell on input [word | prev attention vector]: one merged matmul.
        gates = xg_d[t * B:(t + 1) * B, :] + mm(
            jnp.concatenate([av, h], axis=-1), w_avh)                   # (B, 4Hd)
        i, f, g, o = lstm_gates(gates, Hd)
        c = f * c + i * g
        h = o * jnp.tanh(c)

        # Dot-product attention, Ts on the lane axis (flash-style einsums).
        q = h.reshape(B, 1, Hd)
        logit = jnp.einsum('bqd,bkd->bqk', q, attn_bm,
                           preferred_element_type=f32)                  # (B, 1, Ts)
        m = jnp.max(logit, axis=-1, keepdims=True)
        e = jnp.exp(logit - m)
        alpha = e / jnp.sum(e, axis=-1, keepdims=True)
        ctx = jnp.einsum('bqk,bkd->bqd', alpha, enc_bm,
                         preferred_element_type=f32).reshape(B, 2 * He)  # (B, 2He)

        # combine([hidden | context]) as one merged matmul.
        av = jnp.tanh(mm(jnp.concatenate([h, ctx], axis=-1), comb))      # (B, Hd)
        av_list.append(av)

    # --------- hoisted output projection + cross-entropy (all steps) ---------
    av_all = jnp.concatenate(av_list, axis=0)                           # (Td*B, Hd)
    logits = mm(av_all, out_w_ref[...])                                 # (Td*B, 128)
    col = lax.broadcasted_iota(jnp.int32, logits.shape, 1)
    L = jnp.where(col < V, logits, -1e30)                               # mask padded vocab
    m = jnp.max(L, axis=-1, keepdims=True)
    lse = m + jnp.log(jnp.sum(jnp.exp(L - m), axis=-1, keepdims=True))  # (Td*B, 1)
    tgt = tgt_ref[...]                                                  # (Td*B, 1) int32
    picked = jnp.sum(jnp.where(col == tgt, L, 0.0), axis=-1, keepdims=True)
    valid = (tgt != PAD).astype(f32)
    num = jnp.sum((lse - picked) * valid, axis=0, keepdims=True)        # (1, 1)
    den = jnp.sum(valid, axis=0, keepdims=True)
    # NOTE: if every target were PAD this is 0/0 (NaN), matching
    # torch.nn.CrossEntropyLoss(ignore_index=PAD) semantics.
    loss_ref[...] = num / den


# ----------------------------------------------------------------------------
# Wrapper: embeddings in XLA, everything else in the single fused kernel
# ----------------------------------------------------------------------------
@jax.jit
def seq2seq_forward(raw, kp, src_tokens, tgt_tokens):
    Ts, Bb = src_tokens.shape
    Td = tgt_tokens.shape[0] - 1

    # Lane/sublane-dense 2-D slabs straight into the kernel.
    src_emb = jnp.take(raw["emb_src"], src_tokens, axis=0).reshape(Ts * Bb, E_ENC)
    tgt_emb = jnp.take(raw["emb_tgt"], tgt_tokens[:-1], axis=0).reshape(Td * Bb, E_DEC)
    tgt_out = tgt_tokens[1:].reshape(Td * Bb, 1).astype(jnp.int32)       # one VMEM tile

    vmem = lambda: pl.BlockSpec(memory_space=pltpu.MemorySpace.VMEM)

    loss = pl.pallas_call(
        seq2seq_kernel,
        out_shape=jax.ShapeDtypeStruct((1, 1), jnp.float32),
        in_specs=[vmem() for _ in range(15)],
        out_specs=vmem(),
    )(src_emb, tgt_emb, tgt_out,
      kp["wih_enc"], kp["b_enc"], kp["whh_f"], kp["whh_b"],
      kp["init_w"], kp["init_b"], kp["proj"],
      kp["wih_x"], kp["b_dec"], kp["w_avh"], kp["comb"], kp["out_w"])
    return loss[0, 0]


# ----------------------------------------------------------------------------
# Parameters: raw (PyTorch layout) + transposed/fused kernel layout
# ----------------------------------------------------------------------------
def init_raw_params(key):
    ks = jax.random.split(key, 24)
    u = lambda k, shape, s: jax.random.uniform(k, shape, jnp.float32, -s, s)
    se, sd = 1.0 / math.sqrt(H_ENC), 1.0 / math.sqrt(H_DEC)
    si = 1.0 / math.sqrt(2 * H_ENC)

    emb_src = 0.1 * jax.random.normal(ks[0], (V_SRC, E_ENC), jnp.float32)
    emb_src = emb_src.at[PAD].set(0.0)          # padding_idx row zeroed
    emb_tgt = 0.1 * jax.random.normal(ks[1], (V_TGT, E_DEC), jnp.float32)
    emb_tgt = emb_tgt.at[PAD].set(0.0)

    raw = {
        "emb_src": emb_src, "emb_tgt": emb_tgt,
        # encoder bi-LSTM (PyTorch gate order i, f, g, o); biases pre-summed.
        "enc_wih_f": u(ks[2], (4 * H_ENC, E_ENC), se),
        "enc_whh_f": u(ks[3], (4 * H_ENC, H_ENC), se),
        "enc_b_f": u(ks[4], (4 * H_ENC,), se) + u(ks[5], (4 * H_ENC,), se),
        "enc_wih_b": u(ks[6], (4 * H_ENC, E_ENC), se),
        "enc_whh_b": u(ks[7], (4 * H_ENC, H_ENC), se),
        "enc_b_b": u(ks[8], (4 * H_ENC,), se) + u(ks[9], (4 * H_ENC,), se),
        # decoder init_cell: Linear(2*H_ENC -> H_DEC)
        "init_w": u(ks[10], (H_DEC, 2 * H_ENC), si),
        "init_b": u(ks[11], (H_DEC,), si),
        # decoder LSTMCell(E_DEC + H_DEC -> H_DEC), W_ih split into [word|ctx]
        "dec_wih_x": u(ks[12], (4 * H_DEC, E_DEC), sd),
        "dec_wih_c": u(ks[13], (4 * H_DEC, H_DEC), sd),
        "dec_whh": u(ks[14], (4 * H_DEC, H_DEC), sd),
        "dec_b": u(ks[15], (4 * H_DEC,), sd) + u(ks[16], (4 * H_DEC,), sd),
        # attention: proj_encoder (no bias), combine (no bias, split [h|ctx])
        "proj_w": u(ks[17], (H_DEC, 2 * H_ENC), si),
        "comb_h": u(ks[18], (H_DEC, H_DEC), sd),
        "comb_c": u(ks[19], (H_DEC, 2 * H_ENC), sd),
        # output: Linear(H_DEC -> V_TGT, no bias)
        "out_w": u(ks[20], (V_TGT, H_DEC), sd),
    }
    return raw


def prep_kernel_params(raw):
    """Transpose + fuse weights into the dense kernel layout (gates packed
    contiguously in PyTorch [i|f|g|o] order; per-step matmuls merged by
    stacking their weight rows; vocab padded to 128 lanes)."""
    f32 = jnp.float32
    He, Hd = H_ENC, H_DEC

    out_w = jnp.zeros((Hd, 128), f32).at[:, :V_TGT].set(raw["out_w"].T)

    return {
        # encoder: one input projection for both directions
        "wih_enc": jnp.concatenate([raw["enc_wih_f"].T, raw["enc_wih_b"].T],
                                   axis=1),                     # (E_ENC, 8He=128)
        "b_enc": jnp.concatenate([raw["enc_b_f"], raw["enc_b_b"]])[None, :],
        "whh_f": raw["enc_whh_f"].T,                            # (He, 4He)
        "whh_b": raw["enc_whh_b"].T,                            # (He, 4He)
        # decoder init_cell on [c_fwd | c_bwd]
        "init_w": raw["init_w"].T,                              # (2He, Hd)
        "init_b": raw["init_b"][None, :],                       # (1, Hd)
        # attention projection on [fwd | bwd] encodings
        "proj": raw["proj_w"].T,                                # (2He, Hd)
        # decoder LSTMCell: word part hoisted, [av | h] part merged
        "wih_x": raw["dec_wih_x"].T,                            # (E_DEC, 4Hd)
        "b_dec": raw["dec_b"][None, :],                         # (1, 4Hd)
        "w_avh": jnp.concatenate([raw["dec_wih_c"].T, raw["dec_whh"].T],
                                 axis=0),                       # (2Hd, 4Hd)
        # combine on [h | ctx]
        "comb": jnp.concatenate([raw["comb_h"].T, raw["comb_c"].T],
                                axis=0),                        # (Hd+2He, Hd)
        # output projection, vocab padded to a full lane span
        "out_w": out_w,                                         # (Hd, 128)
    }


# ----------------------------------------------------------------------------
# Pure-JAX reference (same math, unpadded) for a sanity check
# ----------------------------------------------------------------------------
@jax.jit
def reference_forward(raw, src_tokens, tgt_tokens):
    src_emb = jnp.take(raw["emb_src"], src_tokens, axis=0)
    _, Bb, _ = src_emb.shape

    def lstm_step(hc, x, wih, whh, b):
        h, c = hc
        gates = x @ wih.T + h @ whh.T + b
        i, f, g, o = jnp.split(gates, 4, axis=-1)
        c = jax.nn.sigmoid(f) * c + jax.nn.sigmoid(i) * jnp.tanh(g)
        h = jax.nn.sigmoid(o) * jnp.tanh(c)
        return (h, c), h

    z = (jnp.zeros((Bb, H_ENC), jnp.float32), jnp.zeros((Bb, H_ENC), jnp.float32))
    (_, cf), out_f = lax.scan(
        lambda hc, x: lstm_step(hc, x, raw["enc_wih_f"], raw["enc_whh_f"], raw["enc_b_f"]),
        z, src_emb)
    (_, cb), out_b_rev = lax.scan(
        lambda hc, x: lstm_step(hc, x, raw["enc_wih_b"], raw["enc_whh_b"], raw["enc_b_b"]),
        z, src_emb[::-1])
    out_b = out_b_rev[::-1]
    src_enc = jnp.concatenate([out_f, out_b], axis=-1)          # (Ts, B, 2He)

    init_cell = jnp.concatenate([cf, cb], axis=1) @ raw["init_w"].T + raw["init_b"]
    h, c = jnp.tanh(init_cell), init_cell

    src_enc_bm = jnp.transpose(src_enc, (1, 0, 2))              # (B, Ts, 2He)
    attn = jnp.einsum("bte,de->btd", src_enc_bm, raw["proj_w"])
    tgt_emb = jnp.take(raw["emb_tgt"], tgt_tokens[:-1], axis=0)
    av = jnp.zeros((Bb, H_DEC), jnp.float32)
    scores = []
    for t in range(tgt_emb.shape[0]):
        word = tgt_emb[t]
        gates = (word @ raw["dec_wih_x"].T + av @ raw["dec_wih_c"].T
                 + h @ raw["dec_whh"].T + raw["dec_b"])
        i, f, g, o = jnp.split(gates, 4, axis=-1)
        c = jax.nn.sigmoid(f) * c + jax.nn.sigmoid(i) * jnp.tanh(g)
        h = jax.nn.sigmoid(o) * jnp.tanh(c)
        logits = jnp.einsum("btd,bd->bt", attn, h)
        alpha = jax.nn.softmax(logits, axis=-1)
        ctx = jnp.einsum("bt,bte->be", alpha, src_enc_bm)
        av = jnp.tanh(h @ raw["comb_h"].T + ctx @ raw["comb_c"].T)
        scores.append(av @ raw["out_w"].T)
    scores = jnp.stack(scores)                                  # (Td, B, V)

    logits = scores.reshape(-1, V_TGT)
    tgt_out = tgt_tokens[1:].reshape(-1)
    lse = jax.nn.logsumexp(logits, axis=-1)
    picked = jnp.take_along_axis(logits, tgt_out[:, None], axis=1)[:, 0]
    valid = (tgt_out != PAD).astype(jnp.float32)
    return jnp.sum((lse - picked) * valid) / jnp.sum(valid)


# ----------------------------------------------------------------------------
if __name__ == "__main__":
    key = jax.random.PRNGKey(0)
    kparam, ksrc, ktgt = jax.random.split(key, 3)

    raw = init_raw_params(kparam)
    kp = prep_kernel_params(raw)

    # Token tensors in `to_tensor` layout: (T, B) int32, time-major.
    src_tokens = jax.random.randint(ksrc, (T_SRC, B), 1, V_SRC, dtype=jnp.int32)
    tgt_tokens = jax.random.randint(ktgt, (T_TGT, B), 1, V_TGT, dtype=jnp.int32)
    tgt_tokens = tgt_tokens.at[0, :].set(1)        # BOS-like token
    tgt_tokens = tgt_tokens.at[-1, 1].set(PAD)     # exercise ignore_index

    loss = jax.block_until_ready(seq2seq_forward(raw, kp, src_tokens, tgt_tokens))
    loss_ref = jax.block_until_ready(reference_forward(raw, src_tokens, tgt_tokens))

    np.testing.assert_allclose(np.asarray(loss), np.asarray(loss_ref),
                               rtol=1e-3, atol=1e-3)
    assert np.isfinite(np.asarray(loss))
    print("KERNEL_OK")
</pallas_src>

<mosaic_0001>
module attributes {stable_mosaic.version = 11 : i64} {
  func.func @seq2seq_kernel(%arg0: memref<16x16xf32, #tpu.memory_space<vmem>>, %arg1: memref<14x16xf32, #tpu.memory_space<vmem>>, %arg2: memref<14x1xi32, #tpu.memory_space<vmem>>, %arg3: memref<16x128xf32, #tpu.memory_space<vmem>>, %arg4: memref<1x128xf32, #tpu.memory_space<vmem>>, %arg5: memref<16x64xf32, #tpu.memory_space<vmem>>, %arg6: memref<16x64xf32, #tpu.memory_space<vmem>>, %arg7: memref<32x32xf32, #tpu.memory_space<vmem>>, %arg8: memref<1x32xf32, #tpu.memory_space<vmem>>, %arg9: memref<32x32xf32, #tpu.memory_space<vmem>>, %arg10: memref<16x128xf32, #tpu.memory_space<vmem>>, %arg11: memref<1x128xf32, #tpu.memory_space<vmem>>, %arg12: memref<64x128xf32, #tpu.memory_space<vmem>>, %arg13: memref<64x32xf32, #tpu.memory_space<vmem>>, %arg14: memref<32x128xf32, #tpu.memory_space<vmem>>, %arg15: memref<1x1xf32, #tpu.memory_space<vmem>>) attributes {dimension_semantics = [], scalar_prefetch = 0 : i64, scratch_operands = 0 : i64, tpu.core_type = #tpu.core_type<tc>} {
    %c0 = arith.constant 0 : index
    %c0_0 = arith.constant 0 : index
    %0 = vector.load %arg0[%c0, %c0_0] : memref<16x16xf32, #tpu.memory_space<vmem>>, vector<16x16xf32>
    %c0_1 = arith.constant 0 : index
    %c0_2 = arith.constant 0 : index
    %1 = vector.load %arg3[%c0_1, %c0_2] : memref<16x128xf32, #tpu.memory_space<vmem>>, vector<16x128xf32>
    %cst = arith.constant dense<0.000000e+00> : vector<16x128xf32>
    %2 = tpu.matmul %0, %1, %cst {dimension_numbers = #tpu.dot_dimension_numbers<[1], [0], [0], [1], [0, 0, 1, 1], [], []>} : vector<16x16xf32>, vector<16x128xf32>, vector<16x128xf32> -> vector<16x128xf32>
    %c0_3 = arith.constant 0 : index
    %c0_4 = arith.constant 0 : index
    %3 = vector.load %arg4[%c0_3, %c0_4] : memref<1x128xf32, #tpu.memory_space<vmem>>, vector<1x128xf32>
    %4 = vector.broadcast %3 : vector<1x128xf32> to vector<16x128xf32>
    %5 = arith.addf %2, %4 : vector<16x128xf32>
    %6 = vector.extract_strided_slice %5 {offsets = [0, 0], sizes = [16, 64], strides = [1, 1]} : vector<16x128xf32> to vector<16x64xf32>
    %7 = vector.extract_strided_slice %5 {offsets = [0, 64], sizes = [16, 64], strides = [1, 1]} : vector<16x128xf32> to vector<16x64xf32>
    %c0_5 = arith.constant 0 : index
    %c0_6 = arith.constant 0 : index
    %8 = vector.load %arg5[%c0_5, %c0_6] : memref<16x64xf32, #tpu.memory_space<vmem>>, vector<16x64xf32>
    %c0_7 = arith.constant 0 : index
    %c0_8 = arith.constant 0 : index
    %9 = vector.load %arg6[%c0_7, %c0_8] : memref<16x64xf32, #tpu.memory_space<vmem>>, vector<16x64xf32>
    %cst_9 = arith.constant 0.000000e+00 : f32
    %10 = vector.broadcast %cst_9 : f32 to vector<2x16xf32>
    %cst_10 = arith.constant 0.000000e+00 : f32
    %11 = vector.broadcast %cst_10 : f32 to vector<2x16xf32>
    %cst_11 = arith.constant 0.000000e+00 : f32
    %12 = vector.broadcast %cst_11 : f32 to vector<2x16xf32>
    %cst_12 = arith.constant 0.000000e+00 : f32
    %13 = vector.broadcast %cst_12 : f32 to vector<2x16xf32>
    %14 = vector.extract_strided_slice %6 {offsets = [0, 0], sizes = [2, 64], strides = [1, 1]} : vector<16x64xf32> to vector<2x64xf32>
    %cst_13 = arith.constant dense<0.000000e+00> : vector<2x64xf32>
    %15 = tpu.matmul %10, %8, %cst_13 {dimension_numbers = #tpu.dot_dimension_numbers<[1], [0], [0], [1], [0, 0, 1, 1], [], []>} : vector<2x16xf32>, vector<16x64xf32>, vector<2x64xf32> -> vector<2x64xf32>
    %16 = arith.addf %14, %15 : vector<2x64xf32>
    %17 = arith.negf %16 : vector<2x64xf32>
    %18 = math.exp %17 : vector<2x64xf32>
    %cst_14 = arith.constant 1.000000e+00 : f32
    %19 = vector.broadcast %cst_14 : f32 to vector<2x64xf32>
    %20 = arith.addf %19, %18 : vector<2x64xf32>
    %21 = arith.divf %19, %20 : vector<2x64xf32>
    %22 = math.tanh %16 : vector<2x64xf32>
    %23 = vector.extract_strided_slice %21 {offsets = [0, 0], sizes = [2, 16], strides = [1, 1]} : vector<2x64xf32> to vector<2x16xf32>
    %24 = vector.extract_strided_slice %21 {offsets = [0, 16], sizes = [2, 16], strides = [1, 1]} : vector<2x64xf32> to vector<2x16xf32>
    %25 = vector.extract_strided_slice %22 {offsets = [0, 32], sizes = [2, 16], strides = [1, 1]} : vector<2x64xf32> to vector<2x16xf32>
    %26 = vector.extract_strided_slice %21 {offsets = [0, 48], sizes = [2, 16], strides = [1, 1]} : vector<2x64xf32> to vector<2x16xf32>
    %27 = arith.mulf %24, %11 : vector<2x16xf32>
    %28 = arith.mulf %23, %25 : vector<2x16xf32>
    %29 = arith.addf %27, %28 : vector<2x16xf32>
    %30 = math.tanh %29 : vector<2x16xf32>
    %31 = arith.mulf %26, %30 : vector<2x16xf32>
    %32 = vector.extract_strided_slice %7 {offsets = [14, 0], sizes = [2, 64], strides = [1, 1]} : vector<16x64xf32> to vector<2x64xf32>
    %cst_15 = arith.constant dense<0.000000e+00> : vector<2x64xf32>
    %33 = tpu.matmul %12, %9, %cst_15 {dimension_numbers = #tpu.dot_dimension_numbers<[1], [0], [0], [1], [0, 0, 1, 1], [], []>} : vector<2x16xf32>, vector<16x64xf32>, vector<2x64xf32> -> vector<2x64xf32>
    %34 = arith.addf %32, %33 : vector<2x64xf32>
    %35 = arith.negf %34 : vector<2x64xf32>
    %36 = math.exp %35 : vector<2x64xf32>
    %cst_16 = arith.constant 1.000000e+00 : f32
    %37 = vector.broadcast %cst_16 : f32 to vector<2x64xf32>
    %38 = arith.addf %37, %36 : vector<2x64xf32>
    %39 = arith.divf %37, %38 : vector<2x64xf32>
    %40 = math.tanh %34 : vector<2x64xf32>
    %41 = vector.extract_strided_slice %39 {offsets = [0, 0], sizes = [2, 16], strides = [1, 1]} : vector<2x64xf32> to vector<2x16xf32>
    %42 = vector.extract_strided_slice %39 {offsets = [0, 16], sizes = [2, 16], strides = [1, 1]} : vector<2x64xf32> to vector<2x16xf32>
    %43 = vector.extract_strided_slice %40 {offsets = [0, 32], sizes = [2, 16], strides = [1, 1]} : vector<2x64xf32> to vector<2x16xf32>
    %44 = vector.extract_strided_slice %39 {offsets = [0, 48], sizes = [2, 16], strides = [1, 1]} : vector<2x64xf32> to vector<2x16xf32>
    %45 = arith.mulf %42, %13 : vector<2x16xf32>
    %46 = arith.mulf %41, %43 : vector<2x16xf32>
    %47 = arith.addf %45, %46 : vector<2x16xf32>
    %48 = math.tanh %47 : vector<2x16xf32>
    %49 = arith.mulf %44, %48 : vector<2x16xf32>
    %50 = vector.extract_strided_slice %6 {offsets = [2, 0], sizes = [2, 64], strides = [1, 1]} : vector<16x64xf32> to vector<2x64xf32>
    %cst_17 = arith.constant dense<0.000000e+00> : vector<2x64xf32>
    %51 = tpu.matmul %31, %8, %cst_17 {dimension_numbers = #tpu.dot_dimension_numbers<[1], [0], [0], [1], [0, 0, 1, 1], [], []>} : vector<2x16xf32>, vector<16x64xf32>, vector<2x64xf32> -> vector<2x64xf32>
    %52 = arith.addf %50, %51 : vector<2x64xf32>
    %53 = arith.negf %52 : vector<2x64xf32>
    %54 = math.exp %53 : vector<2x64xf32>
    %cst_18 = arith.constant 1.000000e+00 : f32
    %55 = vector.broadcast %cst_18 : f32 to vector<2x64xf32>
    %56 = arith.addf %55, %54 : vector<2x64xf32>
    %57 = arith.divf %55, %56 : vector<2x64xf32>
    %58 = math.tanh %52 : vector<2x64xf32>
    %59 = vector.extract_strided_slice %57 {offsets = [0, 0], sizes = [2, 16], strides = [1, 1]} : vector<2x64xf32> to vector<2x16xf32>
    %60 = vector.extract_strided_slice %57 {offsets = [0, 16], sizes = [2, 16], strides = [1, 1]} : vector<2x64xf32> to vector<2x16xf32>
    %61 = vector.extract_strided_slice %58 {offsets = [0, 32], sizes = [2, 16], strides = [1, 1]} : vector<2x64xf32> to vector<2x16xf32>
    %62 = vector.extract_strided_slice %57 {offsets = [0, 48], sizes = [2, 16], strides = [1, 1]} : vector<2x64xf32> to vector<2x16xf32>
    %63 = arith.mulf %60, %29 : vector<2x16xf32>
    %64 = arith.mulf %59, %61 : vector<2x16xf32>
    %65 = arith.addf %63, %64 : vector<2x16xf32>
    %66 = math.tanh %65 : vector<2x16xf32>
    %67 = arith.mulf %62, %66 : vector<2x16xf32>
    %68 = vector.extract_strided_slice %7 {offsets = [12, 0], sizes = [2, 64], strides = [1, 1]} : vector<16x64xf32> to vector<2x64xf32>
    %cst_19 = arith.constant dense<0.000000e+00> : vector<2x64xf32>
    %69 = tpu.matmul %49, %9, %cst_19 {dimension_numbers = #tpu.dot_dimension_numbers<[1], [0], [0], [1], [0, 0, 1, 1], [], []>} : vector<2x16xf32>, vector<16x64xf32>, vector<2x64xf32> -> vector<2x64xf32>
    %70 = arith.addf %68, %69 : vector<2x64xf32>
    %71 = arith.negf %70 : vector<2x64xf32>
    %72 = math.exp %71 : vector<2x64xf32>
    %cst_20 = arith.constant 1.000000e+00 : f32
    %73 = vector.broadcast %cst_20 : f32 to vector<2x64xf32>
    %74 = arith.addf %73, %72 : vector<2x64xf32>
    %75 = arith.divf %73, %74 : vector<2x64xf32>
    %76 = math.tanh %70 : vector<2x64xf32>
    %77 = vector.extract_strided_slice %75 {offsets = [0, 0], sizes = [2, 16], strides = [1, 1]} : vector<2x64xf32> to vector<2x16xf32>
    %78 = vector.extract_strided_slice %75 {offsets = [0, 16], sizes = [2, 16], strides = [1, 1]} : vector<2x64xf32> to vector<2x16xf32>
    %79 = vector.extract_strided_slice %76 {offsets = [0, 32], sizes = [2, 16], strides = [1, 1]} : vector<2x64xf32> to vector<2x16xf32>
    %80 = vector.extract_strided_slice %75 {offsets = [0, 48], sizes = [2, 16], strides = [1, 1]} : vector<2x64xf32> to vector<2x16xf32>
    %81 = arith.mulf %78, %47 : vector<2x16xf32>
    %82 = arith.mulf %77, %79 : vector<2x16xf32>
    %83 = arith.addf %81, %82 : vector<2x16xf32>
    %84 = math.tanh %83 : vector<2x16xf32>
    %85 = arith.mulf %80, %84 : vector<2x16xf32>
    %86 = vector.extract_strided_slice %6 {offsets = [4, 0], sizes = [2, 64], strides = [1, 1]} : vector<16x64xf32> to vector<2x64xf32>
    %cst_21 = arith.constant dense<0.000000e+00> : vector<2x64xf32>
    %87 = tpu.matmul %67, %8, %cst_21 {dimension_numbers = #tpu.dot_dimension_numbers<[1], [0], [0], [1], [0, 0, 1, 1], [], []>} : vector<2x16xf32>, vector<16x64xf32>, vector<2x64xf32> -> vector<2x64xf32>
    %88 = arith.addf %86, %87 : vector<2x64xf32>
    %89 = arith.negf %88 : vector<2x64xf32>
    %90 = math.exp %89 : vector<2x64xf32>
    %cst_22 = arith.constant 1.000000e+00 : f32
    %91 = vector.broadcast %cst_22 : f32 to vector<2x64xf32>
    %92 = arith.addf %91, %90 : vector<2x64xf32>
    %93 = arith.divf %91, %92 : vector<2x64xf32>
    %94 = math.tanh %88 : vector<2x64xf32>
    %95 = vector.extract_strided_slice %93 {offsets = [0, 0], sizes = [2, 16], strides = [1, 1]} : vector<2x64xf32> to vector<2x16xf32>
    %96 = vector.extract_strided_slice %93 {offsets = [0, 16], sizes = [2, 16], strides = [1, 1]} : vector<2x64xf32> to vector<2x16xf32>
    %97 = vector.extract_strided_slice %94 {offsets = [0, 32], sizes = [2, 16], strides = [1, 1]} : vector<2x64xf32> to vector<2x16xf32>
    %98 = vector.extract_strided_slice %93 {offsets = [0, 48], sizes = [2, 16], strides = [1, 1]} : vector<2x64xf32> to vector<2x16xf32>
    %99 = arith.mulf %96, %65 : vector<2x16xf32>
    %100 = arith.mulf %95, %97 : vector<2x16xf32>
    %101 = arith.addf %99, %100 : vector<2x16xf32>
    %102 = math.tanh %101 : vector<2x16xf32>
    %103 = arith.mulf %98, %102 : vector<2x16xf32>
    %104 = vector.extract_strided_slice %7 {offsets = [10, 0], sizes = [2, 64], strides = [1, 1]} : vector<16x64xf32> to vector<2x64xf32>
    %cst_23 = arith.constant dense<0.000000e+00> : vector<2x64xf32>
    %105 = tpu.matmul %85, %9, %cst_23 {dimension_numbers = #tpu.dot_dimension_numbers<[1], [0], [0], [1], [0, 0, 1, 1], [], []>} : vector<2x16xf32>, vector<16x64xf32>, vector<2x64xf32> -> vector<2x64xf32>
    %106 = arith.addf %104, %105 : vector<2x64xf32>
    %107 = arith.negf %106 : vector<2x64xf32>
    %108 = math.exp %107 : vector<2x64xf32>
    %cst_24 = arith.constant 1.000000e+00 : f32
    %109 = vector.broadcast %cst_24 : f32 to vector<2x64xf32>
    %110 = arith.addf %109, %108 : vector<2x64xf32>
    %111 = arith.divf %109, %110 : vector<2x64xf32>
    %112 = math.tanh %106 : vector<2x64xf32>
    %113 = vector.extract_strided_slice %111 {offsets = [0, 0], sizes = [2, 16], strides = [1, 1]} : vector<2x64xf32> to vector<2x16xf32>
    %114 = vector.extract_strided_slice %111 {offsets = [0, 16], sizes = [2, 16], strides = [1, 1]} : vector<2x64xf32> to vector<2x16xf32>
    %115 = vector.extract_strided_slice %112 {offsets = [0, 32], sizes = [2, 16], strides = [1, 1]} : vector<2x64xf32> to vector<2x16xf32>
    %116 = vector.extract_strided_slice %111 {offsets = [0, 48], sizes = [2, 16], strides = [1, 1]} : vector<2x64xf32> to vector<2x16xf32>
    %117 = arith.mulf %114, %83 : vector<2x16xf32>
    %118 = arith.mulf %113, %115 : vector<2x16xf32>
    %119 = arith.addf %117, %118 : vector<2x16xf32>
    %120 = math.tanh %119 : vector<2x16xf32>
    %121 = arith.mulf %116, %120 : vector<2x16xf32>
    %122 = vector.extract_strided_slice %6 {offsets = [6, 0], sizes = [2, 64], strides = [1, 1]} : vector<16x64xf32> to vector<2x64xf32>
    %cst_25 = arith.constant dense<0.000000e+00> : vector<2x64xf32>
    %123 = tpu.matmul %103, %8, %cst_25 {dimension_numbers = #tpu.dot_dimension_numbers<[1], [0], [0], [1], [0, 0, 1, 1], [], []>} : vector<2x16xf32>, vector<16x64xf32>, vector<2x64xf32> -> vector<2x64xf32>
    %124 = arith.addf %122, %123 : vector<2x64xf32>
    %125 = arith.negf %124 : vector<2x64xf32>
    %126 = math.exp %125 : vector<2x64xf32>
    %cst_26 = arith.constant 1.000000e+00 : f32
    %127 = vector.broadcast %cst_26 : f32 to vector<2x64xf32>
    %128 = arith.addf %127, %126 : vector<2x64xf32>
    %129 = arith.divf %127, %128 : vector<2x64xf32>
    %130 = math.tanh %124 : vector<2x64xf32>
    %131 = vector.extract_strided_slice %129 {offsets = [0, 0], sizes = [2, 16], strides = [1, 1]} : vector<2x64xf32> to vector<2x16xf32>
    %132 = vector.extract_strided_slice %129 {offsets = [0, 16], sizes = [2, 16], strides = [1, 1]} : vector<2x64xf32> to vector<2x16xf32>
    %133 = vector.extract_strided_slice %130 {offsets = [0, 32], sizes = [2, 16], strides = [1, 1]} : vector<2x64xf32> to vector<2x16xf32>
    %134 = vector.extract_strided_slice %129 {offsets = [0, 48], sizes = [2, 16], strides = [1, 1]} : vector<2x64xf32> to vector<2x16xf32>
    %135 = arith.mulf %132, %101 : vector<2x16xf32>
    %136 = arith.mulf %131, %133 : vector<2x16xf32>
    %137 = arith.addf %135, %136 : vector<2x16xf32>
    %138 = math.tanh %137 : vector<2x16xf32>
    %139 = arith.mulf %134, %138 : vector<2x16xf32>
    %140 = vector.extract_strided_slice %7 {offsets = [8, 0], sizes = [2, 64], strides = [1, 1]} : vector<16x64xf32> to vector<2x64xf32>
    %cst_27 = arith.constant dense<0.000000e+00> : vector<2x64xf32>
    %141 = tpu.matmul %121, %9, %cst_27 {dimension_numbers = #tpu.dot_dimension_numbers<[1], [0], [0], [1], [0, 0, 1, 1], [], []>} : vector<2x16xf32>, vector<16x64xf32>, vector<2x64xf32> -> vector<2x64xf32>
    %142 = arith.addf %140, %141 : vector<2x64xf32>
    %143 = arith.negf %142 : vector<2x64xf32>
    %144 = math.exp %143 : vector<2x64xf32>
    %cst_28 = arith.constant 1.000000e+00 : f32
    %145 = vector.broadcast %cst_28 : f32 to vector<2x64xf32>
    %146 = arith.addf %145, %144 : vector<2x64xf32>
    %147 = arith.divf %145, %146 : vector<2x64xf32>
    %148 = math.tanh %142 : vector<2x64xf32>
    %149 = vector.extract_strided_slice %147 {offsets = [0, 0], sizes = [2, 16], strides = [1, 1]} : vector<2x64xf32> to vector<2x16xf32>
    %150 = vector.extract_strided_slice %147 {offsets = [0, 16], sizes = [2, 16], strides = [1, 1]} : vector<2x64xf32> to vector<2x16xf32>
    %151 = vector.extract_strided_slice %148 {offsets = [0, 32], sizes = [2, 16], strides = [1, 1]} : vector<2x64xf32> to vector<2x16xf32>
    %152 = vector.extract_strided_slice %147 {offsets = [0, 48], sizes = [2, 16], strides = [1, 1]} : vector<2x64xf32> to vector<2x16xf32>
    %153 = arith.mulf %150, %119 : vector<2x16xf32>
    %154 = arith.mulf %149, %151 : vector<2x16xf32>
    %155 = arith.addf %153, %154 : vector<2x16xf32>
    %156 = math.tanh %155 : vector<2x16xf32>
    %157 = arith.mulf %152, %156 : vector<2x16xf32>
    %158 = vector.extract_strided_slice %6 {offsets = [8, 0], sizes = [2, 64], strides = [1, 1]} : vector<16x64xf32> to vector<2x64xf32>
    %cst_29 = arith.constant dense<0.000000e+00> : vector<2x64xf32>
    %159 = tpu.matmul %139, %8, %cst_29 {dimension_numbers = #tpu.dot_dimension_numbers<[1], [0], [0], [1], [0, 0, 1, 1], [], []>} : vector<2x16xf32>, vector<16x64xf32>, vector<2x64xf32> -> vector<2x64xf32>
    %160 = arith.addf %158, %159 : vector<2x64xf32>
    %161 = arith.negf %160 : vector<2x64xf32>
    %162 = math.exp %161 : vector<2x64xf32>
    %cst_30 = arith.constant 1.000000e+00 : f32
    %163 = vector.broadcast %cst_30 : f32 to vector<2x64xf32>
    %164 = arith.addf %163, %162 : vector<2x64xf32>
    %165 = arith.divf %163, %164 : vector<2x64xf32>
    %166 = math.tanh %160 : vector<2x64xf32>
    %167 = vector.extract_strided_slice %165 {offsets = [0, 0], sizes = [2, 16], strides = [1, 1]} : vector<2x64xf32> to vector<2x16xf32>
    %168 = vector.extract_strided_slice %165 {offsets = [0, 16], sizes = [2, 16], strides = [1, 1]} : vector<2x64xf32> to vector<2x16xf32>
    %169 = vector.extract_strided_slice %166 {offsets = [0, 32], sizes = [2, 16], strides = [1, 1]} : vector<2x64xf32> to vector<2x16xf32>
    %170 = vector.extract_strided_slice %165 {offsets = [0, 48], sizes = [2, 16], strides = [1, 1]} : vector<2x64xf32> to vector<2x16xf32>
    %171 = arith.mulf %168, %137 : vector<2x16xf32>
    %172 = arith.mulf %167, %169 : vector<2x16xf32>
    %173 = arith.addf %171, %172 : vector<2x16xf32>
    %174 = math.tanh %173 : vector<2x16xf32>
    %175 = arith.mulf %170, %174 : vector<2x16xf32>
    %176 = vector.extract_strided_slice %7 {offsets = [6, 0], sizes = [2, 64], strides = [1, 1]} : vector<16x64xf32> to vector<2x64xf32>
    %cst_31 = arith.constant dense<0.000000e+00> : vector<2x64xf32>
    %177 = tpu.matmul %157, %9, %cst_31 {dimension_numbers = #tpu.dot_dimension_numbers<[1], [0], [0], [1], [0, 0, 1, 1], [], []>} : vector<2x16xf32>, vector<16x64xf32>, vector<2x64xf32> -> vector<2x64xf32>
    %178 = arith.addf %176, %177 : vector<2x64xf32>
    %179 = arith.negf %178 : vector<2x64xf32>
    %180 = math.exp %179 : vector<2x64xf32>
    %cst_32 = arith.constant 1.000000e+00 : f32
    %181 = vector.broadcast %cst_32 : f32 to vector<2x64xf32>
    %182 = arith.addf %181, %180 : vector<2x64xf32>
    %183 = arith.divf %181, %182 : vector<2x64xf32>
    %184 = math.tanh %178 : vector<2x64xf32>
    %185 = vector.extract_strided_slice %183 {offsets = [0, 0], sizes = [2, 16], strides = [1, 1]} : vector<2x64xf32> to vector<2x16xf32>
    %186 = vector.extract_strided_slice %183 {offsets = [0, 16], sizes = [2, 16], strides = [1, 1]} : vector<2x64xf32> to vector<2x16xf32>
    %187 = vector.extract_strided_slice %184 {offsets = [0, 32], sizes = [2, 16], strides = [1, 1]} : vector<2x64xf32> to vector<2x16xf32>
    %188 = vector.extract_strided_slice %183 {offsets = [0, 48], sizes = [2, 16], strides = [1, 1]} : vector<2x64xf32> to vector<2x16xf32>
    %189 = arith.mulf %186, %155 : vector<2x16xf32>
    %190 = arith.mulf %185, %187 : vector<2x16xf32>
    %191 = arith.addf %189, %190 : vector<2x16xf32>
    %192 = math.tanh %191 : vector<2x16xf32>
    %193 = arith.mulf %188, %192 : vector<2x16xf32>
    %194 = vector.extract_strided_slice %6 {offsets = [10, 0], sizes = [2, 64], strides = [1, 1]} : vector<16x64xf32> to vector<2x64xf32>
    %cst_33 = arith.constant dense<0.000000e+00> : vector<2x64xf32>
    %195 = tpu.matmul %175, %8, %cst_33 {dimension_numbers = #tpu.dot_dimension_numbers<[1], [0], [0], [1], [0, 0, 1, 1], [], []>} : vector<2x16xf32>, vector<16x64xf32>, vector<2x64xf32> -> vector<2x64xf32>
    %196 = arith.addf %194, %195 : vector<2x64xf32>
    %197 = arith.negf %196 : vector<2x64xf32>
    %198 = math.exp %197 : vector<2x64xf32>
    %cst_34 = arith.constant 1.000000e+00 : f32
    %199 = vector.broadcast %cst_34 : f32 to vector<2x64xf32>
    %200 = arith.addf %199, %198 : vector<2x64xf32>
    %201 = arith.divf %199, %200 : vector<2x64xf32>
    %202 = math.tanh %196 : vector<2x64xf32>
    %203 = vector.extract_strided_slice %201 {offsets = [0, 0], sizes = [2, 16], strides = [1, 1]} : vector<2x64xf32> to vector<2x16xf32>
    %204 = vector.extract_strided_slice %201 {offsets = [0, 16], sizes = [2, 16], strides = [1, 1]} : vector<2x64xf32> to vector<2x16xf32>
    %205 = vector.extract_strided_slice %202 {offsets = [0, 32], sizes = [2, 16], strides = [1, 1]} : vector<2x64xf32> to vector<2x16xf32>
    %206 = vector.extract_strided_slice %201 {offsets = [0, 48], sizes = [2, 16], strides = [1, 1]} : vector<2x64xf32> to vector<2x16xf32>
    %207 = arith.mulf %204, %173 : vector<2x16xf32>
    %208 = arith.mulf %203, %205 : vector<2x16xf32>
    %209 = arith.addf %207, %208 : vector<2x16xf32>
    %210 = math.tanh %209 : vector<2x16xf32>
    %211 = arith.mulf %206, %210 : vector<2x16xf32>
    %212 = vector.extract_strided_slice %7 {offsets = [4, 0], sizes = [2, 64], strides = [1, 1]} : vector<16x64xf32> to vector<2x64xf32>
    %cst_35 = arith.constant dense<0.000000e+00> : vector<2x64xf32>
    %213 = tpu.matmul %193, %9, %cst_35 {dimension_numbers = #tpu.dot_dimension_numbers<[1], [0], [0], [1], [0, 0, 1, 1], [], []>} : vector<2x16xf32>, vector<16x64xf32>, vector<2x64xf32> -> vector<2x64xf32>
    %214 = arith.addf %212, %213 : vector<2x64xf32>
    %215 = arith.negf %214 : vector<2x64xf32>
    %216 = math.exp %215 : vector<2x64xf32>
    %cst_36 = arith.constant 1.000000e+00 : f32
    %217 = vector.broadcast %cst_36 : f32 to vector<2x64xf32>
    %218 = arith.addf %217, %216 : vector<2x64xf32>
    %219 = arith.divf %217, %218 : vector<2x64xf32>
    %220 = math.tanh %214 : vector<2x64xf32>
    %221 = vector.extract_strided_slice %219 {offsets = [0, 0], sizes = [2, 16], strides = [1, 1]} : vector<2x64xf32> to vector<2x16xf32>
    %222 = vector.extract_strided_slice %219 {offsets = [0, 16], sizes = [2, 16], strides = [1, 1]} : vector<2x64xf32> to vector<2x16xf32>
    %223 = vector.extract_strided_slice %220 {offsets = [0, 32], sizes = [2, 16], strides = [1, 1]} : vector<2x64xf32> to vector<2x16xf32>
    %224 = vector.extract_strided_slice %219 {offsets = [0, 48], sizes = [2, 16], strides = [1, 1]} : vector<2x64xf32> to vector<2x16xf32>
    %225 = arith.mulf %222, %191 : vector<2x16xf32>
    %226 = arith.mulf %221, %223 : vector<2x16xf32>
    %227 = arith.addf %225, %226 : vector<2x16xf32>
    %228 = math.tanh %227 : vector<2x16xf32>
    %229 = arith.mulf %224, %228 : vector<2x16xf32>
    %230 = vector.extract_strided_slice %6 {offsets = [12, 0], sizes = [2, 64], strides = [1, 1]} : vector<16x64xf32> to vector<2x64xf32>
    %cst_37 = arith.constant dense<0.000000e+00> : vector<2x64xf32>
    %231 = tpu.matmul %211, %8, %cst_37 {dimension_numbers = #tpu.dot_dimension_numbers<[1], [0], [0], [1], [0, 0, 1, 1], [], []>} : vector<2x16xf32>, vector<16x64xf32>, vector<2x64xf32> -> vector<2x64xf32>
    %232 = arith.addf %230, %231 : vector<2x64xf32>
    %233 = arith.negf %232 : vector<2x64xf32>
    %234 = math.exp %233 : vector<2x64xf32>
    %cst_38 = arith.constant 1.000000e+00 : f32
    %235 = vector.broadcast %cst_38 : f32 to vector<2x64xf32>
    %236 = arith.addf %235, %234 : vector<2x64xf32>
    %237 = arith.divf %235, %236 : vector<2x64xf32>
    %238 = math.tanh %232 : vector<2x64xf32>
    %239 = vector.extract_strided_slice %237 {offsets = [0, 0], sizes = [2, 16], strides = [1, 1]} : vector<2x64xf32> to vector<2x16xf32>
    %240 = vector.extract_strided_slice %237 {offsets = [0, 16], sizes = [2, 16], strides = [1, 1]} : vector<2x64xf32> to vector<2x16xf32>
    %241 = vector.extract_strided_slice %238 {offsets = [0, 32], sizes = [2, 16], strides = [1, 1]} : vector<2x64xf32> to vector<2x16xf32>
    %242 = vector.extract_strided_slice %237 {offsets = [0, 48], sizes = [2, 16], strides = [1, 1]} : vector<2x64xf32> to vector<2x16xf32>
    %243 = arith.mulf %240, %209 : vector<2x16xf32>
    %244 = arith.mulf %239, %241 : vector<2x16xf32>
    %245 = arith.addf %243, %244 : vector<2x16xf32>
    %246 = math.tanh %245 : vector<2x16xf32>
    %247 = arith.mulf %242, %246 : vector<2x16xf32>
    %248 = vector.extract_strided_slice %7 {offsets = [2, 0], sizes = [2, 64], strides = [1, 1]} : vector<16x64xf32> to vector<2x64xf32>
    %cst_39 = arith.constant dense<0.000000e+00> : vector<2x64xf32>
    %249 = tpu.matmul %229, %9, %cst_39 {dimension_numbers = #tpu.dot_dimension_numbers<[1], [0], [0], [1], [0, 0, 1, 1], [], []>} : vector<2x16xf32>, vector<16x64xf32>, vector<2x64xf32> -> vector<2x64xf32>
    %250 = arith.addf %248, %249 : vector<2x64xf32>
    %251 = arith.negf %250 : vector<2x64xf32>
    %252 = math.exp %251 : vector<2x64xf32>
    %cst_40 = arith.constant 1.000000e+00 : f32
    %253 = vector.broadcast %cst_40 : f32 to vector<2x64xf32>
    %254 = arith.addf %253, %252 : vector<2x64xf32>
    %255 = arith.divf %253, %254 : vector<2x64xf32>
    %256 = math.tanh %250 : vector<2x64xf32>
    %257 = vector.extract_strided_slice %255 {offsets = [0, 0], sizes = [2, 16], strides = [1, 1]} : vector<2x64xf32> to vector<2x16xf32>
    %258 = vector.extract_strided_slice %255 {offsets = [0, 16], sizes = [2, 16], strides = [1, 1]} : vector<2x64xf32> to vector<2x16xf32>
    %259 = vector.extract_strided_slice %256 {offsets = [0, 32], sizes = [2, 16], strides = [1, 1]} : vector<2x64xf32> to vector<2x16xf32>
    %260 = vector.extract_strided_slice %255 {offsets = [0, 48], sizes = [2, 16], strides = [1, 1]} : vector<2x64xf32> to vector<2x16xf32>
    %261 = arith.mulf %258, %227 : vector<2x16xf32>
    %262 = arith.mulf %257, %259 : vector<2x16xf32>
    %263 = arith.addf %261, %262 : vector<2x16xf32>
    %264 = math.tanh %263 : vector<2x16xf32>
    %265 = arith.mulf %260, %264 : vector<2x16xf32>
    %266 = vector.extract_strided_slice %6 {offsets = [14, 0], sizes = [2, 64], strides = [1, 1]} : vector<16x64xf32> to vector<2x64xf32>
    %cst_41 = arith.constant dense<0.000000e+00> : vector<2x64xf32>
    %267 = tpu.matmul %247, %8, %cst_41 {dimension_numbers = #tpu.dot_dimension_numbers<[1], [0], [0], [1], [0, 0, 1, 1], [], []>} : vector<2x16xf32>, vector<16x64xf32>, vector<2x64xf32> -> vector<2x64xf32>
    %268 = arith.addf %266, %267 : vector<2x64xf32>
    %269 = arith.negf %268 : vector<2x64xf32>
    %270 = math.exp %269 : vector<2x64xf32>
    %cst_42 = arith.constant 1.000000e+00 : f32
    %271 = vector.broadcast %cst_42 : f32 to vector<2x64xf32>
    %272 = arith.addf %271, %270 : vector<2x64xf32>
    %273 = arith.divf %271, %272 : vector<2x64xf32>
    %274 = math.tanh %268 : vector<2x64xf32>
    %275 = vector.extract_strided_slice %273 {offsets = [0, 0], sizes = [2, 16], strides = [1, 1]} : vector<2x64xf32> to vector<2x16xf32>
    %276 = vector.extract_strided_slice %273 {offsets = [0, 16], sizes = [2, 16], strides = [1, 1]} : vector<2x64xf32> to vector<2x16xf32>
    %277 = vector.extract_strided_slice %274 {offsets = [0, 32], sizes = [2, 16], strides = [1, 1]} : vector<2x64xf32> to vector<2x16xf32>
    %278 = vector.extract_strided_slice %273 {offsets = [0, 48], sizes = [2, 16], strides = [1, 1]} : vector<2x64xf32> to vector<2x16xf32>
    %279 = arith.mulf %276, %245 : vector<2x16xf32>
    %280 = arith.mulf %275, %277 : vector<2x16xf32>
    %281 = arith.addf %279, %280 : vector<2x16xf32>
    %282 = math.tanh %281 : vector<2x16xf32>
    %283 = arith.mulf %278, %282 : vector<2x16xf32>
    %284 = vector.extract_strided_slice %7 {offsets = [0, 0], sizes = [2, 64], strides = [1, 1]} : vector<16x64xf32> to vector<2x64xf32>
    %cst_43 = arith.constant dense<0.000000e+00> : vector<2x64xf32>
    %285 = tpu.matmul %265, %9, %cst_43 {dimension_numbers = #tpu.dot_dimension_numbers<[1], [0], [0], [1], [0, 0, 1, 1], [], []>} : vector<2x16xf32>, vector<16x64xf32>, vector<2x64xf32> -> vector<2x64xf32>
    %286 = arith.addf %284, %285 : vector<2x64xf32>
    %287 = arith.negf %286 : vector<2x64xf32>
    %288 = math.exp %287 : vector<2x64xf32>
    %cst_44 = arith.constant 1.000000e+00 : f32
    %289 = vector.broadcast %cst_44 : f32 to vector<2x64xf32>
    %290 = arith.addf %289, %288 : vector<2x64xf32>
    %291 = arith.divf %289, %290 : vector<2x64xf32>
    %292 = math.tanh %286 : vector<2x64xf32>
    %293 = vector.extract_strided_slice %291 {offsets = [0, 0], sizes = [2, 16], strides = [1, 1]} : vector<2x64xf32> to vector<2x16xf32>
    %294 = vector.extract_strided_slice %291 {offsets = [0, 16], sizes = [2, 16], strides = [1, 1]} : vector<2x64xf32> to vector<2x16xf32>
    %295 = vector.extract_strided_slice %292 {offsets = [0, 32], sizes = [2, 16], strides = [1, 1]} : vector<2x64xf32> to vector<2x16xf32>
    %296 = vector.extract_strided_slice %291 {offsets = [0, 48], sizes = [2, 16], strides = [1, 1]} : vector<2x64xf32> to vector<2x16xf32>
    %297 = arith.mulf %294, %263 : vector<2x16xf32>
    %298 = arith.mulf %293, %295 : vector<2x16xf32>
    %299 = arith.addf %297, %298 : vector<2x16xf32>
    %300 = math.tanh %299 : vector<2x16xf32>
    %301 = arith.mulf %296, %300 : vector<2x16xf32>
    %302 = tpu.concatenate %31, %301 in 1 : vector<2x16xf32>, vector<2x16xf32> -> vector<2x32xf32>
    %303 = tpu.concatenate %67, %265 in 1 : vector<2x16xf32>, vector<2x16xf32> -> vector<2x32xf32>
    %304 = tpu.concatenate %103, %229 in 1 : vector<2x16xf32>, vector<2x16xf32> -> vector<2x32xf32>
    %305 = tpu.concatenate %139, %193 in 1 : vector<2x16xf32>, vector<2x16xf32> -> vector<2x32xf32>
    %306 = tpu.concatenate %175, %157 in 1 : vector<2x16xf32>, vector<2x16xf32> -> vector<2x32xf32>
    %307 = tpu.concatenate %211, %121 in 1 : vector<2x16xf32>, vector<2x16xf32> -> vector<2x32xf32>
    %308 = tpu.concatenate %247, %85 in 1 : vector<2x16xf32>, vector<2x16xf32> -> vector<2x32xf32>
    %309 = tpu.concatenate %283, %49 in 1 : vector<2x16xf32>, vector<2x16xf32> -> vector<2x32xf32>
    %310 = vector.extract_strided_slice %302 {offsets = [0, 0], sizes = [1, 32], strides = [1, 1]} : vector<2x32xf32> to vector<1x32xf32>
    %311 = vector.extract_strided_slice %303 {offsets = [0, 0], sizes = [1, 32], strides = [1, 1]} : vector<2x32xf32> to vector<1x32xf32>
    %312 = vector.extract_strided_slice %304 {offsets = [0, 0], sizes = [1, 32], strides = [1, 1]} : vector<2x32xf32> to vector<1x32xf32>
    %313 = vector.extract_strided_slice %305 {offsets = [0, 0], sizes = [1, 32], strides = [1, 1]} : vector<2x32xf32> to vector<1x32xf32>
    %314 = vector.extract_strided_slice %306 {offsets = [0, 0], sizes = [1, 32], strides = [1, 1]} : vector<2x32xf32> to vector<1x32xf32>
    %315 = vector.extract_strided_slice %307 {offsets = [0, 0], sizes = [1, 32], strides = [1, 1]} : vector<2x32xf32> to vector<1x32xf32>
    %316 = vector.extract_strided_slice %308 {offsets = [0, 0], sizes = [1, 32], strides = [1, 1]} : vector<2x32xf32> to vector<1x32xf32>
    %317 = vector.extract_strided_slice %309 {offsets = [0, 0], sizes = [1, 32], strides = [1, 1]} : vector<2x32xf32> to vector<1x32xf32>
    %318 = vector.extract_strided_slice %302 {offsets = [1, 0], sizes = [1, 32], strides = [1, 1]} : vector<2x32xf32> to vector<1x32xf32>
    %319 = vector.extract_strided_slice %303 {offsets = [1, 0], sizes = [1, 32], strides = [1, 1]} : vector<2x32xf32> to vector<1x32xf32>
    %320 = vector.extract_strided_slice %304 {offsets = [1, 0], sizes = [1, 32], strides = [1, 1]} : vector<2x32xf32> to vector<1x32xf32>
    %321 = vector.extract_strided_slice %305 {offsets = [1, 0], sizes = [1, 32], strides = [1, 1]} : vector<2x32xf32> to vector<1x32xf32>
    %322 = vector.extract_strided_slice %306 {offsets = [1, 0], sizes = [1, 32], strides = [1, 1]} : vector<2x32xf32> to vector<1x32xf32>
    %323 = vector.extract_strided_slice %307 {offsets = [1, 0], sizes = [1, 32], strides = [1, 1]} : vector<2x32xf32> to vector<1x32xf32>
    %324 = vector.extract_strided_slice %308 {offsets = [1, 0], sizes = [1, 32], strides = [1, 1]} : vector<2x32xf32> to vector<1x32xf32>
    %325 = vector.extract_strided_slice %309 {offsets = [1, 0], sizes = [1, 32], strides = [1, 1]} : vector<2x32xf32> to vector<1x32xf32>
    %326 = tpu.concatenate %310, %311, %312, %313, %314, %315, %316, %317, %318, %319, %320, %321, %322, %323, %324, %325 in 0 : vector<1x32xf32>, vector<1x32xf32>, vector<1x32xf32>, vector<1x32xf32>, vector<1x32xf32>, vector<1x32xf32>, vector<1x32xf32>, vector<1x32xf32>, vector<1x32xf32>, vector<1x32xf32>, vector<1x32xf32>, vector<1x32xf32>, vector<1x32xf32>, vector<1x32xf32>, vector<1x32xf32>, vector<1x32xf32> -> vector<16x32xf32>
    %327 = vector.shape_cast %326 : vector<16x32xf32> to vector<2x8x32xf32>
    %c0_45 = arith.constant 0 : index
    %c0_46 = arith.constant 0 : index
    %328 = vector.load %arg9[%c0_45, %c0_46] : memref<32x32xf32, #tpu.memory_space<vmem>>, vector<32x32xf32>
    %cst_47 = arith.constant dense<0.000000e+00> : vector<16x32xf32>
    %329 = tpu.matmul %326, %328, %cst_47 {dimension_numbers = #tpu.dot_dimension_numbers<[1], [0], [0], [1], [0, 0, 1, 1], [], []>} : vector<16x32xf32>, vector<32x32xf32>, vector<16x32xf32> -> vector<16x32xf32>
    %330 = vector.shape_cast %329 : vector<16x32xf32> to vector<2x8x32xf32>
    %331 = tpu.concatenate %281, %299 in 1 : vector<2x16xf32>, vector<2x16xf32> -> vector<2x32xf32>
    %c0_48 = arith.constant 0 : index
    %c0_49 = arith.constant 0 : index
    %332 = vector.load %arg7[%c0_48, %c0_49] : memref<32x32xf32, #tpu.memory_space<vmem>>, vector<32x32xf32>
    %cst_50 = arith.constant dense<0.000000e+00> : vector<2x32xf32>
    %333 = tpu.matmul %331, %332, %cst_50 {dimension_numbers = #tpu.dot_dimension_numbers<[1], [0], [0], [1], [0, 0, 1, 1], [], []>} : vector<2x32xf32>, vector<32x32xf32>, vector<2x32xf32> -> vector<2x32xf32>
    %c0_51 = arith.constant 0 : index
    %c0_52 = arith.constant 0 : index
    %334 = vector.load %arg8[%c0_51, %c0_52] : memref<1x32xf32, #tpu.memory_space<vmem>>, vector<1x32xf32>
    %335 = vector.broadcast %334 : vector<1x32xf32> to vector<2x32xf32>
    %336 = arith.addf %333, %335 : vector<2x32xf32>
    %337 = math.tanh %336 : vector<2x32xf32>
    %c0_53 = arith.constant 0 : index
    %c0_54 = arith.constant 0 : index
    %338 = vector.load %arg1[%c0_53, %c0_54] : memref<14x16xf32, #tpu.memory_space<vmem>>, vector<14x16xf32>
    %c0_55 = arith.constant 0 : index
    %c0_56 = arith.constant 0 : index
    %339 = vector.load %arg10[%c0_55, %c0_56] : memref<16x128xf32, #tpu.memory_space<vmem>>, vector<16x128xf32>
    %cst_57 = arith.constant dense<0.000000e+00> : vector<14x128xf32>
    %340 = tpu.matmul %338, %339, %cst_57 {dimension_numbers = #tpu.dot_dimension_numbers<[1], [0], [0], [1], [0, 0, 1, 1], [], []>} : vector<14x16xf32>, vector<16x128xf32>, vector<14x128xf32> -> vector<14x128xf32>
    %c0_58 = arith.constant 0 : index
    %c0_59 = arith.constant 0 : index
    %341 = vector.load %arg11[%c0_58, %c0_59] : memref<1x128xf32, #tpu.memory_space<vmem>>, vector<1x128xf32>
    %342 = vector.broadcast %341 : vector<1x128xf32> to vector<14x128xf32>
    %343 = arith.addf %340, %342 : vector<14x128xf32>
    %c0_60 = arith.constant 0 : index
    %c0_61 = arith.constant 0 : index
    %344 = vector.load %arg12[%c0_60, %c0_61] : memref<64x128xf32, #tpu.memory_space<vmem>>, vector<64x128xf32>
    %c0_62 = arith.constant 0 : index
    %c0_63 = arith.constant 0 : index
    %345 = vector.load %arg13[%c0_62, %c0_63] : memref<64x32xf32, #tpu.memory_space<vmem>>, vector<64x32xf32>
    %cst_64 = arith.constant 0.000000e+00 : f32
    %346 = vector.broadcast %cst_64 : f32 to vector<2x32xf32>
    %347 = vector.extract_strided_slice %343 {offsets = [0, 0], sizes = [2, 128], strides = [1, 1]} : vector<14x128xf32> to vector<2x128xf32>
    %348 = tpu.concatenate %346, %337 in 1 : vector<2x32xf32>, vector<2x32xf32> -> vector<2x64xf32>
    %cst_65 = arith.constant dense<0.000000e+00> : vector<2x128xf32>
    %349 = tpu.matmul %348, %344, %cst_65 {dimension_numbers = #tpu.dot_dimension_numbers<[1], [0], [0], [1], [0, 0, 1, 1], [], []>} : vector<2x64xf32>, vector<64x128xf32>, vector<2x128xf32> -> vector<2x128xf32>
    %350 = arith.addf %347, %349 : vector<2x128xf32>
    %351 = arith.negf %350 : vector<2x128xf32>
    %352 = math.exp %351 : vector<2x128xf32>
    %cst_66 = arith.constant 1.000000e+00 : f32
    %353 = vector.broadcast %cst_66 : f32 to vector<2x128xf32>
    %354 = arith.addf %353, %352 : vector<2x128xf32>
    %355 = arith.divf %353, %354 : vector<2x128xf32>
    %356 = math.tanh %350 : vector<2x128xf32>
    %357 = vector.extract_strided_slice %355 {offsets = [0, 0], sizes = [2, 32], strides = [1, 1]} : vector<2x128xf32> to vector<2x32xf32>
    %358 = vector.extract_strided_slice %355 {offsets = [0, 32], sizes = [2, 32], strides = [1, 1]} : vector<2x128xf32> to vector<2x32xf32>
    %359 = vector.extract_strided_slice %356 {offsets = [0, 64], sizes = [2, 32], strides = [1, 1]} : vector<2x128xf32> to vector<2x32xf32>
    %360 = vector.extract_strided_slice %355 {offsets = [0, 96], sizes = [2, 32], strides = [1, 1]} : vector<2x128xf32> to vector<2x32xf32>
    %361 = arith.mulf %358, %336 : vector<2x32xf32>
    %362 = arith.mulf %357, %359 : vector<2x32xf32>
    %363 = arith.addf %361, %362 : vector<2x32xf32>
    %364 = math.tanh %363 : vector<2x32xf32>
    %365 = arith.mulf %360, %364 : vector<2x32xf32>
    %366 = vector.shape_cast %365 : vector<2x32xf32> to vector<2x1x32xf32>
    "tpu.trace_start"() <{level = 10 : i32, message = "bqd,bkd->bqk"}> : () -> ()
    %cst_67 = arith.constant dense<0.000000e+00> : vector<2x1x8xf32>
    %367 = tpu.matmul %366, %330, %cst_67 {dimension_numbers = #tpu.dot_dimension_numbers<[2], [2], [1], [1], [0, 0, 0, 1, 1, 1], [0], [0]>} : vector<2x1x32xf32>, vector<2x8x32xf32>, vector<2x1x8xf32> -> vector<2x1x8xf32>
    "tpu.trace_stop"() : () -> ()
    %cst_68 = arith.constant dense<0xFF800000> : vector<2x1xf32>
    %368 = vector.multi_reduction <maximumf>, %367, %cst_68 [2] : vector<2x1x8xf32> to vector<2x1xf32>
    %369 = vector.shape_cast %368 : vector<2x1xf32> to vector<2x1x1xf32>
    %370 = vector.broadcast %369 : vector<2x1x1xf32> to vector<2x1x8xf32>
    %371 = arith.subf %367, %370 : vector<2x1x8xf32>
    %372 = math.exp %371 : vector<2x1x8xf32>
    %cst_69 = arith.constant dense<0.000000e+00> : vector<2x1xf32>
    %373 = vector.multi_reduction <add>, %372, %cst_69 [2] : vector<2x1x8xf32> to vector<2x1xf32>
    %374 = vector.shape_cast %373 : vector<2x1xf32> to vector<2x1x1xf32>
    %375 = vector.broadcast %374 : vector<2x1x1xf32> to vector<2x1x8xf32>
    %376 = arith.divf %372, %375 : vector<2x1x8xf32>
    "tpu.trace_start"() <{level = 10 : i32, message = "bqk,bkd->bqd"}> : () -> ()
    %cst_70 = arith.constant dense<0.000000e+00> : vector<2x1x32xf32>
    %377 = tpu.matmul %376, %327, %cst_70 {dimension_numbers = #tpu.dot_dimension_numbers<[2], [1], [1], [2], [0, 0, 0, 1, 1, 2], [0], [0]>} : vector<2x1x8xf32>, vector<2x8x32xf32>, vector<2x1x32xf32> -> vector<2x1x32xf32>
    "tpu.trace_stop"() : () -> ()
    %378 = vector.shape_cast %377 : vector<2x1x32xf32> to vector<2x32xf32>
    %379 = tpu.concatenate %365, %378 in 1 : vector<2x32xf32>, vector<2x32xf32> -> vector<2x64xf32>
    %cst_71 = arith.constant dense<0.000000e+00> : vector<2x32xf32>
    %380 = tpu.matmul %379, %345, %cst_71 {dimension_numbers = #tpu.dot_dimension_numbers<[1], [0], [0], [1], [0, 0, 1, 1], [], []>} : vector<2x64xf32>, vector<64x32xf32>, vector<2x32xf32> -> vector<2x32xf32>
    %381 = math.tanh %380 : vector<2x32xf32>
    %382 = vector.extract_strided_slice %343 {offsets = [2, 0], sizes = [2, 128], strides = [1, 1]} : vector<14x128xf32> to vector<2x128xf32>
    %383 = tpu.concatenate %381, %365 in 1 : vector<2x32xf32>, vector<2x32xf32> -> vector<2x64xf32>
    %cst_72 = arith.constant dense<0.000000e+00> : vector<2x128xf32>
    %384 = tpu.matmul %383, %344, %cst_72 {dimension_numbers = #tpu.dot_dimension_numbers<[1], [0], [0], [1], [0, 0, 1, 1], [], []>} : vector<2x64xf32>, vector<64x128xf32>, vector<2x128xf32> -> vector<2x128xf32>
    %385 = arith.addf %382, %384 : vector<2x128xf32>
    %386 = arith.negf %385 : vector<2x128xf32>
    %387 = math.exp %386 : vector<2x128xf32>
    %cst_73 = arith.constant 1.000000e+00 : f32
    %388 = vector.broadcast %cst_73 : f32 to vector<2x128xf32>
    %389 = arith.addf %388, %387 : vector<2x128xf32>
    %390 = arith.divf %388, %389 : vector<2x128xf32>
    %391 = math.tanh %385 : vector<2x128xf32>
    %392 = vector.extract_strided_slice %390 {offsets = [0, 0], sizes = [2, 32], strides = [1, 1]} : vector<2x128xf32> to vector<2x32xf32>
    %393 = vector.extract_strided_slice %390 {offsets = [0, 32], sizes = [2, 32], strides = [1, 1]} : vector<2x128xf32> to vector<2x32xf32>
    %394 = vector.extract_strided_slice %391 {offsets = [0, 64], sizes = [2, 32], strides = [1, 1]} : vector<2x128xf32> to vector<2x32xf32>
    %395 = vector.extract_strided_slice %390 {offsets = [0, 96], sizes = [2, 32], strides = [1, 1]} : vector<2x128xf32> to vector<2x32xf32>
    %396 = arith.mulf %393, %363 : vector<2x32xf32>
    %397 = arith.mulf %392, %394 : vector<2x32xf32>
    %398 = arith.addf %396, %397 : vector<2x32xf32>
    %399 = math.tanh %398 : vector<2x32xf32>
    %400 = arith.mulf %395, %399 : vector<2x32xf32>
    %401 = vector.shape_cast %400 : vector<2x32xf32> to vector<2x1x32xf32>
    "tpu.trace_start"() <{level = 10 : i32, message = "bqd,bkd->bqk"}> : () -> ()
    %cst_74 = arith.constant dense<0.000000e+00> : vector<2x1x8xf32>
    %402 = tpu.matmul %401, %330, %cst_74 {dimension_numbers = #tpu.dot_dimension_numbers<[2], [2], [1], [1], [0, 0, 0, 1, 1, 1], [0], [0]>} : vector<2x1x32xf32>, vector<2x8x32xf32>, vector<2x1x8xf32> -> vector<2x1x8xf32>
    "tpu.trace_stop"() : () -> ()
    %cst_75 = arith.constant dense<0xFF800000> : vector<2x1xf32>
    %403 = vector.multi_reduction <maximumf>, %402, %cst_75 [2] : vector<2x1x8xf32> to vector<2x1xf32>
    %404 = vector.shape_cast %403 : vector<2x1xf32> to vector<2x1x1xf32>
    %405 = vector.broadcast %404 : vector<2x1x1xf32> to vector<2x1x8xf32>
    %406 = arith.subf %402, %405 : vector<2x1x8xf32>
    %407 = math.exp %406 : vector<2x1x8xf32>
    %cst_76 = arith.constant dense<0.000000e+00> : vector<2x1xf32>
    %408 = vector.multi_reduction <add>, %407, %cst_76 [2] : vector<2x1x8xf32> to vector<2x1xf32>
    %409 = vector.shape_cast %408 : vector<2x1xf32> to vector<2x1x1xf32>
    %410 = vector.broadcast %409 : vector<2x1x1xf32> to vector<2x1x8xf32>
    %411 = arith.divf %407, %410 : vector<2x1x8xf32>
    "tpu.trace_start"() <{level = 10 : i32, message = "bqk,bkd->bqd"}> : () -> ()
    %cst_77 = arith.constant dense<0.000000e+00> : vector<2x1x32xf32>
    %412 = tpu.matmul %411, %327, %cst_77 {dimension_numbers = #tpu.dot_dimension_numbers<[2], [1], [1], [2], [0, 0, 0, 1, 1, 2], [0], [0]>} : vector<2x1x8xf32>, vector<2x8x32xf32>, vector<2x1x32xf32> -> vector<2x1x32xf32>
    "tpu.trace_stop"() : () -> ()
    %413 = vector.shape_cast %412 : vector<2x1x32xf32> to vector<2x32xf32>
    %414 = tpu.concatenate %400, %413 in 1 : vector<2x32xf32>, vector<2x32xf32> -> vector<2x64xf32>
    %cst_78 = arith.constant dense<0.000000e+00> : vector<2x32xf32>
    %415 = tpu.matmul %414, %345, %cst_78 {dimension_numbers = #tpu.dot_dimension_numbers<[1], [0], [0], [1], [0, 0, 1, 1], [], []>} : vector<2x64xf32>, vector<64x32xf32>, vector<2x32xf32> -> vector<2x32xf32>
    %416 = math.tanh %415 : vector<2x32xf32>
    %417 = vector.extract_strided_slice %343 {offsets = [4, 0], sizes = [2, 128], strides = [1, 1]} : vector<14x128xf32> to vector<2x128xf32>
    %418 = tpu.concatenate %416, %400 in 1 : vector<2x32xf32>, vector<2x32xf32> -> vector<2x64xf32>
    %cst_79 = arith.constant dense<0.000000e+00> : vector<2x128xf32>
    %419 = tpu.matmul %418, %344, %cst_79 {dimension_numbers = #tpu.dot_dimension_numbers<[1], [0], [0], [1], [0, 0, 1, 1], [], []>} : vector<2x64xf32>, vector<64x128xf32>, vector<2x128xf32> -> vector<2x128xf32>
    %420 = arith.addf %417, %419 : vector<2x128xf32>
    %421 = arith.negf %420 : vector<2x128xf32>
    %422 = math.exp %421 : vector<2x128xf32>
    %cst_80 = arith.constant 1.000000e+00 : f32
    %423 = vector.broadcast %cst_80 : f32 to vector<2x128xf32>
    %424 = arith.addf %423, %422 : vector<2x128xf32>
    %425 = arith.divf %423, %424 : vector<2x128xf32>
    %426 = math.tanh %420 : vector<2x128xf32>
    %427 = vector.extract_strided_slice %425 {offsets = [0, 0], sizes = [2, 32], strides = [1, 1]} : vector<2x128xf32> to vector<2x32xf32>
    %428 = vector.extract_strided_slice %425 {offsets = [0, 32], sizes = [2, 32], strides = [1, 1]} : vector<2x128xf32> to vector<2x32xf32>
    %429 = vector.extract_strided_slice %426 {offsets = [0, 64], sizes = [2, 32], strides = [1, 1]} : vector<2x128xf32> to vector<2x32xf32>
    %430 = vector.extract_strided_slice %425 {offsets = [0, 96], sizes = [2, 32], strides = [1, 1]} : vector<2x128xf32> to vector<2x32xf32>
    %431 = arith.mulf %428, %398 : vector<2x32xf32>
    %432 = arith.mulf %427, %429 : vector<2x32xf32>
    %433 = arith.addf %431, %432 : vector<2x32xf32>
    %434 = math.tanh %433 : vector<2x32xf32>
    %435 = arith.mulf %430, %434 : vector<2x32xf32>
    %436 = vector.shape_cast %435 : vector<2x32xf32> to vector<2x1x32xf32>
    "tpu.trace_start"() <{level = 10 : i32, message = "bqd,bkd->bqk"}> : () -> ()
    %cst_81 = arith.constant dense<0.000000e+00> : vector<2x1x8xf32>
    %437 = tpu.matmul %436, %330, %cst_81 {dimension_numbers = #tpu.dot_dimension_numbers<[2], [2], [1], [1], [0, 0, 0, 1, 1, 1], [0], [0]>} : vector<2x1x32xf32>, vector<2x8x32xf32>, vector<2x1x8xf32> -> vector<2x1x8xf32>
    "tpu.trace_stop"() : () -> ()
    %cst_82 = arith.constant dense<0xFF800000> : vector<2x1xf32>
    %438 = vector.multi_reduction <maximumf>, %437, %cst_82 [2] : vector<2x1x8xf32> to vector<2x1xf32>
    %439 = vector.shape_cast %438 : vector<2x1xf32> to vector<2x1x1xf32>
    %440 = vector.broadcast %439 : vector<2x1x1xf32> to vector<2x1x8xf32>
    %441 = arith.subf %437, %440 : vector<2x1x8xf32>
    %442 = math.exp %441 : vector<2x1x8xf32>
    %cst_83 = arith.constant dense<0.000000e+00> : vector<2x1xf32>
    %443 = vector.multi_reduction <add>, %442, %cst_83 [2] : vector<2x1x8xf32> to vector<2x1xf32>
    %444 = vector.shape_cast %443 : vector<2x1xf32> to vector<2x1x1xf32>
    %445 = vector.broadcast %444 : vector<2x1x1xf32> to vector<2x1x8xf32>
    %446 = arith.divf %442, %445 : vector<2x1x8xf32>
    "tpu.trace_start"() <{level = 10 : i32, message = "bqk,bkd->bqd"}> : () -> ()
    %cst_84 = arith.constant dense<0.000000e+00> : vector<2x1x32xf32>
    %447 = tpu.matmul %446, %327, %cst_84 {dimension_numbers = #tpu.dot_dimension_numbers<[2], [1], [1], [2], [0, 0, 0, 1, 1, 2], [0], [0]>} : vector<2x1x8xf32>, vector<2x8x32xf32>, vector<2x1x32xf32> -> vector<2x1x32xf32>
    "tpu.trace_stop"() : () -> ()
    %448 = vector.shape_cast %447 : vector<2x1x32xf32> to vector<2x32xf32>
    %449 = tpu.concatenate %435, %448 in 1 : vector<2x32xf32>, vector<2x32xf32> -> vector<2x64xf32>
    %cst_85 = arith.constant dense<0.000000e+00> : vector<2x32xf32>
    %450 = tpu.matmul %449, %345, %cst_85 {dimension_numbers = #tpu.dot_dimension_numbers<[1], [0], [0], [1], [0, 0, 1, 1], [], []>} : vector<2x64xf32>, vector<64x32xf32>, vector<2x32xf32> -> vector<2x32xf32>
    %451 = math.tanh %450 : vector<2x32xf32>
    %452 = vector.extract_strided_slice %343 {offsets = [6, 0], sizes = [2, 128], strides = [1, 1]} : vector<14x128xf32> to vector<2x128xf32>
    %453 = tpu.concatenate %451, %435 in 1 : vector<2x32xf32>, vector<2x32xf32> -> vector<2x64xf32>
    %cst_86 = arith.constant dense<0.000000e+00> : vector<2x128xf32>
    %454 = tpu.matmul %453, %344, %cst_86 {dimension_numbers = #tpu.dot_dimension_numbers<[1], [0], [0], [1], [0, 0, 1, 1], [], []>} : vector<2x64xf32>, vector<64x128xf32>, vector<2x128xf32> -> vector<2x128xf32>
    %455 = arith.addf %452, %454 : vector<2x128xf32>
    %456 = arith.negf %455 : vector<2x128xf32>
    %457 = math.exp %456 : vector<2x128xf32>
    %cst_87 = arith.constant 1.000000e+00 : f32
    %458 = vector.broadcast %cst_87 : f32 to vector<2x128xf32>
    %459 = arith.addf %458, %457 : vector<2x128xf32>
    %460 = arith.divf %458, %459 : vector<2x128xf32>
    %461 = math.tanh %455 : vector<2x128xf32>
    %462 = vector.extract_strided_slice %460 {offsets = [0, 0], sizes = [2, 32], strides = [1, 1]} : vector<2x128xf32> to vector<2x32xf32>
    %463 = vector.extract_strided_slice %460 {offsets = [0, 32], sizes = [2, 32], strides = [1, 1]} : vector<2x128xf32> to vector<2x32xf32>
    %464 = vector.extract_strided_slice %461 {offsets = [0, 64], sizes = [2, 32], strides = [1, 1]} : vector<2x128xf32> to vector<2x32xf32>
    %465 = vector.extract_strided_slice %460 {offsets = [0, 96], sizes = [2, 32], strides = [1, 1]} : vector<2x128xf32> to vector<2x32xf32>
    %466 = arith.mulf %463, %433 : vector<2x32xf32>
    %467 = arith.mulf %462, %464 : vector<2x32xf32>
    %468 = arith.addf %466, %467 : vector<2x32xf32>
    %469 = math.tanh %468 : vector<2x32xf32>
    %470 = arith.mulf %465, %469 : vector<2x32xf32>
    %471 = vector.shape_cast %470 : vector<2x32xf32> to vector<2x1x32xf32>
    "tpu.trace_start"() <{level = 10 : i32, message = "bqd,bkd->bqk"}> : () -> ()
    %cst_88 = arith.constant dense<0.000000e+00> : vector<2x1x8xf32>
    %472 = tpu.matmul %471, %330, %cst_88 {dimension_numbers = #tpu.dot_dimension_numbers<[2], [2], [1], [1], [0, 0, 0, 1, 1, 1], [0], [0]>} : vector<2x1x32xf32>, vector<2x8x32xf32>, vector<2x1x8xf32> -> vector<2x1x8xf32>
    "tpu.trace_stop"() : () -> ()
    %cst_89 = arith.constant dense<0xFF800000> : vector<2x1xf32>
    %473 = vector.multi_reduction <maximumf>, %472, %cst_89 [2] : vector<2x1x8xf32> to vector<2x1xf32>
    %474 = vector.shape_cast %473 : vector<2x1xf32> to vector<2x1x1xf32>
    %475 = vector.broadcast %474 : vector<2x1x1xf32> to vector<2x1x8xf32>
    %476 = arith.subf %472, %475 : vector<2x1x8xf32>
    %477 = math.exp %476 : vector<2x1x8xf32>
    %cst_90 = arith.constant dense<0.000000e+00> : vector<2x1xf32>
    %478 = vector.multi_reduction <add>, %477, %cst_90 [2] : vector<2x1x8xf32> to vector<2x1xf32>
    %479 = vector.shape_cast %478 : vector<2x1xf32> to vector<2x1x1xf32>
    %480 = vector.broadcast %479 : vector<2x1x1xf32> to vector<2x1x8xf32>
    %481 = arith.divf %477, %480 : vector<2x1x8xf32>
    "tpu.trace_start"() <{level = 10 : i32, message = "bqk,bkd->bqd"}> : () -> ()
    %cst_91 = arith.constant dense<0.000000e+00> : vector<2x1x32xf32>
    %482 = tpu.matmul %481, %327, %cst_91 {dimension_numbers = #tpu.dot_dimension_numbers<[2], [1], [1], [2], [0, 0, 0, 1, 1, 2], [0], [0]>} : vector<2x1x8xf32>, vector<2x8x32xf32>, vector<2x1x32xf32> -> vector<2x1x32xf32>
    "tpu.trace_stop"() : () -> ()
    %483 = vector.shape_cast %482 : vector<2x1x32xf32> to vector<2x32xf32>
    %484 = tpu.concatenate %470, %483 in 1 : vector<2x32xf32>, vector<2x32xf32> -> vector<2x64xf32>
    %cst_92 = arith.constant dense<0.000000e+00> : vector<2x32xf32>
    %485 = tpu.matmul %484, %345, %cst_92 {dimension_numbers = #tpu.dot_dimension_numbers<[1], [0], [0], [1], [0, 0, 1, 1], [], []>} : vector<2x64xf32>, vector<64x32xf32>, vector<2x32xf32> -> vector<2x32xf32>
    %486 = math.tanh %485 : vector<2x32xf32>
    %487 = vector.extract_strided_slice %343 {offsets = [8, 0], sizes = [2, 128], strides = [1, 1]} : vector<14x128xf32> to vector<2x128xf32>
    %488 = tpu.concatenate %486, %470 in 1 : vector<2x32xf32>, vector<2x32xf32> -> vector<2x64xf32>
    %cst_93 = arith.constant dense<0.000000e+00> : vector<2x128xf32>
    %489 = tpu.matmul %488, %344, %cst_93 {dimension_numbers = #tpu.dot_dimension_numbers<[1], [0], [0], [1], [0, 0, 1, 1], [], []>} : vector<2x64xf32>, vector<64x128xf32>, vector<2x128xf32> -> vector<2x128xf32>
    %490 = arith.addf %487, %489 : vector<2x128xf32>
    %491 = arith.negf %490 : vector<2x128xf32>
    %492 = math.exp %491 : vector<2x128xf32>
    %cst_94 = arith.constant 1.000000e+00 : f32
    %493 = vector.broadcast %cst_94 : f32 to vector<2x128xf32>
    %494 = arith.addf %493, %492 : vector<2x128xf32>
    %495 = arith.divf %493, %494 : vector<2x128xf32>
    %496 = math.tanh %490 : vector<2x128xf32>
    %497 = vector.extract_strided_slice %495 {offsets = [0, 0], sizes = [2, 32], strides = [1, 1]} : vector<2x128xf32> to vector<2x32xf32>
    %498 = vector.extract_strided_slice %495 {offsets = [0, 32], sizes = [2, 32], strides = [1, 1]} : vector<2x128xf32> to vector<2x32xf32>
    %499 = vector.extract_strided_slice %496 {offsets = [0, 64], sizes = [2, 32], strides = [1, 1]} : vector<2x128xf32> to vector<2x32xf32>
    %500 = vector.extract_strided_slice %495 {offsets = [0, 96], sizes = [2, 32], strides = [1, 1]} : vector<2x128xf32> to vector<2x32xf32>
    %501 = arith.mulf %498, %468 : vector<2x32xf32>
    %502 = arith.mulf %497, %499 : vector<2x32xf32>
    %503 = arith.addf %501, %502 : vector<2x32xf32>
    %504 = math.tanh %503 : vector<2x32xf32>
    %505 = arith.mulf %500, %504 : vector<2x32xf32>
    %506 = vector.shape_cast %505 : vector<2x32xf32> to vector<2x1x32xf32>
    "tpu.trace_start"() <{level = 10 : i32, message = "bqd,bkd->bqk"}> : () -> ()
    %cst_95 = arith.constant dense<0.000000e+00> : vector<2x1x8xf32>
    %507 = tpu.matmul %506, %330, %cst_95 {dimension_numbers = #tpu.dot_dimension_numbers<[2], [2], [1], [1], [0, 0, 0, 1, 1, 1], [0], [0]>} : vector<2x1x32xf32>, vector<2x8x32xf32>, vector<2x1x8xf32> -> vector<2x1x8xf32>
    "tpu.trace_stop"() : () -> ()
    %cst_96 = arith.constant dense<0xFF800000> : vector<2x1xf32>
    %508 = vector.multi_reduction <maximumf>, %507, %cst_96 [2] : vector<2x1x8xf32> to vector<2x1xf32>
    %509 = vector.shape_cast %508 : vector<2x1xf32> to vector<2x1x1xf32>
    %510 = vector.broadcast %509 : vector<2x1x1xf32> to vector<2x1x8xf32>
    %511 = arith.subf %507, %510 : vector<2x1x8xf32>
    %512 = math.exp %511 : vector<2x1x8xf32>
    %cst_97 = arith.constant dense<0.000000e+00> : vector<2x1xf32>
    %513 = vector.multi_reduction <add>, %512, %cst_97 [2] : vector<2x1x8xf32> to vector<2x1xf32>
    %514 = vector.shape_cast %513 : vector<2x1xf32> to vector<2x1x1xf32>
    %515 = vector.broadcast %514 : vector<2x1x1xf32> to vector<2x1x8xf32>
    %516 = arith.divf %512, %515 : vector<2x1x8xf32>
    "tpu.trace_start"() <{level = 10 : i32, message = "bqk,bkd->bqd"}> : () -> ()
    %cst_98 = arith.constant dense<0.000000e+00> : vector<2x1x32xf32>
    %517 = tpu.matmul %516, %327, %cst_98 {dimension_numbers = #tpu.dot_dimension_numbers<[2], [1], [1], [2], [0, 0, 0, 1, 1, 2], [0], [0]>} : vector<2x1x8xf32>, vector<2x8x32xf32>, vector<2x1x32xf32> -> vector<2x1x32xf32>
    "tpu.trace_stop"() : () -> ()
    %518 = vector.shape_cast %517 : vector<2x1x32xf32> to vector<2x32xf32>
    %519 = tpu.concatenate %505, %518 in 1 : vector<2x32xf32>, vector<2x32xf32> -> vector<2x64xf32>
    %cst_99 = arith.constant dense<0.000000e+00> : vector<2x32xf32>
    %520 = tpu.matmul %519, %345, %cst_99 {dimension_numbers = #tpu.dot_dimension_numbers<[1], [0], [0], [1], [0, 0, 1, 1], [], []>} : vector<2x64xf32>, vector<64x32xf32>, vector<2x32xf32> -> vector<2x32xf32>
    %521 = math.tanh %520 : vector<2x32xf32>
    %522 = vector.extract_strided_slice %343 {offsets = [10, 0], sizes = [2, 128], strides = [1, 1]} : vector<14x128xf32> to vector<2x128xf32>
    %523 = tpu.concatenate %521, %505 in 1 : vector<2x32xf32>, vector<2x32xf32> -> vector<2x64xf32>
    %cst_100 = arith.constant dense<0.000000e+00> : vector<2x128xf32>
    %524 = tpu.matmul %523, %344, %cst_100 {dimension_numbers = #tpu.dot_dimension_numbers<[1], [0], [0], [1], [0, 0, 1, 1], [], []>} : vector<2x64xf32>, vector<64x128xf32>, vector<2x128xf32> -> vector<2x128xf32>
    %525 = arith.addf %522, %524 : vector<2x128xf32>
    %526 = arith.negf %525 : vector<2x128xf32>
    %527 = math.exp %526 : vector<2x128xf32>
    %cst_101 = arith.constant 1.000000e+00 : f32
    %528 = vector.broadcast %cst_101 : f32 to vector<2x128xf32>
    %529 = arith.addf %528, %527 : vector<2x128xf32>
    %530 = arith.divf %528, %529 : vector<2x128xf32>
    %531 = math.tanh %525 : vector<2x128xf32>
    %532 = vector.extract_strided_slice %530 {offsets = [0, 0], sizes = [2, 32], strides = [1, 1]} : vector<2x128xf32> to vector<2x32xf32>
    %533 = vector.extract_strided_slice %530 {offsets = [0, 32], sizes = [2, 32], strides = [1, 1]} : vector<2x128xf32> to vector<2x32xf32>
    %534 = vector.extract_strided_slice %531 {offsets = [0, 64], sizes = [2, 32], strides = [1, 1]} : vector<2x128xf32> to vector<2x32xf32>
    %535 = vector.extract_strided_slice %530 {offsets = [0, 96], sizes = [2, 32], strides = [1, 1]} : vector<2x128xf32> to vector<2x32xf32>
    %536 = arith.mulf %533, %503 : vector<2x32xf32>
    %537 = arith.mulf %532, %534 : vector<2x32xf32>
    %538 = arith.addf %536, %537 : vector<2x32xf32>
    %539 = math.tanh %538 : vector<2x32xf32>
    %540 = arith.mulf %535, %539 : vector<2x32xf32>
    %541 = vector.shape_cast %540 : vector<2x32xf32> to vector<2x1x32xf32>
    "tpu.trace_start"() <{level = 10 : i32, message = "bqd,bkd->bqk"}> : () -> ()
    %cst_102 = arith.constant dense<0.000000e+00> : vector<2x1x8xf32>
    %542 = tpu.matmul %541, %330, %cst_102 {dimension_numbers = #tpu.dot_dimension_numbers<[2], [2], [1], [1], [0, 0, 0, 1, 1, 1], [0], [0]>} : vector<2x1x32xf32>, vector<2x8x32xf32>, vector<2x1x8xf32> -> vector<2x1x8xf32>
    "tpu.trace_stop"() : () -> ()
    %cst_103 = arith.constant dense<0xFF800000> : vector<2x1xf32>
    %543 = vector.multi_reduction <maximumf>, %542, %cst_103 [2] : vector<2x1x8xf32> to vector<2x1xf32>
    %544 = vector.shape_cast %543 : vector<2x1xf32> to vector<2x1x1xf32>
    %545 = vector.broadcast %544 : vector<2x1x1xf32> to vector<2x1x8xf32>
    %546 = arith.subf %542, %545 : vector<2x1x8xf32>
    %547 = math.exp %546 : vector<2x1x8xf32>
    %cst_104 = arith.constant dense<0.000000e+00> : vector<2x1xf32>
    %548 = vector.multi_reduction <add>, %547, %cst_104 [2] : vector<2x1x8xf32> to vector<2x1xf32>
    %549 = vector.shape_cast %548 : vector<2x1xf32> to vector<2x1x1xf32>
    %550 = vector.broadcast %549 : vector<2x1x1xf32> to vector<2x1x8xf32>
    %551 = arith.divf %547, %550 : vector<2x1x8xf32>
    "tpu.trace_start"() <{level = 10 : i32, message = "bqk,bkd->bqd"}> : () -> ()
    %cst_105 = arith.constant dense<0.000000e+00> : vector<2x1x32xf32>
    %552 = tpu.matmul %551, %327, %cst_105 {dimension_numbers = #tpu.dot_dimension_numbers<[2], [1], [1], [2], [0, 0, 0, 1, 1, 2], [0], [0]>} : vector<2x1x8xf32>, vector<2x8x32xf32>, vector<2x1x32xf32> -> vector<2x1x32xf32>
    "tpu.trace_stop"() : () -> ()
    %553 = vector.shape_cast %552 : vector<2x1x32xf32> to vector<2x32xf32>
    %554 = tpu.concatenate %540, %553 in 1 : vector<2x32xf32>, vector<2x32xf32> -> vector<2x64xf32>
    %cst_106 = arith.constant dense<0.000000e+00> : vector<2x32xf32>
    %555 = tpu.matmul %554, %345, %cst_106 {dimension_numbers = #tpu.dot_dimension_numbers<[1], [0], [0], [1], [0, 0, 1, 1], [], []>} : vector<2x64xf32>, vector<64x32xf32>, vector<2x32xf32> -> vector<2x32xf32>
    %556 = math.tanh %555 : vector<2x32xf32>
    %557 = vector.extract_strided_slice %343 {offsets = [12, 0], sizes = [2, 128], strides = [1, 1]} : vector<14x128xf32> to vector<2x128xf32>
    %558 = tpu.concatenate %556, %540 in 1 : vector<2x32xf32>, vector<2x32xf32> -> vector<2x64xf32>
    %cst_107 = arith.constant dense<0.000000e+00> : vector<2x128xf32>
    %559 = tpu.matmul %558, %344, %cst_107 {dimension_numbers = #tpu.dot_dimension_numbers<[1], [0], [0], [1], [0, 0, 1, 1], [], []>} : vector<2x64xf32>, vector<64x128xf32>, vector<2x128xf32> -> vector<2x128xf32>
    %560 = arith.addf %557, %559 : vector<2x128xf32>
    %561 = arith.negf %560 : vector<2x128xf32>
    %562 = math.exp %561 : vector<2x128xf32>
    %cst_108 = arith.constant 1.000000e+00 : f32
    %563 = vector.broadcast %cst_108 : f32 to vector<2x128xf32>
    %564 = arith.addf %563, %562 : vector<2x128xf32>
    %565 = arith.divf %563, %564 : vector<2x128xf32>
    %566 = math.tanh %560 : vector<2x128xf32>
    %567 = vector.extract_strided_slice %565 {offsets = [0, 0], sizes = [2, 32], strides = [1, 1]} : vector<2x128xf32> to vector<2x32xf32>
    %568 = vector.extract_strided_slice %565 {offsets = [0, 32], sizes = [2, 32], strides = [1, 1]} : vector<2x128xf32> to vector<2x32xf32>
    %569 = vector.extract_strided_slice %566 {offsets = [0, 64], sizes = [2, 32], strides = [1, 1]} : vector<2x128xf32> to vector<2x32xf32>
    %570 = vector.extract_strided_slice %565 {offsets = [0, 96], sizes = [2, 32], strides = [1, 1]} : vector<2x128xf32> to vector<2x32xf32>
    %571 = arith.mulf %568, %538 : vector<2x32xf32>
    %572 = arith.mulf %567, %569 : vector<2x32xf32>
    %573 = arith.addf %571, %572 : vector<2x32xf32>
    %574 = math.tanh %573 : vector<2x32xf32>
    %575 = arith.mulf %570, %574 : vector<2x32xf32>
    %576 = vector.shape_cast %575 : vector<2x32xf32> to vector<2x1x32xf32>
    "tpu.trace_start"() <{level = 10 : i32, message = "bqd,bkd->bqk"}> : () -> ()
    %cst_109 = arith.constant dense<0.000000e+00> : vector<2x1x8xf32>
    %577 = tpu.matmul %576, %330, %cst_109 {dimension_numbers = #tpu.dot_dimension_numbers<[2], [2], [1], [1], [0, 0, 0, 1, 1, 1], [0], [0]>} : vector<2x1x32xf32>, vector<2x8x32xf32>, vector<2x1x8xf32> -> vector<2x1x8xf32>
    "tpu.trace_stop"() : () -> ()
    %cst_110 = arith.constant dense<0xFF800000> : vector<2x1xf32>
    %578 = vector.multi_reduction <maximumf>, %577, %cst_110 [2] : vector<2x1x8xf32> to vector<2x1xf32>
    %579 = vector.shape_cast %578 : vector<2x1xf32> to vector<2x1x1xf32>
    %580 = vector.broadcast %579 : vector<2x1x1xf32> to vector<2x1x8xf32>
    %581 = arith.subf %577, %580 : vector<2x1x8xf32>
    %582 = math.exp %581 : vector<2x1x8xf32>
    %cst_111 = arith.constant dense<0.000000e+00> : vector<2x1xf32>
    %583 = vector.multi_reduction <add>, %582, %cst_111 [2] : vector<2x1x8xf32> to vector<2x1xf32>
    %584 = vector.shape_cast %583 : vector<2x1xf32> to vector<2x1x1xf32>
    %585 = vector.broadcast %584 : vector<2x1x1xf32> to vector<2x1x8xf32>
    %586 = arith.divf %582, %585 : vector<2x1x8xf32>
    "tpu.trace_start"() <{level = 10 : i32, message = "bqk,bkd->bqd"}> : () -> ()
    %cst_112 = arith.constant dense<0.000000e+00> : vector<2x1x32xf32>
    %587 = tpu.matmul %586, %327, %cst_112 {dimension_numbers = #tpu.dot_dimension_numbers<[2], [1], [1], [2], [0, 0, 0, 1, 1, 2], [0], [0]>} : vector<2x1x8xf32>, vector<2x8x32xf32>, vector<2x1x32xf32> -> vector<2x1x32xf32>
    "tpu.trace_stop"() : () -> ()
    %588 = vector.shape_cast %587 : vector<2x1x32xf32> to vector<2x32xf32>
    %589 = tpu.concatenate %575, %588 in 1 : vector<2x32xf32>, vector<2x32xf32> -> vector<2x64xf32>
    %cst_113 = arith.constant dense<0.000000e+00> : vector<2x32xf32>
    %590 = tpu.matmul %589, %345, %cst_113 {dimension_numbers = #tpu.dot_dimension_numbers<[1], [0], [0], [1], [0, 0, 1, 1], [], []>} : vector<2x64xf32>, vector<64x32xf32>, vector<2x32xf32> -> vector<2x32xf32>
    %591 = math.tanh %590 : vector<2x32xf32>
    %592 = tpu.concatenate %381, %416, %451, %486, %521, %556, %591 in 0 : vector<2x32xf32>, vector<2x32xf32>, vector<2x32xf32>, vector<2x32xf32>, vector<2x32xf32>, vector<2x32xf32>, vector<2x32xf32> -> vector<14x32xf32>
    %c0_114 = arith.constant 0 : index
    %c0_115 = arith.constant 0 : index
    %593 = vector.load %arg14[%c0_114, %c0_115] : memref<32x128xf32, #tpu.memory_space<vmem>>, vector<32x128xf32>
    %cst_116 = arith.constant dense<0.000000e+00> : vector<14x128xf32>
    %594 = tpu.matmul %592, %593, %cst_116 {dimension_numbers = #tpu.dot_dimension_numbers<[1], [0], [0], [1], [0, 0, 1, 1], [], []>} : vector<14x32xf32>, vector<32x128xf32>, vector<14x128xf32> -> vector<14x128xf32>
    %595 = tpu.iota {dimensions = array<i32: 1>} : vector<14x128xi32>
    %c32_i32 = arith.constant 32 : i32
    %596 = vector.broadcast %c32_i32 : i32 to vector<14x128xi32>
    %597 = arith.cmpi slt, %595, %596 : vector<14x128xi32>
    %cst_117 = arith.constant -1.000000e+30 : f32
    %598 = vector.broadcast %cst_117 : f32 to vector<14x128xf32>
    %599 = arith.select %597, %594, %598 : vector<14x128xi1>, vector<14x128xf32>
    %cst_118 = arith.constant dense<0xFF800000> : vector<14xf32>
    %600 = vector.multi_reduction <maximumf>, %599, %cst_118 [1] : vector<14x128xf32> to vector<14xf32>
    %601 = vector.shape_cast %600 : vector<14xf32> to vector<14x1xf32>
    %602 = vector.broadcast %601 : vector<14x1xf32> to vector<14x128xf32>
    %603 = arith.subf %599, %602 : vector<14x128xf32>
    %604 = math.exp %603 : vector<14x128xf32>
    %cst_119 = arith.constant dense<0.000000e+00> : vector<14xf32>
    %605 = vector.multi_reduction <add>, %604, %cst_119 [1] : vector<14x128xf32> to vector<14xf32>
    %606 = vector.shape_cast %605 : vector<14xf32> to vector<14x1xf32>
    %607 = math.log %606 : vector<14x1xf32>
    %608 = arith.addf %601, %607 : vector<14x1xf32>
    %c0_120 = arith.constant 0 : index
    %c0_121 = arith.constant 0 : index
    %609 = vector.load %arg2[%c0_120, %c0_121] : memref<14x1xi32, #tpu.memory_space<vmem>>, vector<14x1xi32>
    %610 = vector.broadcast %609 : vector<14x1xi32> to vector<14x128xi32>
    %611 = arith.cmpi eq, %595, %610 : vector<14x128xi32>
    %cst_122 = arith.constant 0.000000e+00 : f32
    %612 = vector.broadcast %cst_122 : f32 to vector<14x128xf32>
    %613 = arith.select %611, %599, %612 : vector<14x128xi1>, vector<14x128xf32>
    %cst_123 = arith.constant dense<0.000000e+00> : vector<14xf32>
    %614 = vector.multi_reduction <add>, %613, %cst_123 [1] : vector<14x128xf32> to vector<14xf32>
    %615 = vector.shape_cast %614 : vector<14xf32> to vector<14x1xf32>
    %c0_i32 = arith.constant 0 : i32
    %616 = vector.broadcast %c0_i32 : i32 to vector<14x1xi32>
    %617 = arith.cmpi ne, %609, %616 : vector<14x1xi32>
    %618 = arith.extui %617 : vector<14x1xi1> to vector<14x1xi32>
    %619 = arith.sitofp %618 : vector<14x1xi32> to vector<14x1xf32>
    %620 = arith.subf %608, %615 : vector<14x1xf32>
    %621 = arith.mulf %620, %619 : vector<14x1xf32>
    %cst_124 = arith.constant dense<0.000000e+00> : vector<1xf32>
    %622 = vector.multi_reduction <add>, %621, %cst_124 [0] : vector<14x1xf32> to vector<1xf32>
    %623 = vector.shape_cast %622 : vector<1xf32> to vector<1x1xf32>
    %cst_125 = arith.constant dense<0.000000e+00> : vector<1xf32>
    %624 = vector.multi_reduction <add>, %619, %cst_125 [0] : vector<14x1xf32> to vector<1xf32>
    %625 = vector.shape_cast %624 : vector<1xf32> to vector<1x1xf32>
    %626 = arith.divf %623, %625 : vector<1x1xf32>
    %c0_126 = arith.constant 0 : index
    %c0_127 = arith.constant 0 : index
    %627 = vector.load %arg15[%c0_126, %c0_127] : memref<1x1xf32, #tpu.memory_space<vmem>>, vector<1x1xf32>
    tpu.vector_store %arg15[%c0_126, %c0_127], %626 {strides = array<i32>} : memref<1x1xf32, #tpu.memory_space<vmem>>, vector<1x1xf32>,
    return
  }
}

</mosaic_0001>

<bundles_post_ra>
// kernel: seq2seq_forward.1
= control target key start
LH: loop header
LB: loop body
LE: loop exit
PB: predicated region body
PF: predicated region fallthrough
CT: control target
= control target key end

     0   :  { %vm59_vm0 = vcmask 130048   ;;  %s4863_s0 = inlined_call_operand.vmem [shape: f32[16,16], index: 0, kind: input, shape index: {}]   ;;  %s4864_s1 = inlined_call_operand.vmem [shape: f32[14,16], index: 1, kind: input, shape index: {}]   ;;  %s4865_s2 = inlined_call_operand.vmem [shape: s32[14,1], index: 2, kind: input, shape index: {}]   ;;  %s4866_s3 = inlined_call_operand.vmem [shape: f32[16,128], index: 3, kind: input, shape index: {}]   ;;  %s4867_s4 = inlined_call_operand.vmem [shape: f32[1,128], index: 4, kind: input, shape index: {}]   ;;  %s4868_s5 = inlined_call_operand.vmem [shape: f32[16,64], index: 5, kind: input, shape index: {}]   ;;  %s4869_s6 = inlined_call_operand.vmem [shape: f32[16,64], index: 6, kind: input, shape index: {}]   ;;  %s4870_s7 = inlined_call_operand.vmem [shape: f32[32,32], index: 7, kind: input, shape index: {}]   ;;  %s4871_s8 = inlined_call_operand.vmem [shape: f32[1,32], index: 8, kind: input, shape index: {}]   ;;  %s4872_s9 = inlined_call_operand.vmem [shape: f32[32,32], index: 9, kind: input, shape index: {}]   ;;  %s4873_s10 = inlined_call_operand.vmem [shape: f32[16,128], index: 10, kind: input, shape index: {}]   ;;  %s4874_s11 = inlined_call_operand.vmem [shape: f32[1,128], index: 11, kind: input, shape index: {}]   ;;  %s4875_s12 = inlined_call_operand.vmem [shape: f32[64,128], index: 12, kind: input, shape index: {}]   ;;  %s4876_s13 = inlined_call_operand.vmem [shape: f32[64,32], index: 13, kind: input, shape index: {}]   ;;  %s4877_s14 = inlined_call_operand.vmem [shape: f32[32,128], index: 14, kind: input, shape index: {}]   ;;  %s4878_s15 = inlined_call_operand.hbm [shape: f32[1,1], index: 15, kind: output, shape index: {}]  }
   0x1   :  { %v3930_v0 = vld [vmem:[%s4869_s6 + $0x8] sm:$0xff]  ;;  %v3935_v1 = vld [vmem:[%s4869_s6] sm:$0xff] }
   0x2   :  { %v3940_v2 = vld [vmem:[%s4868_s5 + $0x8] sm:$0xff]  ;;  %168 = vmatpush.msra.mxu2 %v3930_v0  ;;  %v3947_v3 = vld [vmem:[%s4868_s5] sm:$0xff]  ;;  %306 = vmatpush.msra.mxu1 %v3930_v0 }
   0x3   :  { %110 = vmatpush.msra.mxu3 %v3940_v2  ;;  %v54_v4 = vld [vmem:[%s4866_s3 + $0x8] sm:$0xff]  ;;  %v53_v5 = vld [vmem:[%s4866_s3] sm:$0xff] }
   0x4   :  { %80 = vmatpush.msra.mxu0 %v54_v4  ;;  %v51_v6 = vld [vmem:[%s4863_s0] sm:$0xff]  ;;  %169 = vmatpush.msra.mxu2 %v3935_v1 }
   0x5   :  { %111 = vmatpush.msra.mxu3 %v3947_v3 }
   0x6   :  { %20 = vsyncpa [#allocation3], 0  ;;  %v3838_v7 = vmov 0.0   ;;  %81 = vmatpush.msra.mxu0 %v53_v5  ;;  %307 = vmatpush.msra.mxu1 %v3935_v1  ;;  %v52_v8 = vld [vmem:[%s4863_s0 + $0x8] sm:$0xff]  ;;  %v3526_v9 = vld [vmem:[%s4867_s4] ss:$0 sm:$0xff] }
   0x7   :  { %170 = vmatmul.f32.vlgmr.msra.gmra.mxu2 %v3838_v7  ;;  %112 = vmatmul.f32.vlgmr.msra.gmra.mxu3 %v3838_v7  ;;  %s3839_s0 = smov 64   ;;  %s3840_s18 = smov 96  }
   0x8   :  { %3411 = vmatmul.msk.f32.vlgmr.msra.gmra.mxu0 %vm59_vm0, %v51_v6  ;;  %236 = vmatpush.msrb.mxu3 %v3940_v2  ;;  %s3841_s4 = smov 16   ;;  %s3842_s19 = smov 32  }
   0x9   :  { %378 = vmatpush.msrb.mxu2 %v3940_v2  ;;  %590 = vmatpush.msrb.mxu1 %v3930_v0  ;;  %s3843_s20 = smov 80   ;;  %s3844_s21 = smov 112  }
   0xa   :  { %237 = vmatpush.msrb.mxu3 %v3947_v3  ;;  %520 = vmatpush.msrb.mxu0 %v3940_v2  ;;  %s3402_s5 = sshll.u32 %s4878_s15, 4  ;;  %s3403_s5 = int_to_ptr.hbm [resolvable:$true] %s3402_s5 }
   0xb   :  { %379 = vmatpush.msrb.mxu2 %v3947_v3  ;;  %591 = vmatpush.msrb.mxu1 %v3935_v1 }
   0xc   :  { %448 = vmatpush.msra.mxu3 %v3930_v0  ;;  %521 = vmatpush.msrb.mxu0 %v3947_v3 }
   0xd   :  { %661 = vmatpush.msra.mxu2 %v3940_v2 }
   0xe   :  { %449 = vmatpush.msra.mxu3 %v3935_v1  ;;  %798 = vmatpush.msra.mxu0 %v3940_v2 }
   0xf   :  { %662 = vmatpush.msra.mxu2 %v3947_v3 }
  0x10   :  { %3412 = vmatmul.msk.f32.gmra.mxu0 %vm59_vm0, %v52_v8 }
  0x11   :  { %799 = vmatpush.msra.mxu0 %v3947_v3 }
  0x85   :  { %v83_v10 = vpop.f32.mrf.mxu0 }
  0x86   :  { %v3986_v11 = vadd.f32 %v3526_v9, %v83_v10 }
  0x8a   :  { %v171_v12 = vpop.f32.mrf.mxu2  ;;  %v113_v39 = vpop.f32.mrf.mxu3 }
  0x8b   :  { %v175_v13 = vrot.slane %v171_v12, 2  ;;  %v116_v42 = vadd.f32 %v113_v39, %v3986_v11 }
  0x8d   :  { %176 = vrot.lane.b32.xlu0 %v175_v13, %s3839_s0  ;;  %v86_v14 = vpop.f32.mrf.mxu0  ;;  %v3413_v44 = vmul.f32 -1.442695, %v116_v42 }
  0x8e   :  { %v3989_v15 = vadd.f32 %v3526_v9, %v86_v14 }
  0xff   :  { %v177_v16 = vpop.permute.xlu0 %176 }
 0x100   :  { %v179_v17 = vadd.f32 %v177_v16, %v3989_v15 }
 0x102   :  { %3529 = vtanh.f32 %v179_v17  ;;  %v3414_v19 = vmul.f32 -1.442695, %v179_v17 }
 0x104   :  { %3531 = vpow2.f32 %v3414_v19 }
 0x108   :  { %v3530_v18 = vpop.eup %3529 }
 0x109   :  { %202 = vrot.lane.b32.xlu0 %v3530_v18, %s3840_s18 }
 0x10a   :  { %v3532_v20 = vpop.eup %3531 }
 0x10b   :  { %v183_v21 = vadd.f32 1.0, %v3532_v20 }
 0x10d   :  { %3533 = vrcp.f32 %v183_v21  ;;  %v195_v27 = vand.u32 2147483648, %v183_v21  ;;  %vm189_vm2 = vweird.f32 %v183_v21  ;;  %v193_v28 = vand.u32 2147483647, %v183_v21 }
 0x10f   :  { %v196_v30 = vor.u32 1.1754944e-38, %v195_v27  ;;  %vm194_vm4 = vcmp.eq.f32.partialorder %v193_v28, 8.507059e+37 }
 0x113   :  { %v3534_v22 = vpop.eup %3533 }
 0x114   :  { %v185_v23 = vmul.f32 %v3534_v22, %v183_v21  ;;  %vm190_vm1 = vweird.f32 %v3534_v22 }
 0x115   :  { %vm191_vm3 = vmor %vm189_vm2, %vm190_vm1 }
 0x116   :  { %v186_v24 = vsub.f32 1.0, %v185_v23 }
 0x118   :  { %v187_v25 = vmul.f32 %v3534_v22, %v186_v24 }
 0x11a   :  { %v188_v26 = vadd.f32 %v3534_v22, %v187_v25 }
 0x11c   :  { %v192_v29 = vsel %vm191_vm3, %v3534_v22, %v188_v26 }
 0x11d   :  { %v197_v32 = vsel %vm194_vm4, %v196_v30, %v192_v29 }
 0x11e   :  { %v200_v34 = vmul.f32 0.0, %v197_v32 }
 0x17b   :  { %v203_v31 = vpop.permute.xlu0 %202 }
 0x17c   :  { %v205_v33 = vmul.f32 %v203_v31, %v197_v32 }
 0x17e   :  { %207 = vrot.lane.b32.xlu1 %v205_v33, %s3841_s4 }
 0x1f0   :  { %v208_v35 = vpop.permute.xlu1 %207 }
 0x1f1   :  { %v3994_v36 = vadd.f32 %v208_v35, %v200_v34 }
 0x1f3   :  { %3535 = vtanh.f32 %v3994_v36  ;;  %v339_v30 = vrot.slane %v3994_v36, 2 }
 0x1f4   :  { %3537 = vtanh.f32 %v116_v42 }
 0x1f5   :  { %3539 = vpow2.f32 %v3413_v44 }
 0x1f9   :  { %v3536_v37 = vpop.eup %3535 }
 0x1fa   :  { %213 = vrot.lane.b32.xlu1 %v3536_v37, %s3842_s19  ;;  %v3538_v43 = vpop.eup %3537 }
 0x1fb   :  { %v3540_v45 = vpop.eup %3539 }
 0x1fc   :  { %v120_v46 = vadd.f32 1.0, %v3540_v45 }
 0x1fe   :  { %3541 = vrcp.f32 %v120_v46  ;;  %vm126_vm5 = vweird.f32 %v120_v46  ;;  %v132_v52 = vand.u32 2147483648, %v120_v46  ;;  %v130_v54 = vand.u32 2147483647, %v120_v46 }
 0x200   :  { %v133_v55 = vor.u32 1.1754944e-38, %v132_v52  ;;  %vm131_vm8 = vcmp.eq.f32.partialorder %v130_v54, 8.507059e+37 }
 0x204   :  { %v3542_v47 = vpop.eup %3541 }
 0x205   :  { %v122_v48 = vmul.f32 %v3542_v47, %v120_v46  ;;  %vm127_vm6 = vweird.f32 %v3542_v47 }
 0x206   :  { %vm128_vm7 = vmor %vm126_vm5, %vm127_vm6 }
 0x207   :  { %v123_v49 = vsub.f32 1.0, %v122_v48 }
 0x209   :  { %v124_v50 = vmul.f32 %v3542_v47, %v123_v49 }
 0x20b   :  { %v125_v53 = vadd.f32 %v3542_v47, %v124_v50 }
 0x20d   :  { %v129_v56 = vsel %vm128_vm7, %v3542_v47, %v125_v53 }
 0x20e   :  { %v134_v58 = vsel %vm131_vm8, %v133_v55, %v129_v56 }
 0x20f   :  { %v137_v60 = vmul.f32 0.0, %v134_v58 }
 0x26c   :  { %v214_v38 = vpop.permute.xlu1 %213 }
 0x26d   :  { %v3998_v40 = vmul.f32 %v214_v38, %v197_v32 }
 0x26f   :  { %v287_v41 = vrot.slane %v3998_v40, 6 }
 0x271   :  { %288 = vrot.lane.b32.xlu2 %v287_v41, %s3841_s4 }
 0x279   :  { %139 = vrot.lane.b32.xlu2 %v3538_v43, %s3840_s18 }
 0x2cb   :  { %v289_v51 = vpop.permute.xlu2 %288 }
 0x2cc   :  { %3417 = vmatmul.msk.f32.vlgmr.msra.gmra.mxu1 %vm59_vm0, %v289_v51 }
 0x2cd   :  { %868 = vmatpush.msra.mxu1 %v3930_v0 }
 0x2cf   :  { %869 = vmatpush.msra.mxu1 %v3935_v1 }
 0x2d3   :  { %v140_v57 = vpop.permute.xlu2 %139 }
 0x2d4   :  { %v142_v59 = vmul.f32 %v140_v57, %v134_v58 }
 0x2d6   :  { %144 = vrot.lane.b32.xlu1 %v142_v59, %s3841_s4 }
 0x348   :  { %v145_v61 = vpop.permute.xlu1 %144 }
 0x349   :  { %v4008_v62 = vadd.f32 %v145_v61, %v137_v60  ;;  %v309_v63 = vpop.f32.mrf.mxu1 }
 0x34a   :  { %v313_v4 = vrot.slane %v309_v63, 4 }
 0x34b   :  { %3543 = vtanh.f32 %v4008_v62 }
 0x34c   :  { %314 = vrot.lane.b32.xlu0 %v313_v4, %s3839_s0 }
 0x351   :  { %v3544_v5 = vpop.eup %3543 }
 0x354   :  { %150 = vrot.lane.b32.xlu0 %v3544_v5, %s3842_s19 }
 0x3be   :  { %v315_v6 = vpop.permute.xlu0 %314 }
 0x3bf   :  { %v317_v8 = vadd.f32 %v315_v6, %v3989_v15 }
 0x3c1   :  { %3545 = vtanh.f32 %v317_v8  ;;  %v3418_v13 = vmul.f32 -1.442695, %v317_v8 }
 0x3c3   :  { %3547 = vpow2.f32 %v3418_v13 }
 0x3c6   :  { %v151_v10 = vpop.permute.xlu0 %150 }
 0x3c7   :  { %v3546_v9 = vpop.eup %3545  ;;  %v153_v12 = vmul.f32 %v151_v10, %v134_v58  ;;  %v267_v58 = vrot.slane %v4008_v62, 6 }
 0x3c8   :  { %343 = vrot.lane.b32.xlu2 %v3546_v9, %s3840_s18 }
 0x3c9   :  { %v3548_v14 = vpop.eup %3547 }
 0x3ca   :  { %v321_v16 = vadd.f32 1.0, %v3548_v14 }
 0x3cc   :  { %3549 = vrcp.f32 %v321_v16  ;;  %v333_v22 = vand.u32 2147483648, %v321_v16  ;;  %vm327_vm10 = vweird.f32 %v321_v16  ;;  %v331_v23 = vand.u32 2147483647, %v321_v16 }
 0x3ce   :  { %v334_v25 = vor.u32 1.1754944e-38, %v333_v22  ;;  %vm332_vm12 = vcmp.eq.f32.partialorder %v331_v23, 8.507059e+37 }
 0x3d0   :  { %218 = vrot.lane.b32.xlu2 %v153_v12, %s3843_s20 }
 0x3d2   :  { %v3550_v17 = vpop.eup %3549 }
 0x3d3   :  { %v323_v18 = vmul.f32 %v3550_v17, %v321_v16  ;;  %vm328_vm9 = vweird.f32 %v3550_v17 }
 0x3d4   :  { %vm329_vm11 = vmor %vm327_vm10, %vm328_vm9 }
 0x3d5   :  { %v324_v19 = vsub.f32 1.0, %v323_v18 }
 0x3d7   :  { %v325_v20 = vmul.f32 %v3550_v17, %v324_v19 }
 0x3d9   :  { %v326_v21 = vadd.f32 %v3550_v17, %v325_v20 }
 0x3db   :  { %v330_v24 = vsel %vm329_vm11, %v3550_v17, %v326_v21 }
 0x3dc   :  { %v335_v26 = vsel %vm332_vm12, %v334_v25, %v330_v24 }
 0x3dd   :  { %v341_v31 = vmul.f32 %v339_v30, %v335_v26 }
 0x422   :  { %v344_v27 = vpop.permute.xlu2 %343 }
 0x423   :  { %v346_v28 = vmul.f32 %v344_v27, %v335_v26 }
 0x425   :  { %348 = vrot.lane.b32.xlu1 %v346_v28, %s3841_s4 }
 0x42a   :  { %v4017_v29 = vpop.permute.xlu2 %218 }
 0x42b   :  { %3415 = vmatmul.msk.f32.vlgmr.msrb.gmra.mxu3 %vm59_vm0, %v4017_v29 }
 0x42c   :  { %727 = vmatpush.msrb.mxu3 %v3930_v0 }
 0x42e   :  { %728 = vmatpush.msrb.mxu3 %v3935_v1 }
 0x497   :  { %v349_v32 = vpop.permute.xlu1 %348 }
 0x498   :  { %v4024_v33 = vadd.f32 %v349_v32, %v341_v31 }
 0x49a   :  { %3551 = vtanh.f32 %v4024_v33 }
 0x4a0   :  { %v3552_v34 = vpop.eup %3551 }
 0x4a1   :  { %354 = vrot.lane.b32.xlu0 %v3552_v34, %s3842_s19 }
 0x4ae   :  { %v239_v35 = vpop.f32.mrf.mxu3 }
 0x4af   :  { %v243_v37 = vrot.slane %v239_v35, 6 }
 0x4b1   :  { %v245_v38 = vadd.f32 %v243_v37, %v3986_v11 }
 0x4b3   :  { %3553 = vtanh.f32 %v245_v38  ;;  %v3416_v41 = vmul.f32 -1.442695, %v245_v38 }
 0x4b5   :  { %3555 = vpow2.f32 %v3416_v41 }
 0x4b9   :  { %v3554_v39 = vpop.eup %3553 }
 0x4ba   :  { %271 = vrot.lane.b32.xlu2 %v3554_v39, %s3840_s18 }
 0x4bb   :  { %v3556_v36 = vpop.eup %3555 }
 0x4bc   :  { %v249_v42 = vadd.f32 1.0, %v3556_v36  ;;  %v481_v36 = vrot.slane %v4024_v33, 2 }
 0x4be   :  { %3557 = vrcp.f32 %v249_v42  ;;  %v261_v48 = vand.u32 2147483648, %v249_v42  ;;  %vm255_vm14 = vweird.f32 %v249_v42  ;;  %v259_v49 = vand.u32 2147483647, %v249_v42 }
 0x4c0   :  { %v262_v51 = vor.u32 1.1754944e-38, %v261_v48  ;;  %vm260_vm1 = vcmp.eq.f32.partialorder %v259_v49, 8.507059e+37 }
 0x4c4   :  { %v3558_v43 = vpop.eup %3557 }
 0x4c5   :  { %v251_v44 = vmul.f32 %v3558_v43, %v249_v42  ;;  %vm256_vm13 = vweird.f32 %v3558_v43 }
 0x4c6   :  { %vm257_vm15 = vmor %vm255_vm14, %vm256_vm13 }
 0x4c7   :  { %v252_v45 = vsub.f32 1.0, %v251_v44 }
 0x4c9   :  { %v253_v46 = vmul.f32 %v3558_v43, %v252_v45 }
 0x4cb   :  { %v254_v47 = vadd.f32 %v3558_v43, %v253_v46 }
 0x4cd   :  { %v258_v50 = vsel %vm257_vm15, %v3558_v43, %v254_v47 }
 0x4ce   :  { %v263_v55 = vsel %vm260_vm1, %v262_v51, %v258_v50 }
 0x4cf   :  { %v269_v59 = vmul.f32 %v267_v58, %v263_v55 }
 0x513   :  { %v355_v52 = vpop.permute.xlu0 %354 }
 0x514   :  { %v4030_v53 = vmul.f32 %v355_v52, %v335_v26  ;;  %v272_v54 = vpop.permute.xlu2 %271 }
 0x515   :  { %v274_v56 = vmul.f32 %v272_v54, %v263_v55 }
 0x516   :  { %v429_v57 = vrot.slane %v4030_v53, 4 }
 0x517   :  { %276 = vrot.lane.b32.xlu0 %v274_v56, %s3841_s4 }
 0x518   :  { %430 = vrot.lane.b32.xlu1 %v429_v57, %s3841_s4 }
 0x589   :  { %v277_v60 = vpop.permute.xlu0 %276 }
 0x58a   :  { %v4036_v61 = vadd.f32 %v277_v60, %v269_v59  ;;  %v431_v63 = vpop.permute.xlu1 %430 }
 0x58b   :  { %3421 = vmatmul.msk.f32.vlgmr.msra.gmra.mxu3 %vm59_vm0, %v431_v63 }
 0x58c   :  { %3559 = vtanh.f32 %v4036_v61  ;;  %1010 = vmatpush.msra.mxu3 %v3930_v0  ;;  %v409_v63 = vrot.slane %v4036_v61, 6 }
 0x58e   :  { %1011 = vmatpush.msra.mxu3 %v3935_v1 }
 0x592   :  { %v3560_v4 = vpop.eup %3559 }
 0x593   :  { %282 = vrot.lane.b32.xlu2 %v3560_v4, %s3842_s19 }
 0x5ed   :  { %v283_v8 = vpop.permute.xlu2 %282 }
 0x5ee   :  { %v4044_v62 = vmul.f32 %v283_v8, %v263_v55 }
 0x5f0   :  { %v359_v9 = vrot.slane %v4044_v62, 2 }
 0x60e   :  { %v451_v5 = vpop.f32.mrf.mxu3 }
 0x60f   :  { %v455_v6 = vrot.slane %v451_v5, 6 }
 0x611   :  { %456 = vrot.lane.b32.xlu1 %v455_v6, %s3839_s0 }
 0x619   :  { %360 = vrot.lane.b32.xlu1 %v359_v9, %s3843_s20 }
 0x683   :  { %v457_v10 = vpop.permute.xlu1 %456 }
 0x684   :  { %v459_v12 = vadd.f32 %v457_v10, %v3989_v15 }
 0x686   :  { %3561 = vtanh.f32 %v459_v12  ;;  %v3422_v16 = vmul.f32 -1.442695, %v459_v12 }
 0x688   :  { %3563 = vpow2.f32 %v3422_v16 }
 0x68b   :  { %v361_v13 = vpop.permute.xlu1 %360 }
 0x68c   :  { %v3562_v14 = vpop.eup %3561  ;;  %3419 = vmatmul.msk.f32.vlgmr.msrb.gmra.mxu2 %vm59_vm0, %v361_v13 }
 0x68d   :  { %485 = vrot.lane.b32.xlu0 %v3562_v14, %s3840_s18  ;;  %940 = vmatpush.msrb.mxu2 %v3940_v2 }
 0x68e   :  { %v3564_v17 = vpop.eup %3563 }
 0x68f   :  { %941 = vmatpush.msrb.mxu2 %v3947_v3  ;;  %v463_v18 = vadd.f32 1.0, %v3564_v17 }
 0x691   :  { %3565 = vrcp.f32 %v463_v18  ;;  %v475_v24 = vand.u32 2147483648, %v463_v18  ;;  %vm469_vm3 = vweird.f32 %v463_v18  ;;  %v473_v25 = vand.u32 2147483647, %v463_v18 }
 0x693   :  { %v476_v27 = vor.u32 1.1754944e-38, %v475_v24  ;;  %vm474_vm5 = vcmp.eq.f32.partialorder %v473_v25, 8.507059e+37 }
 0x697   :  { %v3566_v19 = vpop.eup %3565 }
 0x698   :  { %v465_v20 = vmul.f32 %v3566_v19, %v463_v18  ;;  %vm470_vm2 = vweird.f32 %v3566_v19 }
 0x699   :  { %vm471_vm4 = vmor %vm469_vm3, %vm470_vm2 }
 0x69a   :  { %v466_v21 = vsub.f32 1.0, %v465_v20 }
 0x69c   :  { %v467_v22 = vmul.f32 %v3566_v19, %v466_v21 }
 0x69e   :  { %v468_v23 = vadd.f32 %v3566_v19, %v467_v22 }
 0x6a0   :  { %v472_v26 = vsel %vm471_vm4, %v3566_v19, %v468_v23 }
 0x6a1   :  { %v477_v28 = vsel %vm474_vm5, %v476_v27, %v472_v26 }
 0x6a2   :  { %v483_v42 = vmul.f32 %v481_v36, %v477_v28 }
 0x6ff   :  { %v486_v30 = vpop.permute.xlu0 %485 }
 0x700   :  { %v488_v31 = vmul.f32 %v486_v30, %v477_v28 }
 0x702   :  { %490 = vrot.lane.b32.xlu2 %v488_v31, %s3841_s4 }
 0x70f   :  { %v381_v32 = vpop.f32.mrf.mxu2 }
 0x710   :  { %v385_v34 = vrot.slane %v381_v32, 4 }
 0x712   :  { %v387_v35 = vadd.f32 %v385_v34, %v3986_v11 }
 0x714   :  { %3567 = vtanh.f32 %v387_v35  ;;  %v3420_v38 = vmul.f32 -1.442695, %v387_v35 }
 0x716   :  { %3569 = vpow2.f32 %v3420_v38 }
 0x71a   :  { %v3568_v37 = vpop.eup %3567 }
 0x71b   :  { %413 = vrot.lane.b32.xlu2 %v3568_v37, %s3840_s18 }
 0x71c   :  { %v3570_v39 = vpop.eup %3569 }
 0x71d   :  { %v391_v41 = vadd.f32 1.0, %v3570_v39 }
 0x71f   :  { %3571 = vrcp.f32 %v391_v41  ;;  %v403_v51 = vand.u32 2147483648, %v391_v41  ;;  %vm397_vm7 = vweird.f32 %v391_v41  ;;  %v401_v52 = vand.u32 2147483647, %v391_v41 }
 0x721   :  { %v404_v54 = vor.u32 1.1754944e-38, %v403_v51  ;;  %vm402_vm9 = vcmp.eq.f32.partialorder %v401_v52, 8.507059e+37 }
 0x725   :  { %v3572_v45 = vpop.eup %3571 }
 0x726   :  { %v393_v46 = vmul.f32 %v3572_v45, %v391_v41  ;;  %vm398_vm6 = vweird.f32 %v3572_v45 }
 0x727   :  { %vm399_vm8 = vmor %vm397_vm7, %vm398_vm6 }
 0x728   :  { %v394_v48 = vsub.f32 1.0, %v393_v46 }
 0x72a   :  { %v395_v49 = vmul.f32 %v3572_v45, %v394_v48 }
 0x72c   :  { %v396_v50 = vadd.f32 %v3572_v45, %v395_v49 }
 0x72e   :  { %v400_v33 = vsel %vm399_vm8, %v3572_v45, %v396_v50 }
 0x72f   :  { %v405_v55 = vsel %vm402_vm9, %v404_v54, %v400_v33 }
 0x730   :  { %v411_v4 = vmul.f32 %v409_v63, %v405_v55 }
 0x75c   :  { %v491_v43 = vpop.permute.xlu2 %490 }
 0x75d   :  { %v4057_v44 = vadd.f32 %v491_v43, %v483_v42 }
 0x75f   :  { %3573 = vtanh.f32 %v4057_v44  ;;  %v622_v42 = vrot.slane %v4057_v44, 2 }
 0x765   :  { %v3574_v47 = vpop.eup %3573 }
 0x766   :  { %496 = vrot.lane.b32.xlu0 %v3574_v47, %s3842_s19 }
 0x775   :  { %v414_v56 = vpop.permute.xlu2 %413 }
 0x776   :  { %v416_v57 = vmul.f32 %v414_v56, %v405_v55 }
 0x778   :  { %418 = vrot.lane.b32.xlu0 %v416_v57, %s3841_s4 }
 0x7d8   :  { %v497_v58 = vpop.permute.xlu0 %496 }
 0x7d9   :  { %v4062_v59 = vmul.f32 %v497_v58, %v477_v28 }
 0x7db   :  { %v571_v60 = vrot.slane %v4062_v59, 2 }
 0x7dd   :  { %572 = vrot.lane.b32.xlu1 %v571_v60, %s3841_s4 }
 0x7ea   :  { %v419_v5 = vpop.permute.xlu0 %418 }
 0x7eb   :  { %v4067_v6 = vadd.f32 %v419_v5, %v411_v4 }
 0x7ed   :  { %3575 = vtanh.f32 %v4067_v6  ;;  %v551_v60 = vrot.slane %v4067_v6, 6 }
 0x7f3   :  { %v3576_v8 = vpop.eup %3575 }
 0x7f4   :  { %424 = vrot.lane.b32.xlu1 %v3576_v8, %s3842_s19 }
 0x84f   :  { %v573_v9 = vpop.permute.xlu1 %572 }
 0x850   :  { %3425 = vmatmul.msk.f32.vlgmr.msrb.gmra.mxu1 %vm59_vm0, %v573_v9 }
 0x851   :  { %1152 = vmatpush.msrb.mxu1 %v3930_v0 }
 0x853   :  { %1153 = vmatpush.msrb.mxu1 %v3935_v1 }
 0x866   :  { %v425_v10 = vpop.permute.xlu1 %424 }
 0x867   :  { %v4074_v12 = vmul.f32 %v425_v10, %v405_v55 }
 0x869   :  { %v501_v61 = vrot.slane %v4074_v12, 4 }
 0x86b   :  { %502 = vrot.lane.b32.xlu0 %v501_v61, %s3843_s20 }
 0x8cd   :  { %v593_v13 = vpop.f32.mrf.mxu1 }
 0x8ce   :  { %597 = vrot.lane.b32.xlu2 %v593_v13, %s3839_s0 }
 0x8dd   :  { %v503_v14 = vpop.permute.xlu0 %502 }
 0x8de   :  { %3423 = vmatmul.msk.f32.vlgmr.msrb.gmra.mxu0 %vm59_vm0, %v503_v14 }
 0x8df   :  { %1082 = vmatpush.msrb.mxu0 %v3940_v2 }
 0x8e1   :  { %1083 = vmatpush.msrb.mxu0 %v3947_v3 }
 0x928   :  { %v598_v0 = vpop.permute.xlu2 %597 }
 0x929   :  { %v600_v1 = vadd.f32 %v598_v0, %v3989_v15 }
 0x92b   :  { %3577 = vtanh.f32 %v600_v1  ;;  %v3426_v17 = vmul.f32 -1.442695, %v600_v1 }
 0x92d   :  { %3579 = vpow2.f32 %v3426_v17 }
 0x931   :  { %v3578_v16 = vpop.eup %3577 }
 0x932   :  { %626 = vrot.lane.b32.xlu1 %v3578_v16, %s3840_s18 }
 0x933   :  { %v3580_v18 = vpop.eup %3579 }
 0x934   :  { %v604_v19 = vadd.f32 1.0, %v3580_v18 }
 0x936   :  { %3581 = vrcp.f32 %v604_v19  ;;  %v616_v3 = vand.u32 2147483648, %v604_v19  ;;  %vm610_vm11 = vweird.f32 %v604_v19  ;;  %v614_v25 = vand.u32 2147483647, %v604_v19 }
 0x938   :  { %v617_v28 = vor.u32 1.1754944e-38, %v616_v3  ;;  %vm615_vm13 = vcmp.eq.f32.partialorder %v614_v25, 8.507059e+37 }
 0x93c   :  { %v3582_v20 = vpop.eup %3581 }
 0x93d   :  { %v606_v21 = vmul.f32 %v3582_v20, %v604_v19  ;;  %vm611_vm10 = vweird.f32 %v3582_v20 }
 0x93e   :  { %vm612_vm12 = vmor %vm610_vm11, %vm611_vm10 }
 0x93f   :  { %v607_v22 = vsub.f32 1.0, %v606_v21 }
 0x941   :  { %v608_v23 = vmul.f32 %v3582_v20, %v607_v22 }
 0x943   :  { %v609_v2 = vadd.f32 %v3582_v20, %v608_v23 }
 0x945   :  { %v613_v27 = vsel %vm612_vm12, %v3582_v20, %v609_v2 }
 0x946   :  { %v618_v32 = vsel %vm615_vm13, %v617_v28, %v613_v27 }
 0x947   :  { %v624_v43 = vmul.f32 %v622_v42, %v618_v32 }
 0x95b   :  { %v523_v24 = vpop.f32.mrf.mxu0 }
 0x95c   :  { %v527_v26 = vrot.slane %v523_v24, 2 }
 0x95e   :  { %v529_v30 = vadd.f32 %v527_v26, %v3986_v11 }
 0x960   :  { %3583 = vtanh.f32 %v529_v30  ;;  %v3424_v37 = vmul.f32 -1.442695, %v529_v30 }
 0x962   :  { %3585 = vpow2.f32 %v3424_v37 }
 0x966   :  { %v3584_v35 = vpop.eup %3583 }
 0x968   :  { %v3586_v38 = vpop.eup %3585 }
 0x969   :  { %v533_v39 = vadd.f32 1.0, %v3586_v38 }
 0x96b   :  { %3587 = vrcp.f32 %v533_v39  ;;  %v545_v51 = vand.u32 2147483648, %v533_v39  ;;  %vm539_vm15 = vweird.f32 %v533_v39  ;;  %v543_v52 = vand.u32 2147483647, %v533_v39 }
 0x96d   :  { %v546_v54 = vor.u32 1.1754944e-38, %v545_v51  ;;  %vm544_vm2 = vcmp.eq.f32.partialorder %v543_v52, 8.507059e+37 }
 0x971   :  { %v3588_v41 = vpop.eup %3587 }
 0x972   :  { %v535_v36 = vmul.f32 %v3588_v41, %v533_v39  ;;  %vm540_vm14 = vweird.f32 %v3588_v41 }
 0x973   :  { %vm541_vm1 = vmor %vm539_vm15, %vm540_vm14 }
 0x974   :  { %v536_v46 = vsub.f32 1.0, %v535_v36 }
 0x976   :  { %v537_v48 = vmul.f32 %v3588_v41, %v536_v46 }
 0x978   :  { %v538_v49 = vadd.f32 %v3588_v41, %v537_v48 }
 0x97a   :  { %v542_v33 = vsel %vm541_vm1, %v3588_v41, %v538_v49 }
 0x97b   :  { %v547_v55 = vsel %vm544_vm2, %v546_v54, %v542_v33 }
 0x97c   :  { %v553_v63 = vmul.f32 %v551_v60, %v547_v55 }
 0x9a4   :  { %v627_v31 = vpop.permute.xlu1 %626 }
 0x9a5   :  { %v629_v34 = vmul.f32 %v627_v31, %v618_v32 }
 0x9a7   :  { %631 = vrot.lane.b32.xlu2 %v629_v34, %s3841_s4 }
 0x9af   :  { %555 = vrot.lane.b32.xlu2 %v3584_v35, %s3840_s18 }
 0xa01   :  { %v632_v45 = vpop.permute.xlu2 %631 }
 0xa02   :  { %v4088_v47 = vadd.f32 %v632_v45, %v624_v43 }
 0xa04   :  { %3589 = vtanh.f32 %v4088_v47  ;;  %v760_v42 = vrot.slane %v4088_v47, 2 }
 0xa09   :  { %v556_v44 = vpop.permute.xlu2 %555 }
 0xa0a   :  { %v3590_v50 = vpop.eup %3589  ;;  %v558_v56 = vmul.f32 %v556_v44, %v547_v55 }
 0xa0b   :  { %637 = vrot.lane.b32.xlu0 %v3590_v50, %s3842_s19 }
 0xa13   :  { %560 = vrot.lane.b32.xlu0 %v558_v56, %s3841_s4 }
 0xa7d   :  { %v638_v57 = vpop.permute.xlu0 %637 }
 0xa7e   :  { %v4093_v58 = vmul.f32 %v638_v57, %v618_v32 }
 0xa80   :  { %709 = vrot.lane.b32.xlu1 %v4093_v58, %s3841_s4 }
 0xa85   :  { %v561_v4 = vpop.permute.xlu0 %560 }
 0xa86   :  { %v4098_v5 = vadd.f32 %v561_v4, %v553_v63 }
 0xa88   :  { %3591 = vtanh.f32 %v4098_v5  ;;  %v689_v4 = vrot.slane %v4098_v5, 6 }
 0xa8e   :  { %v3592_v8 = vpop.eup %3591 }
 0xa8f   :  { %566 = vrot.lane.b32.xlu1 %v3592_v8, %s3842_s19 }
 0xaf2   :  { %v710_v9 = vpop.permute.xlu1 %709 }
 0xaf3   :  { %3429 = vmatmul.msk.f32.vlgmr.msrb.gmra.mxu3 %vm59_vm0, %v710_v9 }
 0xb01   :  { %v567_v10 = vpop.permute.xlu1 %566 }
 0xb02   :  { %v4103_v61 = vmul.f32 %v567_v10, %v547_v55 }
 0xb04   :  { %v642_v13 = vrot.slane %v4103_v61, 6 }
 0xb06   :  { %643 = vrot.lane.b32.xlu2 %v642_v13, %s3843_s20 }
 0xb60   :  { %v644_v6 = vpop.permute.xlu2 %643 }
 0xb61   :  { %3427 = vmatmul.msk.f32.vlgmr.msra.gmra.mxu2 %vm59_vm0, %v644_v6 }
 0xb76   :  { %v730_v14 = vpop.f32.mrf.mxu3 }
 0xb77   :  { %v734_v0 = vrot.slane %v730_v14, 2 }
 0xb79   :  { %735 = vrot.lane.b32.xlu0 %v734_v0, %s3839_s0 }
 0xbe4   :  { %v664_v17 = vpop.f32.mrf.mxu2 }
 0xbe5   :  { %v667_v18 = vadd.f32 %v664_v17, %v3989_v15 }
 0xbe7   :  { %v3428_v37 = vmul.f32 -1.442695, %v667_v18 }
 0xbeb   :  { %v736_v1 = vpop.permute.xlu0 %735 }
 0xbec   :  { %v738_v16 = vadd.f32 %v736_v1, %v3986_v11 }
 0xbee   :  { %3593 = vtanh.f32 %v738_v16  ;;  %v3430_v21 = vmul.f32 -1.442695, %v738_v16 }
 0xbef   :  { %3595 = vtanh.f32 %v667_v18 }
 0xbf0   :  { %3597 = vpow2.f32 %v3430_v21 }
 0xbf4   :  { %v3594_v19 = vpop.eup %3593 }
 0xbf5   :  { %764 = vrot.lane.b32.xlu1 %v3594_v19, %s3840_s18  ;;  %v3596_v20 = vpop.eup %3595 }
 0xbf6   :  { %v3598_v22 = vpop.eup %3597 }
 0xbf7   :  { %v742_v23 = vadd.f32 1.0, %v3598_v22 }
 0xbf9   :  { %3599 = vrcp.f32 %v742_v23  ;;  %v754_v27 = vand.u32 2147483648, %v742_v23  ;;  %vm748_vm4 = vweird.f32 %v742_v23  ;;  %v752_v28 = vand.u32 2147483647, %v742_v23 }
 0xbfa   :  { %3601 = vpow2.f32 %v3428_v37 }
 0xbfb   :  { %v755_v31 = vor.u32 1.1754944e-38, %v754_v27  ;;  %vm753_vm6 = vcmp.eq.f32.partialorder %v752_v28, 8.507059e+37 }
 0xbfd   :  { %693 = vrot.lane.b32.xlu1 %v3596_v20, %s3840_s18 }
 0xbff   :  { %v3600_v24 = vpop.eup %3599 }
 0xc00   :  { %v744_v2 = vmul.f32 %v3600_v24, %v742_v23  ;;  %vm749_vm3 = vweird.f32 %v3600_v24  ;;  %v3602_v38 = vpop.eup %3601 }
 0xc01   :  { %vm750_vm5 = vmor %vm748_vm4, %vm749_vm3  ;;  %v671_v39 = vadd.f32 1.0, %v3602_v38 }
 0xc02   :  { %v745_v3 = vsub.f32 1.0, %v744_v2 }
 0xc03   :  { %3603 = vrcp.f32 %v671_v39  ;;  %v683_v52 = vand.u32 2147483648, %v671_v39  ;;  %vm677_vm8 = vweird.f32 %v671_v39  ;;  %v681_v33 = vand.u32 2147483647, %v671_v39 }
 0xc04   :  { %v746_v25 = vmul.f32 %v3600_v24, %v745_v3 }
 0xc05   :  { %v684_v44 = vor.u32 1.1754944e-38, %v683_v52  ;;  %vm682_vm10 = vcmp.eq.f32.partialorder %v681_v33, 8.507059e+37 }
 0xc06   :  { %v747_v26 = vadd.f32 %v3600_v24, %v746_v25 }
 0xc08   :  { %v751_v30 = vsel %vm750_vm5, %v3600_v24, %v747_v26 }
 0xc09   :  { %v756_v34 = vsel %vm753_vm6, %v755_v31, %v751_v30  ;;  %v3604_v41 = vpop.eup %3603 }
 0xc0a   :  { %v673_v36 = vmul.f32 %v3604_v41, %v671_v39  ;;  %v762_v43 = vmul.f32 %v760_v42, %v756_v34  ;;  %vm678_vm7 = vweird.f32 %v3604_v41 }
 0xc0b   :  { %vm679_vm9 = vmor %vm677_vm8, %vm678_vm7 }
 0xc0c   :  { %v674_v45 = vsub.f32 1.0, %v673_v36 }
 0xc0e   :  { %v675_v49 = vmul.f32 %v3604_v41, %v674_v45 }
 0xc10   :  { %v676_v50 = vadd.f32 %v3604_v41, %v675_v49 }
 0xc12   :  { %v680_v54 = vsel %vm679_vm9, %v3604_v41, %v676_v50 }
 0xc13   :  { %v685_v55 = vsel %vm682_vm10, %v684_v44, %v680_v54 }
 0xc14   :  { %v691_v8 = vmul.f32 %v689_v4, %v685_v55 }
 0xc67   :  { %v765_v32 = vpop.permute.xlu1 %764 }
 0xc68   :  { %v767_v35 = vmul.f32 %v765_v32, %v756_v34 }
 0xc6a   :  { %769 = vrot.lane.b32.xlu2 %v767_v35, %s3841_s4 }
 0xc6f   :  { %v694_v47 = vpop.permute.xlu1 %693 }
 0xc70   :  { %v696_v56 = vmul.f32 %v694_v47, %v685_v55 }
 0xcc4   :  { %v770_v46 = vpop.permute.xlu2 %769 }
 0xcc5   :  { %v4115_v48 = vadd.f32 %v770_v46, %v762_v43 }
 0xcc7   :  { %3605 = vtanh.f32 %v4115_v48 }
 0xccd   :  { %v3606_v51 = vpop.eup %3605 }
 0xcce   :  { %775 = vrot.lane.b32.xlu0 %v3606_v51, %s3842_s19 }
 0xcd6   :  { %698 = vrot.lane.b32.xlu0 %v696_v56, %s3841_s4  ;;  %v901_v56 = vrot.slane %v4115_v48, 2 }
 0xd40   :  { %v776_v57 = vpop.permute.xlu0 %775 }
 0xd41   :  { %v4120_v60 = vmul.f32 %v776_v57, %v756_v34 }
 0xd43   :  { %v849_v63 = vrot.slane %v4120_v60, 6 }
 0xd45   :  { %850 = vrot.lane.b32.xlu2 %v849_v63, %s3841_s4 }
 0xd48   :  { %v699_v9 = vpop.permute.xlu0 %698 }
 0xd49   :  { %v4125_v10 = vadd.f32 %v699_v9, %v691_v8 }
 0xd4b   :  { %3607 = vtanh.f32 %v4125_v10  ;;  %v829_v9 = vrot.slane %v4125_v10, 6 }
 0xd51   :  { %v3608_v13 = vpop.eup %3607 }
 0xd52   :  { %704 = vrot.lane.b32.xlu1 %v3608_v13, %s3842_s19 }
 0xd9f   :  { %v851_v6 = vpop.permute.xlu2 %850 }
 0xda0   :  { %3433 = vmatmul.msk.f32.vlgmr.msra.gmra.mxu1 %vm59_vm0, %v851_v6 }
 0xdc4   :  { %v705_v14 = vpop.permute.xlu1 %704 }
 0xdc5   :  { %v707_v0 = vmul.f32 %v705_v14, %v685_v55 }
 0xdc7   :  { %780 = vrot.lane.b32.xlu2 %v707_v0, %s3843_s20 }
 0xe1d   :  { %v871_v1 = vpop.f32.mrf.mxu1 }
 0xe1e   :  { %v875_v5 = vrot.slane %v871_v1, 4 }
 0xe20   :  { %876 = vrot.lane.b32.xlu0 %v875_v5, %s3839_s0 }
 0xe21   :  { %v4132_v16 = vpop.permute.xlu2 %780 }
 0xe22   :  { %3431 = vmatmul.msk.f32.vlgmr.msra.gmra.mxu0 %vm59_vm0, %v4132_v16 }
 0xe92   :  { %v877_v17 = vpop.permute.xlu0 %876 }
 0xe93   :  { %v879_v18 = vadd.f32 %v877_v17, %v3986_v11 }
 0xe95   :  { %3609 = vtanh.f32 %v879_v18  ;;  %v3434_v24 = vmul.f32 -1.442695, %v879_v18 }
 0xe9b   :  { %v3610_v19 = vpop.eup %3609 }
 0xe9c   :  { %905 = vrot.lane.b32.xlu1 %v3610_v19, %s3840_s18 }
 0xe9f   :  { %v801_v20 = vpop.f32.mrf.mxu0 }
 0xea0   :  { %v805_v21 = vrot.slane %v801_v20, 6 }
 0xea2   :  { %v807_v22 = vadd.f32 %v805_v21, %v3989_v15 }
 0xea4   :  { %3611 = vtanh.f32 %v807_v22  ;;  %v3432_v25 = vmul.f32 -1.442695, %v807_v22 }
 0xea5   :  { %3613 = vpow2.f32 %v3434_v24 }
 0xeaa   :  { %v3612_v23 = vpop.eup %3611 }
 0xeab   :  { %833 = vrot.lane.b32.xlu0 %v3612_v23, %s3840_s18  ;;  %v3614_v2 = vpop.eup %3613 }
 0xeac   :  { %v883_v3 = vadd.f32 1.0, %v3614_v2 }
 0xeae   :  { %3615 = vrcp.f32 %v883_v3  ;;  %v895_v37 = vand.u32 2147483648, %v883_v3  ;;  %vm889_vm12 = vweird.f32 %v883_v3  ;;  %v893_v38 = vand.u32 2147483647, %v883_v3 }
 0xeaf   :  { %3617 = vpow2.f32 %v3432_v25 }
 0xeb0   :  { %v896_v36 = vor.u32 1.1754944e-38, %v895_v37  ;;  %vm894_vm14 = vcmp.eq.f32.partialorder %v893_v38, 8.507059e+37 }
 0xeb4   :  { %v3616_v26 = vpop.eup %3615 }
 0xeb5   :  { %v3618_v27 = vpop.eup %3617  ;;  %v885_v28 = vmul.f32 %v3616_v26, %v883_v3  ;;  %vm890_vm11 = vweird.f32 %v3616_v26 }
 0xeb6   :  { %v811_v30 = vadd.f32 1.0, %v3618_v27  ;;  %vm891_vm13 = vmor %vm889_vm12, %vm890_vm11 }
 0xeb7   :  { %v886_v31 = vsub.f32 1.0, %v885_v28 }
 0xeb8   :  { %3619 = vrcp.f32 %v811_v30  ;;  %v823_v51 = vand.u32 2147483648, %v811_v30  ;;  %vm817_vm1 = vweird.f32 %v811_v30  ;;  %v821_v52 = vand.u32 2147483647, %v811_v30 }
 0xeb9   :  { %v887_v32 = vmul.f32 %v3616_v26, %v886_v31 }
 0xeba   :  { %v824_v54 = vor.u32 1.1754944e-38, %v823_v51  ;;  %vm822_vm3 = vcmp.eq.f32.partialorder %v821_v52, 8.507059e+37 }
 0xebb   :  { %v888_v35 = vadd.f32 %v3616_v26, %v887_v32 }
 0xebd   :  { %v892_v41 = vsel %vm891_vm13, %v3616_v26, %v888_v35 }
 0xebe   :  { %v3620_v34 = vpop.eup %3619  ;;  %v897_v43 = vsel %vm894_vm14, %v896_v36, %v892_v41 }
 0xebf   :  { %v813_v39 = vmul.f32 %v3620_v34, %v811_v30  ;;  %vm818_vm15 = vweird.f32 %v3620_v34  ;;  %v903_v57 = vmul.f32 %v901_v56, %v897_v43 }
 0xec0   :  { %vm819_vm2 = vmor %vm817_vm1, %vm818_vm15 }
 0xec1   :  { %v814_v45 = vsub.f32 1.0, %v813_v39 }
 0xec3   :  { %v815_v49 = vmul.f32 %v3620_v34, %v814_v45 }
 0xec5   :  { %v816_v50 = vadd.f32 %v3620_v34, %v815_v49 }
 0xec7   :  { %v820_v33 = vsel %vm819_vm2, %v3620_v34, %v816_v50 }
 0xec8   :  { %v825_v44 = vsel %vm822_vm3, %v824_v54, %v820_v33 }
 0xec9   :  { %v831_v13 = vmul.f32 %v829_v9, %v825_v44 }
 0xf0e   :  { %v906_v42 = vpop.permute.xlu1 %905 }
 0xf0f   :  { %v908_v46 = vmul.f32 %v906_v42, %v897_v43 }
 0xf11   :  { %910 = vrot.lane.b32.xlu2 %v908_v46, %s3841_s4 }
 0xf1d   :  { %v834_v47 = vpop.permute.xlu0 %833 }
 0xf1e   :  { %v836_v55 = vmul.f32 %v834_v47, %v825_v44 }
 0xf20   :  { %838 = vrot.lane.b32.xlu2 %v836_v55, %s3841_s4 }
 0xf6b   :  { %v911_v63 = vpop.permute.xlu2 %910 }
 0xf6c   :  { %v4143_v4 = vadd.f32 %v911_v63, %v903_v57 }
 0xf6e   :  { %3621 = vtanh.f32 %v4143_v4 }
 0xf74   :  { %v3622_v8 = vpop.eup %3621 }
 0xf75   :  { %916 = vrot.lane.b32.xlu1 %v3622_v8, %s3842_s19 }
 0xf7a   :  { %v839_v6 = vpop.permute.xlu2 %838 }
 0xf7b   :  { %v4148_v14 = vadd.f32 %v839_v6, %v831_v13 }
 0xf7d   :  { %3623 = vtanh.f32 %v4148_v14  ;;  %v971_v6 = vrot.slane %v4148_v14, 6 }
 0xf83   :  { %v3624_v0 = vpop.eup %3623 }
 0xf84   :  { %844 = vrot.lane.b32.xlu1 %v3624_v0, %s3842_s19 }
 0xfe7   :  { %v917_v48 = vpop.permute.xlu1 %916 }
 0xfe8   :  { %v4152_v1 = vmul.f32 %v917_v48, %v897_v43 }
 0xfea   :  { %v991_v5 = vrot.slane %v4152_v1, 4 }
 0xfec   :  { %992 = vrot.lane.b32.xlu0 %v991_v5, %s3841_s4 }
 0xff6   :  { %v845_v17 = vpop.permute.xlu1 %844 }
 0xff7   :  { %v4156_v18 = vmul.f32 %v845_v17, %v825_v44 }
 0xff9   :  { %v921_v10 = vrot.slane %v4156_v18, 2 }
 0xffb   :  { %922 = vrot.lane.b32.xlu2 %v921_v10, %s3843_s20  ;;  %v1043_v10 = vrot.slane %v4143_v4, 2 }
0x1055   :  { %v923_v19 = vpop.permute.xlu2 %922 }
0x1056   :  { %3435 = vmatmul.msk.f32.vlgmr.msrb.gmra.mxu2 %vm59_vm0, %v923_v19 }
0x105e   :  { %v993_v20 = vpop.permute.xlu0 %992 }
0x105f   :  { %3437 = vmatmul.msk.f32.vlgmr.msra.gmra.mxu3 %vm59_vm0, %v993_v20 }
0x10d9   :  { %v943_v21 = vpop.f32.mrf.mxu2 }
0x10da   :  { %v947_v22 = vrot.slane %v943_v21, 4 }
0x10dc   :  { %v949_v23 = vadd.f32 %v947_v22, %v3989_v15 }
0x10de   :  { %3625 = vtanh.f32 %v949_v23  ;;  %v3436_v25 = vmul.f32 -1.442695, %v949_v23 }
0x10e0   :  { %3627 = vpow2.f32 %v3436_v25 }
0x10e2   :  { %v1013_v24 = vpop.f32.mrf.mxu3 }
0x10e3   :  { %v1017_v2 = vrot.slane %v1013_v24, 6 }
0x10e4   :  { %v3626_v3 = vpop.eup %3625 }
0x10e5   :  { %975 = vrot.lane.b32.xlu2 %v3626_v3, %s3840_s18  ;;  %1018 = vrot.lane.b32.xlu0 %v1017_v2, %s3839_s0 }
0x10e6   :  { %v3628_v26 = vpop.eup %3627 }
0x10e7   :  { %v953_v27 = vadd.f32 1.0, %v3628_v26 }
0x10e9   :  { %3629 = vrcp.f32 %v953_v27  ;;  %v965_v39 = vand.u32 2147483648, %v953_v27  ;;  %vm959_vm5 = vweird.f32 %v953_v27  ;;  %v963_v41 = vand.u32 2147483647, %v953_v27 }
0x10eb   :  { %v966_v43 = vor.u32 1.1754944e-38, %v965_v39  ;;  %vm964_vm7 = vcmp.eq.f32.partialorder %v963_v41, 8.507059e+37 }
0x10ef   :  { %v3630_v28 = vpop.eup %3629 }
0x10f0   :  { %v955_v30 = vmul.f32 %v3630_v28, %v953_v27  ;;  %vm960_vm4 = vweird.f32 %v3630_v28 }
0x10f1   :  { %vm961_vm6 = vmor %vm959_vm5, %vm960_vm4  ;;  %vm1318_vm5 = vcmask 261120  }
0x10f2   :  { %v956_v31 = vsub.f32 1.0, %v955_v30 }
0x10f4   :  { %v957_v35 = vmul.f32 %v3630_v28, %v956_v31 }
0x10f6   :  { %v958_v37 = vadd.f32 %v3630_v28, %v957_v35 }
0x10f8   :  { %v962_v36 = vsel %vm961_vm6, %v3630_v28, %v958_v37  ;;  %vm1449_vm6 = vcmask 523264  }
0x10f9   :  { %v967_v45 = vsel %vm964_vm7, %v966_v43, %v962_v36  ;;  %vm1293_vm7 = vcmask 1040384  }
0x10fa   :  { %v973_v0 = vmul.f32 %v971_v6, %v967_v45 }
0x113f   :  { %v976_v42 = vpop.permute.xlu2 %975 }
0x1140   :  { %v978_v46 = vmul.f32 %v976_v42, %v967_v45 }
0x1157   :  { %v1019_v32 = vpop.permute.xlu0 %1018 }
0x1158   :  { %v1021_v34 = vadd.f32 %v1019_v32, %v3986_v11 }
0x115a   :  { %3631 = vtanh.f32 %v1021_v34  ;;  %v3438_v49 = vmul.f32 -1.442695, %v1021_v34 }
0x115c   :  { %3633 = vpow2.f32 %v3438_v49 }
0x1160   :  { %v3632_v38 = vpop.eup %3631 }
0x1161   :  { %1047 = vrot.lane.b32.xlu1 %v3632_v38, %s3840_s18 }
0x1162   :  { %v3634_v50 = vpop.eup %3633 }
0x1163   :  { %v1025_v51 = vadd.f32 1.0, %v3634_v50 }
0x1165   :  { %3635 = vrcp.f32 %v1025_v51  ;;  %v1037_v55 = vand.u32 2147483648, %v1025_v51  ;;  %vm1031_vm9 = vweird.f32 %v1025_v51  ;;  %v1035_v56 = vand.u32 2147483647, %v1025_v51 }
0x1167   :  { %v1038_v63 = vor.u32 1.1754944e-38, %v1037_v55  ;;  %vm1036_vm11 = vcmp.eq.f32.partialorder %v1035_v56, 8.507059e+37 }
0x1169   :  { %980 = vrot.lane.b32.xlu1 %v978_v46, %s3841_s4 }
0x116b   :  { %v3636_v52 = vpop.eup %3635 }
0x116c   :  { %v1027_v33 = vmul.f32 %v3636_v52, %v1025_v51  ;;  %vm1032_vm8 = vweird.f32 %v3636_v52 }
0x116d   :  { %vm1033_vm10 = vmor %vm1031_vm9, %vm1032_vm8  ;;  %vm1295_vm8 = vcmask 1041408   ;;  %vm1297_vm9 = vcmask 1042432  }
0x116e   :  { %v1028_v54 = vsub.f32 1.0, %v1027_v33 }
0x1170   :  { %v1029_v44 = vmul.f32 %v3636_v52, %v1028_v54 }
0x1172   :  { %v1030_v47 = vadd.f32 %v3636_v52, %v1029_v44 }
0x1174   :  { %v1034_v57 = vsel %vm1033_vm10, %v3636_v52, %v1030_v47  ;;  %vm1299_vm10 = vcmask 1043456  }
0x1175   :  { %v1039_v9 = vsel %vm1036_vm11, %v1038_v63, %v1034_v57  ;;  %vm1301_vm11 = vcmask 1044480  }
0x1176   :  { %v1045_v19 = vmul.f32 %v1043_v10, %v1039_v9 }
0x11d3   :  { %v1048_v8 = vpop.permute.xlu1 %1047 }
0x11d4   :  { %v1050_v13 = vmul.f32 %v1048_v8, %v1039_v9 }
0x11d6   :  { %1052 = vrot.lane.b32.xlu0 %v1050_v13, %s3841_s4 }
0x11db   :  { %v981_v48 = vpop.permute.xlu1 %980 }
0x11dc   :  { %v4170_v5 = vadd.f32 %v981_v48, %v973_v0 }
0x11de   :  { %3637 = vtanh.f32 %v4170_v5 }
0x11e4   :  { %v3638_v17 = vpop.eup %3637 }
0x11e5   :  { %986 = vrot.lane.b32.xlu0 %v3638_v17, %s3842_s19 }
0x1248   :  { %v1053_v20 = vpop.permute.xlu0 %1052 }
0x1249   :  { %v4175_v21 = vadd.f32 %v1053_v20, %v1045_v19  ;;  %v1113_v19 = vrot.slane %v4170_v5, 6 }
0x124b   :  { %3639 = vtanh.f32 %v4175_v21 }
0x1251   :  { %v3640_v22 = vpop.eup %3639 }
0x1252   :  { %1058 = vrot.lane.b32.xlu2 %v3640_v22, %s3842_s19 }
0x1257   :  { %v987_v14 = vpop.permute.xlu0 %986 }
0x1258   :  { %v4179_v23 = vmul.f32 %v987_v14, %v967_v45 }
0x125a   :  { %v1063_v24 = vrot.slane %v4179_v23, 4 }
0x125c   :  { %1064 = vrot.lane.b32.xlu2 %v1063_v24, %s3843_s20  ;;  %v1184_v24 = vrot.slane %v4175_v21, 2  ;;  %v1361_v21 = vld [vmem:[%s4870_s7 + $0x18] sm:$0xff] }
0x125d   :  { %1382 = vmatpush.msrb.mxu3 %v1361_v21 }
0x12ac   :  { %v1059_v2 = vpop.permute.xlu2 %1058 }
0x12ad   :  { %v4183_v3 = vmul.f32 %v1059_v2, %v1039_v9 }
0x12af   :  { %v1133_v4 = vrot.slane %v4183_v3, 2 }
0x12b1   :  { %1134 = vrot.lane.b32.xlu1 %v1133_v4, %s3841_s4 }
0x12b6   :  { %v1065_v25 = vpop.permute.xlu2 %1064 }
0x12b7   :  { %3439 = vmatmul.msk.f32.vlgmr.msrb.gmra.mxu0 %vm59_vm0, %v1065_v25 }
0x1323   :  { %v1135_v26 = vpop.permute.xlu1 %1134 }
0x1324   :  { %3441 = vmatmul.msk.f32.vlgmr.msrb.gmra.mxu1 %vm59_vm0, %v1135_v26 }
0x1334   :  { %v1085_v27 = vpop.f32.mrf.mxu0 }
0x1335   :  { %v1089_v28 = vrot.slane %v1085_v27, 2 }
0x1337   :  { %v1091_v30 = vadd.f32 %v1089_v28, %v3989_v15 }
0x1339   :  { %3641 = vtanh.f32 %v1091_v30  ;;  %v3440_v34 = vmul.f32 -1.442695, %v1091_v30 }
0x133b   :  { %3643 = vpow2.f32 %v3440_v34  ;;  %v3527_v34 = vld [vmem:[%s4871_s8] ss:$0 sm:$0xff] }
0x133f   :  { %v3642_v31 = vpop.eup %3641 }
0x1340   :  { %1117 = vrot.lane.b32.xlu2 %v3642_v31, %s3840_s18 }
0x1341   :  { %v3644_v35 = vpop.eup %3643 }
0x1342   :  { %v1095_v37 = vadd.f32 1.0, %v3644_v35 }
0x1344   :  { %3645 = vrcp.f32 %v1095_v37  ;;  %v1107_v46 = vand.u32 2147483648, %v1095_v37  ;;  %vm1101_vm13 = vweird.f32 %v1095_v37  ;;  %v1105_v49 = vand.u32 2147483647, %v1095_v37 }
0x1346   :  { %v1108_v52 = vor.u32 1.1754944e-38, %v1107_v46  ;;  %vm1106_vm15 = vcmp.eq.f32.partialorder %v1105_v49, 8.507059e+37 }
0x134a   :  { %v3646_v38 = vpop.eup %3645 }
0x134b   :  { %v1097_v39 = vmul.f32 %v3646_v38, %v1095_v37  ;;  %vm1102_vm12 = vweird.f32 %v3646_v38 }
0x134c   :  { %vm1103_vm14 = vmor %vm1101_vm13, %vm1102_vm12  ;;  %vm1303_vm12 = vcmask 1045504   ;;  %vm1305_vm13 = vcmask 1046528  }
0x134d   :  { %v1098_v41 = vsub.f32 1.0, %v1097_v39  ;;  %v1391_v39 = vld [vmem:[%s4864_s1] sm:$0xff] }
0x134f   :  { %v1099_v15 = vmul.f32 %v3646_v38, %v1098_v41  ;;  %v4273_v41 = vld [vmem:[%s4875_s12 + $0x20] sm:$0xff] }
0x1351   :  { %v1100_v43 = vadd.f32 %v3646_v38, %v1099_v15  ;;  %v4294_v15 = vld [vmem:[%s4875_s12 + $0x8] sm:$0xff] }
0x1353   :  { %v1104_v50 = vsel %vm1103_vm14, %v3646_v38, %v1100_v43  ;;  %v1394_v38 = vld [vmem:[%s4873_s10 + $0x8] sm:$0xff] }
0x1354   :  { %v4194_v33 = vsel %vm1106_vm15, %v1108_v52, %v1104_v50  ;;  %1419 = vmatpush.msra.mxu0 %v1394_v38 }
0x1355   :  { %v1115_v20 = vmul.f32 %v1113_v19, %v4194_v33 }
0x139a   :  { %v1118_v51 = vpop.permute.xlu2 %1117 }
0x139b   :  { %v1120_v54 = vmul.f32 %v1118_v51, %v4194_v33  ;;  %v1316_v51 = vld [vmem:[%s4872_s9 + $0x10] sm:$0xff] }
0x13a1   :  { %v1155_v32 = vpop.f32.mrf.mxu1 }
0x13a2   :  { %1159 = vrot.lane.b32.xlu0 %v1155_v32, %s3839_s0 }
0x1414   :  { %v1160_v36 = vpop.permute.xlu0 %1159 }
0x1415   :  { %v1162_v42 = vadd.f32 %v1160_v36, %v3986_v11  ;;  %v4280_v36 = vld [vmem:[%s4875_s12 + $0x18] sm:$0xff] }
0x1417   :  { %3647 = vtanh.f32 %v1162_v42  ;;  %v3442_v11 = vmul.f32 -1.442695, %v1162_v42  ;;  %v4288_v42 = vld [vmem:[%s4875_s12 + $0x10] sm:$0xff] }
0x1419   :  { %3649 = vpow2.f32 %v3442_v11  ;;  %v1315_v11 = vld [vmem:[%s4872_s9 + $0x8] sm:$0xff] }
0x141d   :  { %v3648_v45 = vpop.eup %3647 }
0x141e   :  { %1188 = vrot.lane.b32.xlu1 %v3648_v45, %s3840_s18  ;;  %v4306_v45 = vld [vmem:[%s4875_s12] sm:$0xff] }
0x141f   :  { %v3650_v44 = vpop.eup %3649 }
0x1420   :  { %v1166_v47 = vadd.f32 1.0, %v3650_v44  ;;  %v1314_v44 = vld [vmem:[%s4872_s9] sm:$0xff] }
0x1422   :  { %3651 = vrcp.f32 %v1166_v47  ;;  %v1178_v9 = vand.u32 2147483648, %v1166_v47  ;;  %vm1172_vm2 = vweird.f32 %v1166_v47  ;;  %v1176_v13 = vand.u32 2147483647, %v1166_v47 }
0x1424   :  { %v1179_v0 = vor.u32 1.1754944e-38, %v1178_v9  ;;  %vm1177_vm4 = vcmp.eq.f32.partialorder %v1176_v13, 8.507059e+37 }
0x1426   :  { %1122 = vrot.lane.b32.xlu1 %v1120_v54, %s3841_s4 }
0x1428   :  { %v3652_v55 = vpop.eup %3651 }
0x1429   :  { %v1168_v56 = vmul.f32 %v3652_v55, %v1166_v47  ;;  %vm1173_vm1 = vweird.f32 %v3652_v55 }
0x142a   :  { %vm1174_vm3 = vmor %vm1172_vm2, %vm1173_vm1 }
0x142b   :  { %v1169_v57 = vsub.f32 1.0, %v1168_v56 }
0x142d   :  { %v1170_v63 = vmul.f32 %v3652_v55, %v1169_v57 }
0x142f   :  { %v1171_v8 = vadd.f32 %v3652_v55, %v1170_v63 }
0x1431   :  { %v1175_v6 = vsel %vm1174_vm3, %v3652_v55, %v1171_v8  ;;  %vm1573_vm3 = vcmask 57344  }
0x1432   :  { %v1180_v17 = vsel %vm1177_vm4, %v1179_v0, %v1175_v6 }
0x1433   :  { %v1186_v2 = vmul.f32 %v1184_v24, %v1180_v17 }
0x1490   :  { %v1189_v48 = vpop.permute.xlu1 %1188 }
0x1491   :  { %v1191_v10 = vmul.f32 %v1189_v48, %v1180_v17 }
0x1493   :  { %1193 = vrot.lane.b32.xlu0 %v1191_v10, %s3841_s4 }
0x1498   :  { %v1123_v22 = vpop.permute.xlu1 %1122 }
0x1499   :  { %v1125_v14 = vadd.f32 %v1123_v22, %v1115_v20 }
0x149b   :  { %1349 = vrot.lane.b32.xlu2 %v1125_v14, %s3844_s21 }
0x1505   :  { %v1194_v4 = vpop.permute.xlu0 %1193 }
0x1506   :  { %v1196_v25 = vadd.f32 %v1194_v4, %v1186_v2 }
0x1508   :  { %3653 = vtanh.f32 %v1196_v25  ;;  %v1353_v26 = vrot.slane %v1196_v25, 2 }
0x1509   :  { %3655 = vtanh.f32 %v1125_v14 }
0x150a   :  { %1354 = vrot.lane.b32.xlu0 %v1353_v26, %s3839_s0 }
0x150e   :  { %v3654_v27 = vpop.eup %3653 }
0x150f   :  { %1199 = vrot.lane.b32.xlu2 %v3654_v27, %s3842_s19  ;;  %v3656_v5 = vpop.eup %3655 }
0x1512   :  { %1128 = vrot.lane.b32.xlu0 %v3656_v5, %s3842_s19 }
0x1517   :  { %1212 = vrot.lane.b32.xlu2 %v4183_v3, %s3842_s19  ;;  %v1360_v3 = vld [vmem:[%s4870_s7 + $0x10] sm:$0xff] }
0x1518   :  { %1383 = vmatpush.msrb.mxu3 %v1360_v3 }
0x151a   :  { %1216 = vrot.lane.b32.xlu0 %v4074_v12, %s3843_s20  ;;  %v1359_v12 = vld [vmem:[%s4870_s7 + $0x8] sm:$0xff] }
0x151b   :  { %1384 = vmatpush.msrb.mxu3 %v1359_v12 }
0x1522   :  { %1223 = vrot.lane.b32.xlu0 %v4103_v61, %s3843_s20  ;;  %v1358_v61 = vld [vmem:[%s4870_s7] sm:$0xff] }
0x1523   :  { %1385 = vmatpush.msrb.mxu3 %v1358_v61 }
0x152a   :  { %1235 = vrot.lane.b32.xlu0 %v4156_v18, %s3843_s20 }
0x1532   :  { %1245 = vrot.lane.b32.xlu0 %v4030_v53, %s3842_s19  ;;  %v1350_v53 = vpop.permute.xlu2 %1349 }
0x1569   :  { %v1200_v18 = vpop.permute.xlu2 %1199 }
0x156a   :  { %v1202_v28 = vmul.f32 %v1200_v18, %v1180_v17 }
0x156c   :  { %1205 = vrot.lane.b32.xlu2 %v1202_v28, %s3842_s19 }
0x1571   :  { %v1213_v50 = vpop.permute.xlu2 %1212 }
0x1574   :  { %1231 = vrot.lane.b32.xlu2 %v4093_v58, %s3842_s19 }
0x157c   :  { %v1355_v30 = vpop.permute.xlu0 %1354  ;;  %1242 = vrot.lane.b32.xlu2 %v4179_v23, %s3843_s20  ;;  %v4252_v23 = vld [vmem:[%s4875_s12 + $0x30] sm:$0xff] }
0x157d   :  { %v1357_v31 = vsel %vm59_vm0, %v1350_v53, %v1355_v30 }
0x157e   :  { %v1367_v32 = vrot.slane %v1357_v31, 6 }
0x1580   :  { %3445 = vmatmul.msk.f32.vlgmr.msrb.gmra.mxu3 %vm1318_vm5, %v1367_v32 }
0x1584   :  { %1253 = vrot.lane.b32.xlu2 %v3998_v40, %s3842_s19  ;;  %v4247_v40 = vld [vmem:[%s4875_s12 + $0x38] sm:$0xff] }
0x1585   :  { %1461 = vmatpush.msra.mxu1 %v4247_v40 }
0x1587   :  { %1462 = vmatpush.msra.mxu1 %v4252_v23 }
0x15c6   :  { %v1206_v54 = vpop.permute.xlu2 %1205 }
0x15c7   :  { %v1208_v13 = vsel %vm59_vm0, %v4017_v29, %v1206_v54 }
0x15c8   :  { %v1279_v17 = vrot.slane %v1208_v13, 1 }
0x15ce   :  { %v1232_v56 = vpop.permute.xlu2 %1231 }
0x15cf   :  { %v1234_v14 = vsel %vm59_vm0, %v4132_v16, %v1232_v56 }
0x15d0   :  { %v1287_v3 = vrot.slane %v1234_v14, 5  ;;  %v1267_v18 = vrot.slane %v1234_v14, 4 }
0x15d6   :  { %v1243_v10 = vpop.permute.xlu2 %1242 }
0x1603   :  { %v1387_v35 = vpop.f32.mrf.mxu3 }
0x1604   :  { %v1388_v37 = vadd.f32 %v3527_v34, %v1387_v35  ;;  %v1254_v34 = vpop.permute.xlu2 %1253 }
0x1606   :  { %3657 = vtanh.f32 %v1388_v37 }
0x160c   :  { %v3658_v58 = vpop.eup %3657 }
0x160d   :  { %1445 = vrot.lane.b32.xlu1 %v3658_v58, %s3842_s19 }
0x1615   :  { %1209 = vrot.lane.b32.xlu1 %v4044_v62, %s3843_s20  ;;  %v4261_v62 = vld [vmem:[%s4875_s12 + $0x28] sm:$0xff] }
0x1616   :  { %1463 = vmatpush.msra.mxu1 %v4261_v62 }
0x1618   :  { %1464 = vmatpush.msra.mxu1 %v4273_v41 }
0x161a   :  { %1465 = vmatpush.msra.mxu1 %v4280_v36 }
0x161c   :  { %1466 = vmatpush.msra.mxu1 %v4288_v42 }
0x161d   :  { %1219 = vrot.lane.b32.xlu1 %v4152_v1, %s3842_s19  ;;  %v1393_v1 = vld [vmem:[%s4873_s10] sm:$0xff] }
0x161e   :  { %1420 = vmatpush.msra.mxu0 %v1393_v1  ;;  %1467 = vmatpush.msra.mxu1 %v4294_v15 }
0x161f   :  { %3446 = vmatmul.msk.f32.vlgmr.msra.gmra.mxu0 %vm59_vm0, %v1391_v39 }
0x1620   :  { %1468 = vmatpush.msra.mxu1 %v4306_v45 }
0x1625   :  { %1226 = vrot.lane.b32.xlu1 %v4120_v60, %s3842_s19  ;;  %v1129_v60 = vpop.permute.xlu0 %1128 }
0x1626   :  { %v1131_v43 = vmul.f32 %v1129_v60, %v4194_v33 }
0x162d   :  { %1238 = vrot.lane.b32.xlu1 %v4062_v59, %s3842_s19  ;;  %v1317_v59 = vld [vmem:[%s4872_s9 + $0x18] sm:$0xff]  ;;  %v1217_v52 = vpop.permute.xlu0 %1216 }
0x162e   :  { %1337 = vmatpush.msra.mxu2 %v1317_v59 }
0x1630   :  { %1338 = vmatpush.msra.mxu2 %v1316_v51 }
0x1632   :  { %1339 = vmatpush.msra.mxu2 %v1315_v11 }
0x1634   :  { %1340 = vmatpush.msra.mxu2 %v1314_v44 }
0x1635   :  { %1250 = vrot.lane.b32.xlu1 %v1131_v43, %s3843_s20  ;;  %v1224_v47 = vpop.permute.xlu0 %1223 }
0x163d   :  { %1495 = vrot.lane.b32.xlu1 %v1388_v37, %s3842_s19  ;;  %v1236_v63 = vpop.permute.xlu0 %1235 }
0x1645   :  { %v1246_v21 = vpop.permute.xlu0 %1245 }
0x1646   :  { %v1248_v61 = vsel %vm59_vm0, %v1243_v10, %v1246_v21 }
0x1647   :  { %v1291_v31 = vrot.slane %v1248_v61, 7  ;;  %v1273_v58 = vrot.slane %v1248_v61, 6 }
0x167f   :  { %v1446_v46 = vpop.permute.xlu1 %1445 }
0x1680   :  { %v1448_v49 = vsel %vm1318_vm5, 0.0, %v1446_v46 }
0x1681   :  { %3448 = vmatmul.msk.f32.vlgmr.msra.gmra.mxu1 %vm1449_vm6, %v1448_v49  ;;  %v3528_v49 = vld [vmem:[%s4874_s11] ss:$0 sm:$0xff] }
0x1687   :  { %v1210_v33 = vpop.permute.xlu1 %1209 }
0x1688   :  { %v1215_v8 = vsel %vm59_vm0, %v1210_v33, %v1213_v50 }
0x1689   :  { %v1281_v0 = vrot.slane %v1215_v8, 2  ;;  %v1258_v19 = vrot.slane %v1215_v8, 1 }
0x168b   :  { %v1307_v24 = vsel %vm1293_vm7, %v1279_v17, %v1281_v0  ;;  %v1294_v26 = vsel %vm1293_vm7, %v1208_v13, %v1258_v19 }
0x168f   :  { %v1220_v55 = vpop.permute.xlu1 %1219 }
0x1690   :  { %v1222_v9 = vsel %vm59_vm0, %v1217_v52, %v1220_v55 }
0x1691   :  { %v1283_v48 = vrot.slane %v1222_v9, 3  ;;  %v1261_v22 = vrot.slane %v1222_v9, 2 }
0x1693   :  { %v1308_v29 = vsel %vm1295_vm8, %v1307_v24, %v1283_v48  ;;  %v1296_v12 = vsel %vm1295_vm8, %v1294_v26, %v1261_v22 }
0x1697   :  { %v1227_v57 = vpop.permute.xlu1 %1226 }
0x1698   :  { %v1229_v6 = vsel %vm59_vm0, %v1224_v47, %v1227_v57 }
0x1699   :  { %v1285_v20 = vrot.slane %v1229_v6, 4  ;;  %v1264_v2 = vrot.slane %v1229_v6, 3 }
0x169b   :  { %v1309_v27 = vsel %vm1297_vm9, %v1308_v29, %v1285_v20  ;;  %v1298_v16 = vsel %vm1297_vm9, %v1296_v12, %v1264_v2 }
0x169c   :  { %v1310_v28 = vsel %vm1299_vm10, %v1309_v27, %v1287_v3  ;;  %v1300_v32 = vsel %vm1299_vm10, %v1298_v16, %v1267_v18  ;;  %v1422_v50 = vpop.f32.mrf.mxu0 }
0x169d   :  { %v4353_v59 = vadd.f32 %v3528_v49, %v1422_v50 }
0x169f   :  { %v1239_v4 = vpop.permute.xlu1 %1238 }
0x16a0   :  { %v1241_v25 = vsel %vm59_vm0, %v1236_v63, %v1239_v4 }
0x16a1   :  { %v1289_v5 = vrot.slane %v1241_v25, 6  ;;  %v1270_v53 = vrot.slane %v1241_v25, 5 }
0x16a3   :  { %v1311_v30 = vsel %vm1301_vm11, %v1310_v28, %v1289_v5  ;;  %v1302_v35 = vsel %vm1301_vm11, %v1300_v32, %v1270_v53 }
0x16a4   :  { %v1312_v1 = vsel %vm1303_vm12, %v1311_v30, %v1291_v31  ;;  %v1304_v43 = vsel %vm1303_vm12, %v1302_v35, %v1273_v58 }
0x16a7   :  { %v1251_v37 = vpop.permute.xlu1 %1250 }
0x16a8   :  { %v1256_v38 = vsel %vm59_vm0, %v1251_v37, %v1254_v34 }
0x16a9   :  { %v1276_v39 = vrot.slane %v1256_v38, 7  ;;  %v4340_v60 = vsel %vm1305_vm13, %v1312_v1, %v1256_v38  ;;  %v1392_v38 = vld [vmem:[%s4864_s1 + $0x8] sm:$0x3f] }
0x16aa   :  { %1664 = vmatpush.msrb.mxu0 %v4340_v60 }
0x16ab   :  { %v4344_v46 = vsel %vm1305_vm13, %v1304_v43, %v1276_v39  ;;  %3447 = vmatmul.msk.f32.gmra.mxu0 %vm59_vm0, %v1392_v38  ;;  %vm1622_vm0 = vcmask 64512  }
0x16ac   :  { %3443 = vmatmul.msk.f32.vlgmr.msra.gmra.mxu2 %vm1318_vm5, %v4344_v46 }
0x16af   :  { %v1496_v20 = vpop.permute.xlu1 %1495 }
0x16b4   :  { %3444 = vmatmul.msk.f32.gmra.mxu2 %vm1318_vm5, %v4340_v60 }
0x16fe   :  { %v1470_v51 = vpop.f32.mrf.mxu1 }
0x16ff   :  { %v1473_v52 = vadd.f32 %v1470_v51, %v4353_v59 }
0x1701   :  { %3659 = vtanh.f32 %v1473_v52  ;;  %v3449_v44 = vmul.f32 -1.442695, %v1473_v52 }
0x1703   :  { %3661 = vpow2.f32 %v3449_v44 }
0x1707   :  { %v3660_v33 = vpop.eup %3659 }
0x1708   :  { %1500 = vrot.lane.b32.xlu0 %v3660_v33, %s3839_s0 }
0x1709   :  { %v3662_v47 = vpop.eup %3661 }
0x170a   :  { %v1477_v55 = vadd.f32 1.0, %v3662_v47 }
0x170c   :  { %3663 = vrcp.f32 %v1477_v55  ;;  %v1489_v13 = vand.u32 2147483648, %v1477_v55  ;;  %vm1483_vm15 = vweird.f32 %v1477_v55  ;;  %v1487_v6 = vand.u32 2147483647, %v1477_v55 }
0x170e   :  { %v1490_v48 = vor.u32 1.1754944e-38, %v1489_v13  ;;  %vm1488_vm2 = vcmp.eq.f32.partialorder %v1487_v6, 8.507059e+37 }
0x1712   :  { %v3664_v56 = vpop.eup %3663 }
0x1713   :  { %v1479_v57 = vmul.f32 %v3664_v56, %v1477_v55  ;;  %vm1484_vm14 = vweird.f32 %v3664_v56 }
0x1714   :  { %vm1485_vm1 = vmor %vm1483_vm15, %vm1484_vm14 }
0x1715   :  { %v1480_v63 = vsub.f32 1.0, %v1479_v57 }
0x1717   :  { %v1481_v8 = vmul.f32 %v3664_v56, %v1480_v63 }
0x1719   :  { %v1482_v9 = vadd.f32 %v3664_v56, %v1481_v8 }
0x171b   :  { %v1486_v0 = vsel %vm1485_vm1, %v3664_v56, %v1482_v9 }
0x171c   :  { %v1491_v17 = vsel %vm1488_vm2, %v1490_v48, %v1486_v0  ;;  %vm1675_vm2 = vcmask 1041409  }
0x171d   :  { %v1498_v22 = vmul.f32 %v1496_v20, %v1491_v17 }
0x172f   :  { %v4357_v54 = vpop.f32.mrf.mxu2 }
0x1730   :  { %3450 = vmatpush.xpose.msk.msra.mxu3 %vm1318_vm5, %v4357_v54 }
0x1734   :  { %1641 = vmatpush.msrb.mxu3 %v4344_v46 }
0x1737   :  { %v4362_v11 = vpop.f32.mrf.mxu2 }
0x1738   :  { %3452 = vmatpush.xpose.msk.msrb.mxu2 %vm1318_vm5, %v4362_v11  ;;  %3461 = vmatpush.xpose.msk.msra.mxu0 %vm1318_vm5, %v4362_v11 }
0x173c   :  { %1720 = vmatpush.msra.mxu2 %v4247_v40 }
0x173e   :  { %1721 = vmatpush.msra.mxu2 %v4252_v23 }
0x1740   :  { %1722 = vmatpush.msra.mxu2 %v4261_v62 }
0x1742   :  { %1723 = vmatpush.msra.mxu2 %v4273_v41 }
0x1744   :  { %1724 = vmatpush.msra.mxu2 %v4280_v36 }
0x1746   :  { %1725 = vmatpush.msra.mxu2 %v4288_v42 }
0x1748   :  { %1726 = vmatpush.msra.mxu2 %v4294_v15 }
0x174a   :  { %1727 = vmatpush.msra.mxu2 %v4306_v45 }
0x177a   :  { %v1501_v10 = vpop.permute.xlu0 %1500 }
0x177b   :  { %v1503_v19 = vmul.f32 %v1501_v10, %v1491_v17 }
0x177d   :  { %1505 = vrot.lane.b32.xlu2 %v1503_v19, %s3842_s19 }
0x17d7   :  { %v1506_v14 = vpop.permute.xlu2 %1505 }
0x17d8   :  { %v4377_v24 = vadd.f32 %v1506_v14, %v1498_v22  ;;  %v4412_v22 = vld [vmem:[%s4876_s13 + $0x38] sm:$0xff]  ;;  %v4417_v14 = vld [vmem:[%s4876_s13 + $0x30] sm:$0xff] }
0x17d9   :  { %1692 = vmatpush.msrb.mxu1 %v4412_v22 }
0x17da   :  { %3665 = vtanh.f32 %v4377_v24 }
0x17db   :  { %1693 = vmatpush.msrb.mxu1 %v4417_v14 }
0x17e0   :  { %v3666_v2 = vpop.eup %3665 }
0x17e1   :  { %1511 = vrot.lane.b32.xlu0 %v3666_v2, %s3839_s0  ;;  %v4423_v2 = vld [vmem:[%s4876_s13 + $0x28] sm:$0xff] }
0x17e2   :  { %1694 = vmatpush.msrb.mxu1 %v4423_v2 }
0x1853   :  { %v1512_v4 = vpop.permute.xlu0 %1511 }
0x1854   :  { %v1514_v29 = vmul.f32 %v1512_v4, %v1491_v17  ;;  %v4429_v4 = vld [vmem:[%s4876_s13 + $0x20] sm:$0xff] }
0x1855   :  { %1695 = vmatpush.msrb.mxu1 %v4429_v4 }
0x1856   :  { %v1517_v25 = vperm.slane %v1514_v29, 0  ;;  %v1516_v26 = vrot.slane %v1514_v29, 1 }
0x1858   :  { %1518 = vrot.lane.b32.xlu1 %v1517_v25, %s3842_s19  ;;  %v1545_v27 = vperm.slane %v1516_v26, 0  ;;  %v4441_v25 = vld [vmem:[%s4876_s13 + $0x10] sm:$0xff]  ;;  %v4447_v26 = vld [vmem:[%s4876_s13 + $0x8] sm:$0xff] }
0x185a   :  { %1546 = vrot.lane.b32.xlu2 %v1545_v27, %s3842_s19  ;;  %v4451_v27 = vpop.f32.mrf.mxu0 }
0x18b4   :  { %v1547_v5 = vpop.permute.xlu2 %1546 }
0x18b5   :  { %3453 = vmatmul.msk.f32.vlgmr.msrb.gmra.mxu2 %vm1318_vm5, %v1547_v5 }
0x18b6   :  { %1980 = vmatpush.msrb.mxu2 %v4247_v40 }
0x18b8   :  { %1981 = vmatpush.msrb.mxu2 %v4252_v23 }
0x18ba   :  { %1982 = vmatpush.msrb.mxu2 %v4261_v62 }
0x18bc   :  { %1983 = vmatpush.msrb.mxu2 %v4273_v41 }
0x18be   :  { %1984 = vmatpush.msrb.mxu2 %v4280_v36 }
0x18c0   :  { %1985 = vmatpush.msrb.mxu2 %v4288_v42 }
0x18c2   :  { %1986 = vmatpush.msrb.mxu2 %v4294_v15 }
0x18c4   :  { %1987 = vmatpush.msrb.mxu2 %v4306_v45 }
0x18ca   :  { %v1519_v21 = vpop.permute.xlu1 %1518 }
0x18cb   :  { %3451 = vmatmul.msk.f32.vlgmr.msra.gmra.mxu3 %vm1318_vm5, %v1519_v21 }
0x18cc   :  { %3459 = vmatpush.xpose.msk.msra.mxu3 %vm1318_vm5, %v4357_v54 }
0x1938   :  { %v1570_v3 = vpop.f32.mrf.mxu2 }
0x1939   :  { %v1577_v12 = vsel %vm1573_vm3, %v1570_v3, -inf }
0x193a   :  { %1578 = vmax.xlane.f32.xlu1 %v1577_v12 }
0x194e   :  { %v1542_v61 = vpop.f32.mrf.mxu3 }
0x194f   :  { %v1574_v16 = vsel %vm1573_vm3, %v1542_v61, -inf }
0x1950   :  { %1575 = vmax.xlane.f32.xlu0 %v1574_v16 }
0x1964   :  { %1669 = vrot.lane.b32.xlu0 %v1514_v29, %s3842_s19 }
0x19ad   :  { %v1579_v53 = vpop.xlane.xlu1 %1578 }
0x19ae   :  { %v1581_v30 = vsub.f32 %v1570_v3, %v1579_v53 }
0x19b0   :  { %v1584_v32 = vmul.f32 1.442695, %v1581_v30 }
0x19c3   :  { %v1576_v18 = vpop.xlane.xlu0 %1575 }
0x19c4   :  { %v1580_v28 = vsub.f32 %v1542_v61, %v1576_v18  ;;  %v4458_v61 = vld [vmem:[%s4876_s13] sm:$0xff] }
0x19c6   :  { %v1582_v31 = vmul.f32 1.442695, %v1580_v28 }
0x19c8   :  { %3667 = vpow2.f32 %v1582_v31 }
0x19c9   :  { %3669 = vpow2.f32 %v1584_v32 }
0x19ce   :  { %v3668_v34 = vpop.eup %3667 }
0x19cf   :  { %v1586_v35 = vsel %vm1573_vm3, %v3668_v34, 0.0  ;;  %v3670_v37 = vpop.eup %3669 }
0x19d0   :  { %1587 = vadd.xlane.f32.xlu2 %v1586_v35  ;;  %v1589_v58 = vsel %vm1573_vm3, %v3670_v37, 0.0 }
0x19d6   :  { %v1670_v16 = vpop.permute.xlu0 %1669 }
0x19d8   :  { %1590 = vadd.xlane.f32.xlu2 %v1589_v58 }
0x19f0   :  { %1705 = vrot.lane.b32.xlu2 %v1514_v29, %s3839_s0  ;;  %v4435_v29 = vld [vmem:[%s4876_s13 + $0x18] sm:$0xff] }
0x19f1   :  { %1696 = vmatpush.msrb.mxu1 %v4435_v29 }
0x19f3   :  { %1697 = vmatpush.msrb.mxu1 %v4441_v25 }
0x19f5   :  { %1698 = vmatpush.msrb.mxu1 %v4447_v26 }
0x19f7   :  { %1699 = vmatpush.msrb.mxu1 %v4458_v61 }
0x19f9   :  { %1951 = vmatpush.msra.mxu1 %v4412_v22 }
0x19fb   :  { %1952 = vmatpush.msra.mxu1 %v4417_v14 }
0x19fd   :  { %1953 = vmatpush.msra.mxu1 %v4423_v2 }
0x19ff   :  { %1954 = vmatpush.msra.mxu1 %v4429_v4 }
0x1a01   :  { %1955 = vmatpush.msra.mxu1 %v4435_v29 }
0x1a03   :  { %1956 = vmatpush.msra.mxu1 %v4441_v25 }
0x1a05   :  { %1957 = vmatpush.msra.mxu1 %v4447_v26 }
0x1a07   :  { %1958 = vmatpush.msra.mxu1 %v4458_v61 }
0x1a43   :  { %v1588_v1 = vpop.xlane.xlu2 %1587 }
0x1a44   :  { %3671 = vrcp.f32 %v1588_v1  ;;  %v1603_v51 = vand.u32 2147483648, %v1588_v1  ;;  %v1601_v33 = vand.u32 2147483647, %v1588_v1  ;;  %vm1597_vm7 = vweird.f32 %v1588_v1 }
0x1a46   :  { %v1604_v55 = vor.u32 1.1754944e-38, %v1603_v51  ;;  %vm1602_vm11 = vcmp.eq.f32.partialorder %v1601_v33, 8.507059e+37 }
0x1a4a   :  { %v3672_v39 = vpop.eup %3671 }
0x1a4b   :  { %v1593_v43 = vmul.f32 %v3672_v39, %v1588_v1  ;;  %v1591_v49 = vpop.xlane.xlu2 %1590  ;;  %vm1598_vm4 = vweird.f32 %v3672_v39 }
0x1a4c   :  { %3673 = vrcp.f32 %v1591_v49  ;;  %vm1599_vm9 = vmor %vm1597_vm7, %vm1598_vm4  ;;  %v1618_v13 = vand.u32 2147483648, %v1591_v49  ;;  %v1616_v0 = vand.u32 2147483647, %v1591_v49  ;;  %vm1612_vm14 = vweird.f32 %v1591_v49 }
0x1a4d   :  { %v1594_v50 = vsub.f32 1.0, %v1593_v43 }
0x1a4e   :  { %v1619_v17 = vor.u32 1.1754944e-38, %v1618_v13  ;;  %vm1617_vm1 = vcmp.eq.f32.partialorder %v1616_v0, 8.507059e+37 }
0x1a4f   :  { %v1595_v52 = vmul.f32 %v3672_v39, %v1594_v50 }
0x1a51   :  { %v1596_v44 = vadd.f32 %v3672_v39, %v1595_v52 }
0x1a52   :  { %v3674_v47 = vpop.eup %3673 }
0x1a53   :  { %v1600_v56 = vsel %vm1599_vm9, %v3672_v39, %v1596_v44  ;;  %v1608_v57 = vmul.f32 %v3674_v47, %v1591_v49  ;;  %vm1613_vm13 = vweird.f32 %v3674_v47  ;;  %v1706_v31 = vpop.permute.xlu2 %1705 }
0x1a54   :  { %v1605_v63 = vsel %vm1602_vm11, %v1604_v55, %v1600_v56  ;;  %vm1614_vm15 = vmor %vm1612_vm14, %vm1613_vm13 }
0x1a55   :  { %v1609_v8 = vsub.f32 1.0, %v1608_v57  ;;  %v1606_v9 = vmul.f32 %v3668_v34, %v1605_v63 }
0x1a57   :  { %v1610_v6 = vmul.f32 %v3674_v47, %v1609_v8  ;;  %3454 = vmatmul.msk.f32.vlgmr.msrb.gmra.mxu3 %vm1622_vm0, %v1606_v9  ;;  %v1757_v8 = vrot.slane %v4377_v24, 6 }
0x1a58   :  { %1898 = vmatpush.msrb.mxu3 %v4344_v46 }
0x1a59   :  { %v1611_v48 = vadd.f32 %v3674_v47, %v1610_v6 }
0x1a5b   :  { %v1615_v10 = vsel %vm1614_vm15, %v3674_v47, %v1611_v48 }
0x1a5c   :  { %v1620_v19 = vsel %vm1617_vm1, %v1619_v17, %v1615_v10 }
0x1a5d   :  { %v1621_v20 = vmul.f32 %v3670_v37, %v1620_v19 }
0x1a5f   :  { %3455 = vmatmul.msk.f32.vlgmr.msrb.gmra.mxu0 %vm1622_vm0, %v1621_v20 }
0x1a60   :  { %1921 = vmatpush.msrb.mxu0 %v4340_v60 }
0x1ada   :  { %v1643_v3 = vpop.f32.mrf.mxu3 }
0x1adc   :  { %v1666_v5 = vpop.f32.mrf.mxu0 }
0x1add   :  { %v1674_v21 = vrot.slane %v1666_v5, 7 }
0x1adf   :  { %v1676_v12 = vsel %vm1675_vm2, %v1674_v21, %v1643_v3 }
0x1ae0   :  { %1677 = vrot.lane.b32.xlu1 %v1676_v12, %s3842_s19 }
0x1b52   :  { %v1678_v53 = vpop.permute.xlu1 %1677 }
0x1b53   :  { %v1680_v18 = vsel %vm1318_vm5, %v1670_v16, %v1678_v53 }
0x1b54   :  { %3456 = vmatmul.msk.f32.vlgmr.msrb.gmra.mxu1 %vm1449_vm6, %v1680_v18 }
0x1b55   :  { %2211 = vmatpush.msrb.mxu1 %v4412_v22 }
0x1b57   :  { %2212 = vmatpush.msrb.mxu1 %v4417_v14 }
0x1b59   :  { %2213 = vmatpush.msrb.mxu1 %v4423_v2 }
0x1b5b   :  { %2214 = vmatpush.msrb.mxu1 %v4429_v4 }
0x1b5d   :  { %2215 = vmatpush.msrb.mxu1 %v4435_v29 }
0x1b5f   :  { %2216 = vmatpush.msrb.mxu1 %v4441_v25 }
0x1b61   :  { %2217 = vmatpush.msrb.mxu1 %v4447_v26 }
0x1b63   :  { %2218 = vmatpush.msrb.mxu1 %v4458_v61 }
0x1bd1   :  { %v1701_v28 = vpop.f32.mrf.mxu1 }
0x1bd2   :  { %3675 = vtanh.f32 %v1701_v28 }
0x1bd8   :  { %v4479_v30 = vpop.eup %3675 }
0x1bd9   :  { %v1708_v32 = vsel %vm1318_vm5, %v4479_v30, %v1706_v31 }
0x1bda   :  { %3457 = vmatmul.msk.f32.vlgmr.msra.gmra.mxu2 %vm1449_vm6, %v1708_v32 }
0x1bdb   :  { %2240 = vmatpush.msra.mxu2 %v4247_v40 }
0x1bdd   :  { %2241 = vmatpush.msra.mxu2 %v4252_v23 }
0x1bdf   :  { %2242 = vmatpush.msra.mxu2 %v4261_v62 }
0x1be1   :  { %2243 = vmatpush.msra.mxu2 %v4273_v41 }
0x1be3   :  { %2244 = vmatpush.msra.mxu2 %v4280_v36 }
0x1be5   :  { %2245 = vmatpush.msra.mxu2 %v4288_v42 }
0x1be7   :  { %2246 = vmatpush.msra.mxu2 %v4294_v15 }
0x1be9   :  { %2247 = vmatpush.msra.mxu2 %v4306_v45 }
0x1c5d   :  { %v1729_v34 = vpop.f32.mrf.mxu2 }
0x1c5e   :  { %v1733_v35 = vrot.slane %v1729_v34, 6 }
0x1c60   :  { %v1735_v37 = vadd.f32 %v1733_v35, %v4353_v59 }
0x1c62   :  { %3677 = vtanh.f32 %v1735_v37  ;;  %v3458_v38 = vmul.f32 -1.442695, %v1735_v37 }
0x1c64   :  { %3679 = vpow2.f32 %v3458_v38 }
0x1c68   :  { %v3678_v58 = vpop.eup %3677 }
0x1c69   :  { %1761 = vrot.lane.b32.xlu0 %v3678_v58, %s3839_s0 }
0x1c6a   :  { %v3680_v1 = vpop.eup %3679 }
0x1c6b   :  { %v1739_v39 = vadd.f32 1.0, %v3680_v1 }
0x1c6d   :  { %3681 = vrcp.f32 %v1739_v39  ;;  %v1751_v33 = vand.u32 2147483648, %v1739_v39  ;;  %vm1745_vm7 = vweird.f32 %v1739_v39  ;;  %v1749_v44 = vand.u32 2147483647, %v1739_v39 }
0x1c6f   :  { %v1752_v55 = vor.u32 1.1754944e-38, %v1751_v33  ;;  %vm1750_vm11 = vcmp.eq.f32.partialorder %v1749_v44, 8.507059e+37 }
0x1c73   :  { %v3682_v43 = vpop.eup %3681 }
0x1c74   :  { %v1741_v49 = vmul.f32 %v3682_v43, %v1739_v39  ;;  %vm1746_vm4 = vweird.f32 %v3682_v43 }
0x1c75   :  { %vm1747_vm9 = vmor %vm1745_vm7, %vm1746_vm4 }
0x1c76   :  { %v1742_v50 = vsub.f32 1.0, %v1741_v49 }
0x1c78   :  { %v1743_v51 = vmul.f32 %v3682_v43, %v1742_v50 }
0x1c7a   :  { %v1744_v52 = vadd.f32 %v3682_v43, %v1743_v51 }
0x1c7c   :  { %v1748_v47 = vsel %vm1747_vm9, %v3682_v43, %v1744_v52 }
0x1c7d   :  { %v1753_v57 = vsel %vm1750_vm11, %v1752_v55, %v1748_v47 }
0x1c7e   :  { %v1759_v9 = vmul.f32 %v1757_v8, %v1753_v57 }
0x1cdb   :  { %v1762_v56 = vpop.permute.xlu0 %1761 }
0x1cdc   :  { %v1764_v63 = vmul.f32 %v1762_v56, %v1753_v57 }
0x1cde   :  { %1766 = vrot.lane.b32.xlu1 %v1764_v63, %s3842_s19 }
0x1d50   :  { %v1767_v13 = vpop.permute.xlu1 %1766 }
0x1d51   :  { %v4496_v6 = vadd.f32 %v1767_v13, %v1759_v9 }
0x1d53   :  { %3683 = vtanh.f32 %v4496_v6 }
0x1d59   :  { %v3684_v0 = vpop.eup %3683 }
0x1d5a   :  { %1772 = vrot.lane.b32.xlu0 %v3684_v0, %s3839_s0 }
0x1dcc   :  { %v1773_v48 = vpop.permute.xlu0 %1772 }
0x1dcd   :  { %v1775_v17 = vmul.f32 %v1773_v48, %v1753_v57 }
0x1dcf   :  { %1777 = vst [vmem:[#allocation1] sm:$0xff] %v1775_v17  ;;  %v1964_v39 = vrot.slane %v1775_v17, 2 }
0x1dd6   :  { %v1781_v10 = vld [vmem:[#allocation1 + $0x3] ss:$9 sm:$0xff] }
0x1dd7   :  { %v1779_v19 = vld [vmem:[#allocation1 + $0x2] ss:$9 sm:$0xff]  ;;  %v1807_v20 = vperm.slane %v1781_v10, 0 }
0x1dd8   :  { %v1782_v5 = vperm.slane %v1779_v19, 0 }
0x1dd9   :  { %1808 = vrot.lane.b32.xlu1 %v1807_v20, %s3842_s19 }
0x1dda   :  { %1783 = vrot.lane.b32.xlu2 %v1782_v5, %s3842_s19 }
0x1e34   :  { %v1784_v24 = vpop.permute.xlu2 %1783 }
0x1e35   :  { %3460 = vmatmul.msk.f32.vlgmr.msra.gmra.mxu3 %vm1318_vm5, %v1784_v24 }
0x1e36   :  { %3468 = vmatpush.xpose.msk.msra.mxu3 %vm1318_vm5, %v4357_v54 }
0x1e4b   :  { %v1809_v21 = vpop.permute.xlu1 %1808 }
0x1e4c   :  { %3462 = vmatmul.msk.f32.vlgmr.msra.gmra.mxu0 %vm1318_vm5, %v1809_v21 }
0x1e4d   :  { %3470 = vmatpush.xpose.msk.msra.mxu0 %vm1318_vm5, %v4362_v11 }
0x1eb8   :  { %v1804_v3 = vpop.f32.mrf.mxu3 }
0x1eb9   :  { %v1832_v12 = vsel %vm1573_vm3, %v1804_v3, -inf }
0x1eba   :  { %1833 = vmax.xlane.f32.xlu0 %v1832_v12 }
0x1ec9   :  { %v1829_v16 = vpop.f32.mrf.mxu0 }
0x1eca   :  { %v1835_v53 = vsel %vm1573_vm3, %v1829_v16, -inf }
0x1ecb   :  { %1836 = vmax.xlane.f32.xlu2 %v1835_v53 }
0x1ee3   :  { %1926 = vrot.lane.b32.xlu2 %v1775_v17, %s3842_s19 }
0x1f2d   :  { %v1834_v18 = vpop.xlane.xlu0 %1833 }
0x1f2e   :  { %v1838_v28 = vsub.f32 %v1804_v3, %v1834_v18 }
0x1f30   :  { %v1840_v31 = vmul.f32 1.442695, %v1838_v28 }
0x1f32   :  { %3685 = vpow2.f32 %v1840_v31 }
0x1f38   :  { %v3686_v32 = vpop.eup %3685 }
0x1f39   :  { %v1844_v34 = vsel %vm1573_vm3, %v3686_v32, 0.0 }
0x1f3a   :  { %1845 = vadd.xlane.f32.xlu1 %v1844_v34 }
0x1f3e   :  { %v1837_v35 = vpop.xlane.xlu2 %1836 }
0x1f3f   :  { %v1839_v37 = vsub.f32 %v1829_v16, %v1837_v35 }
0x1f41   :  { %v1842_v58 = vmul.f32 1.442695, %v1839_v37 }
0x1f43   :  { %3687 = vpow2.f32 %v1842_v58 }
0x1f46   :  { %v1927_v28 = vpop.permute.xlu2 %1926 }
0x1f49   :  { %v3688_v38 = vpop.eup %3687 }
0x1f4a   :  { %v1847_v1 = vsel %vm1573_vm3, %v3688_v38, 0.0 }
0x1f4b   :  { %1848 = vadd.xlane.f32.xlu0 %v1847_v1 }
0x1f5f   :  { %1965 = vrot.lane.b32.xlu0 %v1964_v39, %s3839_s0 }
0x1fad   :  { %v1846_v43 = vpop.xlane.xlu1 %1845 }
0x1fae   :  { %3689 = vrcp.f32 %v1846_v43  ;;  %v1861_v52 = vand.u32 2147483648, %v1846_v43  ;;  %v1859_v44 = vand.u32 2147483647, %v1846_v43  ;;  %vm1855_vm14 = vweird.f32 %v1846_v43 }
0x1fb0   :  { %v1862_v55 = vor.u32 1.1754944e-38, %v1861_v52  ;;  %vm1860_vm1 = vcmp.eq.f32.partialorder %v1859_v44, 8.507059e+37 }
0x1fb4   :  { %v3690_v49 = vpop.eup %3689 }
0x1fb5   :  { %v1851_v50 = vmul.f32 %v3690_v49, %v1846_v43  ;;  %vm1856_vm13 = vweird.f32 %v3690_v49 }
0x1fb6   :  { %vm1857_vm15 = vmor %vm1855_vm14, %vm1856_vm13  ;;  %vm1933_vm13 = vcmask 1043459  }
0x1fb7   :  { %v1852_v51 = vsub.f32 1.0, %v1851_v50 }
0x1fb9   :  { %v1853_v33 = vmul.f32 %v3690_v49, %v1852_v51 }
0x1fbb   :  { %v1854_v47 = vadd.f32 %v3690_v49, %v1853_v33 }
0x1fbd   :  { %v1858_v56 = vsel %vm1857_vm15, %v3690_v49, %v1854_v47 }
0x1fbe   :  { %v1863_v57 = vsel %vm1860_vm1, %v1862_v55, %v1858_v56  ;;  %v1849_v63 = vpop.xlane.xlu0 %1848  ;;  %v2017_v56 = vrot.slane %v4496_v6, 6 }
0x1fbf   :  { %v1864_v8 = vmul.f32 %v3686_v32, %v1863_v57  ;;  %3691 = vrcp.f32 %v1849_v63  ;;  %v1876_v48 = vand.u32 2147483648, %v1849_v63  ;;  %v1874_v10 = vand.u32 2147483647, %v1849_v63 }
0x1fc0   :  { %vm1870_vm7 = vweird.f32 %v1849_v63 }
0x1fc1   :  { %3463 = vmatmul.msk.f32.vlgmr.msrb.gmra.mxu3 %vm1622_vm0, %v1864_v8  ;;  %v1877_v20 = vor.u32 1.1754944e-38, %v1876_v48  ;;  %vm1875_vm11 = vcmp.eq.f32.partialorder %v1874_v10, 8.507059e+37 }
0x1fc2   :  { %2158 = vmatpush.msrb.mxu3 %v4344_v46 }
0x1fc5   :  { %v3692_v9 = vpop.eup %3691 }
0x1fc6   :  { %v1866_v13 = vmul.f32 %v3692_v9, %v1849_v63  ;;  %vm1871_vm4 = vweird.f32 %v3692_v9 }
0x1fc7   :  { %vm1872_vm9 = vmor %vm1870_vm7, %vm1871_vm4 }
0x1fc8   :  { %v1867_v0 = vsub.f32 1.0, %v1866_v13 }
0x1fca   :  { %v1868_v17 = vmul.f32 %v3692_v9, %v1867_v0 }
0x1fcc   :  { %v1869_v19 = vadd.f32 %v3692_v9, %v1868_v17 }
0x1fce   :  { %v1873_v5 = vsel %vm1872_vm9, %v3692_v9, %v1869_v19 }
0x1fcf   :  { %v1878_v24 = vsel %vm1875_vm11, %v1877_v20, %v1873_v5 }
0x1fd0   :  { %v1879_v21 = vmul.f32 %v3688_v38, %v1878_v24 }
0x1fd1   :  { %v1966_v58 = vpop.permute.xlu0 %1965 }
0x1fd2   :  { %3464 = vmatmul.msk.f32.vlgmr.msrb.gmra.mxu0 %vm1622_vm0, %v1879_v21 }
0x1fd3   :  { %2181 = vmatpush.msrb.mxu0 %v4340_v60 }
0x2044   :  { %v1900_v3 = vpop.f32.mrf.mxu3 }
0x2045   :  { %v1931_v16 = vrot.slane %v1900_v3, 6 }
0x204f   :  { %v1923_v12 = vpop.f32.mrf.mxu0 }
0x2050   :  { %v1932_v53 = vrot.slane %v1923_v12, 5 }
0x2052   :  { %v1934_v18 = vsel %vm1933_vm13, %v1932_v53, %v1931_v16 }
0x2053   :  { %1935 = vrot.lane.b32.xlu1 %v1934_v18, %s3842_s19 }
0x20c5   :  { %v1936_v31 = vpop.permute.xlu1 %1935 }
0x20c6   :  { %v1938_v32 = vsel %vm1318_vm5, %v1927_v28, %v1936_v31 }
0x20c7   :  { %v1940_v34 = vrot.slane %v1938_v32, 2 }
0x20c9   :  { %3465 = vmatmul.msk.f32.vlgmr.msra.gmra.mxu1 %vm1449_vm6, %v1940_v34 }
0x20ca   :  { %2471 = vmatpush.msra.mxu1 %v4412_v22 }
0x20cc   :  { %2472 = vmatpush.msra.mxu1 %v4417_v14 }
0x20ce   :  { %2473 = vmatpush.msra.mxu1 %v4423_v2 }
0x20d0   :  { %2474 = vmatpush.msra.mxu1 %v4429_v4 }
0x20d2   :  { %2475 = vmatpush.msra.mxu1 %v4435_v29 }
0x20d4   :  { %2476 = vmatpush.msra.mxu1 %v4441_v25 }
0x20d6   :  { %2477 = vmatpush.msra.mxu1 %v4447_v26 }
0x20d8   :  { %2478 = vmatpush.msra.mxu1 %v4458_v61 }
0x2146   :  { %v1960_v35 = vpop.f32.mrf.mxu1 }
0x2147   :  { %3693 = vtanh.f32 %v1960_v35 }
0x214d   :  { %v4530_v37 = vpop.eup %3693 }
0x214e   :  { %v1968_v38 = vsel %vm1318_vm5, %v4530_v37, %v1966_v58 }
0x214f   :  { %3466 = vmatmul.msk.f32.vlgmr.msrb.gmra.mxu2 %vm1449_vm6, %v1968_v38 }
0x2150   :  { %2500 = vmatpush.msrb.mxu2 %v4247_v40 }
0x2152   :  { %2501 = vmatpush.msrb.mxu2 %v4252_v23 }
0x2154   :  { %2502 = vmatpush.msrb.mxu2 %v4261_v62 }
0x2156   :  { %2503 = vmatpush.msrb.mxu2 %v4273_v41 }
0x2158   :  { %2504 = vmatpush.msrb.mxu2 %v4280_v36 }
0x215a   :  { %2505 = vmatpush.msrb.mxu2 %v4288_v42 }
0x215c   :  { %2506 = vmatpush.msrb.mxu2 %v4294_v15 }
0x215e   :  { %2507 = vmatpush.msrb.mxu2 %v4306_v45 }
0x21d2   :  { %v1989_v1 = vpop.f32.mrf.mxu2 }
0x21d3   :  { %v1993_v39 = vrot.slane %v1989_v1, 4 }
0x21d5   :  { %v1995_v43 = vadd.f32 %v1993_v39, %v4353_v59 }
0x21d7   :  { %3695 = vtanh.f32 %v1995_v43  ;;  %v3467_v23 = vmul.f32 -1.442695, %v1995_v43 }
0x21d9   :  { %3697 = vpow2.f32 %v3467_v23 }
0x21dd   :  { %v3696_v40 = vpop.eup %3695 }
0x21de   :  { %2021 = vrot.lane.b32.xlu2 %v3696_v40, %s3839_s0 }
0x21df   :  { %v3698_v62 = vpop.eup %3697 }
0x21e0   :  { %v1999_v41 = vadd.f32 1.0, %v3698_v62 }
0x21e2   :  { %3699 = vrcp.f32 %v1999_v41  ;;  %v2011_v45 = vand.u32 2147483648, %v1999_v41  ;;  %vm2005_vm15 = vweird.f32 %v1999_v41  ;;  %v2009_v51 = vand.u32 2147483647, %v1999_v41 }
0x21e4   :  { %v2012_v33 = vor.u32 1.1754944e-38, %v2011_v45  ;;  %vm2010_vm4 = vcmp.eq.f32.partialorder %v2009_v51, 8.507059e+37 }
0x21e8   :  { %v3700_v36 = vpop.eup %3699 }
0x21e9   :  { %v2001_v49 = vmul.f32 %v3700_v36, %v1999_v41  ;;  %vm2006_vm14 = vweird.f32 %v3700_v36 }
0x21ea   :  { %vm2007_vm1 = vmor %vm2005_vm15, %vm2006_vm14 }
0x21eb   :  { %v2002_v42 = vsub.f32 1.0, %v2001_v49 }
0x21ed   :  { %v2003_v50 = vmul.f32 %v3700_v36, %v2002_v42 }
0x21ef   :  { %v2004_v15 = vadd.f32 %v3700_v36, %v2003_v50 }
0x21f1   :  { %v2008_v52 = vsel %vm2007_vm1, %v3700_v36, %v2004_v15 }
0x21f2   :  { %v2013_v47 = vsel %vm2010_vm4, %v2012_v33, %v2008_v52 }
0x21f3   :  { %v2019_v57 = vmul.f32 %v2017_v56, %v2013_v47 }
0x2238   :  { %v2022_v44 = vpop.permute.xlu2 %2021 }
0x2239   :  { %v2024_v55 = vmul.f32 %v2022_v44, %v2013_v47 }
0x223b   :  { %2026 = vrot.lane.b32.xlu0 %v2024_v55, %s3842_s19 }
0x22ad   :  { %v2027_v63 = vpop.permute.xlu0 %2026 }
0x22ae   :  { %v4547_v8 = vadd.f32 %v2027_v63, %v2019_v57 }
0x22b0   :  { %3701 = vtanh.f32 %v4547_v8 }
0x22b6   :  { %v3702_v9 = vpop.eup %3701 }
0x22b7   :  { %2032 = vrot.lane.b32.xlu1 %v3702_v9, %s3839_s0 }
0x2329   :  { %v2033_v13 = vpop.permute.xlu1 %2032 }
0x232a   :  { %v2035_v0 = vmul.f32 %v2033_v13, %v2013_v47 }
0x232c   :  { %2037 = vst [vmem:[#allocation1] sm:$0xff] %v2035_v0  ;;  %v2224_v38 = vrot.slane %v2035_v0, 4 }
0x2333   :  { %v2041_v48 = vld [vmem:[#allocation1 + $0x5] ss:$9 sm:$0xff] }
0x2334   :  { %v2039_v17 = vld [vmem:[#allocation1 + $0x4] ss:$9 sm:$0xff]  ;;  %v2067_v10 = vperm.slane %v2041_v48, 0 }
0x2335   :  { %v2042_v19 = vperm.slane %v2039_v17, 0 }
0x2336   :  { %2068 = vrot.lane.b32.xlu0 %v2067_v10, %s3842_s19 }
0x2337   :  { %2043 = vrot.lane.b32.xlu2 %v2042_v19, %s3842_s19 }
0x2391   :  { %v2044_v6 = vpop.permute.xlu2 %2043 }
0x2392   :  { %3469 = vmatmul.msk.f32.vlgmr.msra.gmra.mxu3 %vm1318_vm5, %v2044_v6 }
0x2393   :  { %3477 = vmatpush.xpose.msk.msra.mxu3 %vm1318_vm5, %v4357_v54 }
0x23a8   :  { %v2069_v20 = vpop.permute.xlu0 %2068 }
0x23a9   :  { %3471 = vmatmul.msk.f32.vlgmr.msra.gmra.mxu0 %vm1318_vm5, %v2069_v20 }
0x23aa   :  { %3479 = vmatpush.xpose.msk.msra.mxu0 %vm1318_vm5, %v4362_v11 }
0x2415   :  { %v2064_v5 = vpop.f32.mrf.mxu3 }
0x2416   :  { %v2092_v24 = vsel %vm1573_vm3, %v2064_v5, -inf }
0x2417   :  { %2093 = vmax.xlane.f32.xlu1 %v2092_v24 }
0x2426   :  { %v2089_v21 = vpop.f32.mrf.mxu0 }
0x2427   :  { %v2095_v3 = vsel %vm1573_vm3, %v2089_v21, -inf }
0x2428   :  { %2096 = vmax.xlane.f32.xlu2 %v2095_v3  ;;  %v3252_v3 = vrot.slane %v4530_v37, 6  ;;  %v4598_v37 = vld [vmem:[%s4875_s12 + $0x30] sm:$0xff] }
0x2440   :  { %2186 = vrot.lane.b32.xlu2 %v2035_v0, %s3842_s19 }
0x248a   :  { %v2094_v12 = vpop.xlane.xlu1 %2093 }
0x248b   :  { %v2098_v16 = vsub.f32 %v2064_v5, %v2094_v12 }
0x248d   :  { %v2100_v53 = vmul.f32 1.442695, %v2098_v16 }
0x248f   :  { %3703 = vpow2.f32 %v2100_v53 }
0x2495   :  { %v3704_v18 = vpop.eup %3703 }
0x2496   :  { %v2104_v28 = vsel %vm1573_vm3, %v3704_v18, 0.0 }
0x2497   :  { %2105 = vadd.xlane.f32.xlu0 %v2104_v28  ;;  %v3266_v28 = vsel %vm1295_vm8, %v4479_v30, %v3252_v3  ;;  %v4604_v30 = vld [vmem:[%s4875_s12 + $0x28] sm:$0xff] }
0x249b   :  { %v2097_v31 = vpop.xlane.xlu2 %2096 }
0x249c   :  { %v2099_v32 = vsub.f32 %v2089_v21, %v2097_v31  ;;  %v4589_v31 = vld [vmem:[%s4875_s12 + $0x38] sm:$0xff] }
0x249e   :  { %v2102_v34 = vmul.f32 1.442695, %v2099_v32 }
0x24a0   :  { %3705 = vpow2.f32 %v2102_v34  ;;  %v4610_v34 = vld [vmem:[%s4875_s12 + $0x20] sm:$0xff] }
0x24a3   :  { %v2187_v6 = vpop.permute.xlu2 %2186 }
0x24a6   :  { %v3706_v35 = vpop.eup %3705 }
0x24a7   :  { %v2107_v58 = vsel %vm1573_vm3, %v3706_v35, 0.0 }
0x24a8   :  { %2108 = vadd.xlane.f32.xlu1 %v2107_v58  ;;  %v4622_v58 = vld [vmem:[%s4875_s12 + $0x10] sm:$0xff] }
0x24c1   :  { %2225 = vrot.lane.b32.xlu1 %v2224_v38, %s3839_s0  ;;  %v4628_v38 = vld [vmem:[%s4875_s12 + $0x8] sm:$0xff] }
0x250a   :  { %v2106_v1 = vpop.xlane.xlu0 %2105 }
0x250b   :  { %3707 = vrcp.f32 %v2106_v1  ;;  %v2121_v23 = vand.u32 2147483648, %v2106_v1  ;;  %v2119_v41 = vand.u32 2147483647, %v2106_v1  ;;  %vm2115_vm9 = vweird.f32 %v2106_v1 }
0x250d   :  { %v2122_v49 = vor.u32 1.1754944e-38, %v2121_v23  ;;  %vm2120_vm14 = vcmp.eq.f32.partialorder %v2119_v41, 8.507059e+37 }
0x2511   :  { %v3708_v39 = vpop.eup %3707 }
0x2512   :  { %v2111_v43 = vmul.f32 %v3708_v39, %v2106_v1  ;;  %vm2116_vm7 = vweird.f32 %v3708_v39  ;;  %v4634_v1 = vld [vmem:[%s4875_s12] sm:$0xff] }
0x2513   :  { %vm2117_vm11 = vmor %vm2115_vm9, %vm2116_vm7  ;;  %vm2193_vm9 = vcmask 1045509  }
0x2514   :  { %v2112_v40 = vsub.f32 1.0, %v2111_v43 }
0x2516   :  { %v2113_v62 = vmul.f32 %v3708_v39, %v2112_v40 }
0x2518   :  { %v2114_v36 = vadd.f32 %v3708_v39, %v2113_v62 }
0x251a   :  { %v2118_v42 = vsel %vm2117_vm11, %v3708_v39, %v2114_v36 }
0x251b   :  { %v2123_v50 = vsel %vm2120_vm14, %v2122_v49, %v2118_v42  ;;  %v2109_v15 = vpop.xlane.xlu1 %2108 }
0x251c   :  { %v2124_v45 = vmul.f32 %v3704_v18, %v2123_v50  ;;  %3709 = vrcp.f32 %v2109_v15  ;;  %v2136_v44 = vand.u32 2147483648, %v2109_v15  ;;  %v2134_v55 = vand.u32 2147483647, %v2109_v15 }
0x251d   :  { %vm2130_vm1 = vweird.f32 %v2109_v15 }
0x251e   :  { %3472 = vmatmul.msk.f32.vlgmr.msrb.gmra.mxu3 %vm1622_vm0, %v2124_v45  ;;  %v2137_v57 = vor.u32 1.1754944e-38, %v2136_v44  ;;  %vm2135_vm7 = vcmp.eq.f32.partialorder %v2134_v55, 8.507059e+37 }
0x251f   :  { %2418 = vmatpush.msrb.mxu3 %v4344_v46 }
0x2522   :  { %v3710_v51 = vpop.eup %3709 }
0x2523   :  { %v2126_v52 = vmul.f32 %v3710_v51, %v2109_v15  ;;  %vm2131_vm15 = vweird.f32 %v3710_v51 }
0x2524   :  { %vm2132_vm4 = vmor %vm2130_vm1, %vm2131_vm15 }
0x2525   :  { %v2127_v33 = vsub.f32 1.0, %v2126_v52 }
0x2527   :  { %v2128_v47 = vmul.f32 %v3710_v51, %v2127_v33 }
0x2529   :  { %v2129_v56 = vadd.f32 %v3710_v51, %v2128_v47 }
0x252b   :  { %v2133_v63 = vsel %vm2132_vm4, %v3710_v51, %v2129_v56  ;;  %v2277_v56 = vrot.slane %v4547_v8, 6 }
0x252c   :  { %v2138_v9 = vsel %vm2135_vm7, %v2137_v57, %v2133_v63 }
0x252d   :  { %v2139_v13 = vmul.f32 %v3706_v35, %v2138_v9  ;;  %v4616_v35 = vld [vmem:[%s4875_s12 + $0x18] sm:$0xff] }
0x252f   :  { %3473 = vmatmul.msk.f32.vlgmr.msrb.gmra.mxu0 %vm1622_vm0, %v2139_v13 }
0x2530   :  { %2441 = vmatpush.msrb.mxu0 %v4340_v60 }
0x2533   :  { %v2226_v16 = vpop.permute.xlu1 %2225 }
0x25a1   :  { %v2160_v0 = vpop.f32.mrf.mxu3 }
0x25a2   :  { %v2191_v17 = vrot.slane %v2160_v0, 4 }
0x25ac   :  { %v2183_v48 = vpop.f32.mrf.mxu0 }
0x25ad   :  { %v2192_v10 = vrot.slane %v2183_v48, 3 }
0x25af   :  { %v2194_v19 = vsel %vm2193_vm9, %v2192_v10, %v2191_v17 }
0x25b0   :  { %2195 = vrot.lane.b32.xlu0 %v2194_v19, %s3842_s19 }
0x2622   :  { %v2196_v20 = vpop.permute.xlu0 %2195 }
0x2623   :  { %v2198_v5 = vsel %vm1318_vm5, %v2187_v6, %v2196_v20 }
0x2624   :  { %v2200_v24 = vrot.slane %v2198_v5, 4 }
0x2626   :  { %3474 = vmatmul.msk.f32.vlgmr.msrb.gmra.mxu1 %vm1449_vm6, %v2200_v24 }
0x2627   :  { %2721 = vmatpush.msrb.mxu1 %v4412_v22 }
0x2629   :  { %2722 = vmatpush.msrb.mxu1 %v4417_v14 }
0x262b   :  { %2723 = vmatpush.msrb.mxu1 %v4423_v2 }
0x262d   :  { %2724 = vmatpush.msrb.mxu1 %v4429_v4 }
0x262f   :  { %2725 = vmatpush.msrb.mxu1 %v4435_v29 }
0x2631   :  { %2726 = vmatpush.msrb.mxu1 %v4441_v25 }
0x2633   :  { %2727 = vmatpush.msrb.mxu1 %v4447_v26 }
0x2635   :  { %2728 = vmatpush.msrb.mxu1 %v4458_v61 }
0x26a3   :  { %v2220_v21 = vpop.f32.mrf.mxu1 }
0x26a4   :  { %3711 = vtanh.f32 %v2220_v21 }
0x26aa   :  { %v3712_v12 = vpop.eup %3711 }
0x26ab   :  { %v3255_v53 = vrot.slane %v3712_v12, 4  ;;  %v2228_v18 = vsel %vm1318_vm5, %v3712_v12, %v2226_v16 }
0x26ac   :  { %3475 = vmatmul.msk.f32.vlgmr.msra.gmra.mxu2 %vm1449_vm6, %v2228_v18 }
0x26ad   :  { %2749 = vmatpush.msra.mxu2 %v4589_v31  ;;  %v4593_v32 = vsel %vm1299_vm10, %v3266_v28, %v3255_v53 }
0x26af   :  { %2750 = vmatpush.msra.mxu2 %v4598_v37 }
0x26b1   :  { %2751 = vmatpush.msra.mxu2 %v4604_v30 }
0x26b3   :  { %2752 = vmatpush.msra.mxu2 %v4610_v34 }
0x26b5   :  { %2753 = vmatpush.msra.mxu2 %v4616_v35 }
0x26b7   :  { %2754 = vmatpush.msra.mxu2 %v4622_v58 }
0x26b9   :  { %2755 = vmatpush.msra.mxu2 %v4628_v38 }
0x26bb   :  { %2756 = vmatpush.msra.mxu2 %v4634_v1 }
0x272f   :  { %v2249_v39 = vpop.f32.mrf.mxu2 }
0x2730   :  { %v2253_v43 = vrot.slane %v2249_v39, 2 }
0x2732   :  { %v2255_v40 = vadd.f32 %v2253_v43, %v4353_v59 }
0x2734   :  { %3713 = vtanh.f32 %v2255_v40  ;;  %v3476_v62 = vmul.f32 -1.442695, %v2255_v40 }
0x2736   :  { %3715 = vpow2.f32 %v3476_v62 }
0x273a   :  { %v3714_v23 = vpop.eup %3713 }
0x273b   :  { %2281 = vrot.lane.b32.xlu0 %v3714_v23, %s3839_s0 }
0x273c   :  { %v3716_v41 = vpop.eup %3715 }
0x273d   :  { %v2259_v36 = vadd.f32 1.0, %v3716_v41 }
0x273f   :  { %3717 = vrcp.f32 %v2259_v36  ;;  %v2271_v51 = vand.u32 2147483648, %v2259_v36  ;;  %vm2265_vm14 = vweird.f32 %v2259_v36  ;;  %v2269_v52 = vand.u32 2147483647, %v2259_v36 }
0x2741   :  { %v2272_v33 = vor.u32 1.1754944e-38, %v2271_v51  ;;  %vm2270_vm1 = vcmp.eq.f32.partialorder %v2269_v52, 8.507059e+37 }
0x2745   :  { %v3718_v49 = vpop.eup %3717 }
0x2746   :  { %v2261_v42 = vmul.f32 %v3718_v49, %v2259_v36  ;;  %vm2266_vm11 = vweird.f32 %v3718_v49 }
0x2747   :  { %vm2267_vm15 = vmor %vm2265_vm14, %vm2266_vm11 }
0x2748   :  { %v2262_v50 = vsub.f32 1.0, %v2261_v42 }
0x274a   :  { %v2263_v15 = vmul.f32 %v3718_v49, %v2262_v50 }
0x274c   :  { %v2264_v45 = vadd.f32 %v3718_v49, %v2263_v15 }
0x274e   :  { %v2268_v59 = vsel %vm2267_vm15, %v3718_v49, %v2264_v45 }
0x274f   :  { %v2273_v47 = vsel %vm2270_vm1, %v2272_v33, %v2268_v59 }
0x2750   :  { %v2279_v57 = vmul.f32 %v2277_v56, %v2273_v47 }
0x27ad   :  { %v2282_v44 = vpop.permute.xlu0 %2281 }
0x27ae   :  { %v2284_v55 = vmul.f32 %v2282_v44, %v2273_v47 }
0x27b0   :  { %2286 = vrot.lane.b32.xlu2 %v2284_v55, %s3842_s19 }
0x280a   :  { %v2287_v63 = vpop.permute.xlu2 %2286 }
0x280b   :  { %v4641_v9 = vadd.f32 %v2287_v63, %v2279_v57 }
0x280d   :  { %3719 = vtanh.f32 %v4641_v9 }
0x2813   :  { %v3720_v13 = vpop.eup %3719 }
0x2814   :  { %2292 = vrot.lane.b32.xlu1 %v3720_v13, %s3839_s0 }
0x2886   :  { %v2293_v0 = vpop.permute.xlu1 %2292 }
0x2887   :  { %v2295_v48 = vmul.f32 %v2293_v0, %v2273_v47 }
0x2889   :  { %2297 = vst [vmem:[#allocation1] sm:$0xff] %v2295_v48  ;;  %v2484_v23 = vrot.slane %v2295_v48, 6 }
0x2890   :  { %v2301_v17 = vld [vmem:[#allocation1 + $0x7] ss:$9 sm:$0xff] }
0x2891   :  { %v2299_v10 = vld [vmem:[#allocation1 + $0x6] ss:$9 sm:$0xff]  ;;  %v2327_v19 = vperm.slane %v2301_v17, 0 }
0x2892   :  { %v2302_v6 = vperm.slane %v2299_v10, 0 }
0x2893   :  { %2328 = vrot.lane.b32.xlu2 %v2327_v19, %s3842_s19 }
0x2894   :  { %2303 = vrot.lane.b32.xlu0 %v2302_v6, %s3842_s19 }
0x28ed   :  { %v2329_v8 = vpop.permute.xlu2 %2328 }
0x28ee   :  { %3480 = vmatmul.msk.f32.vlgmr.msra.gmra.mxu0 %vm1318_vm5, %v2329_v8 }
0x28ef   :  { %3488 = vmatpush.xpose.msk.msra.mxu0 %vm1318_vm5, %v4362_v11 }
0x2906   :  { %v2304_v20 = vpop.permute.xlu0 %2303 }
0x2907   :  { %3478 = vmatmul.msk.f32.vlgmr.msra.gmra.mxu3 %vm1318_vm5, %v2304_v20 }
0x2908   :  { %3486 = vmatpush.xpose.msk.msra.mxu3 %vm1318_vm5, %v4357_v54 }
0x296b   :  { %v2349_v5 = vpop.f32.mrf.mxu0 }
0x296c   :  { %v2355_v24 = vsel %vm1573_vm3, %v2349_v5, -inf }
0x296d   :  { %2356 = vmax.xlane.f32.xlu0 %v2355_v24 }
0x2981   :  { %2446 = vrot.lane.b32.xlu0 %v2295_v48, %s3842_s19 }
0x298a   :  { %v2324_v21 = vpop.f32.mrf.mxu3 }
0x298b   :  { %v2352_v3 = vsel %vm1573_vm3, %v2324_v21, -inf }
0x298c   :  { %2353 = vmax.xlane.f32.xlu1 %v2352_v3 }
0x29e0   :  { %v2357_v12 = vpop.xlane.xlu0 %2356 }
0x29e1   :  { %v2359_v16 = vsub.f32 %v2349_v5, %v2357_v12 }
0x29e3   :  { %v2362_v53 = vmul.f32 1.442695, %v2359_v16 }
0x29e5   :  { %3721 = vpow2.f32 %v2362_v53 }
0x29eb   :  { %v3722_v18 = vpop.eup %3721 }
0x29ec   :  { %v2367_v28 = vsel %vm1573_vm3, %v3722_v18, 0.0 }
0x29ed   :  { %2368 = vadd.xlane.f32.xlu1 %v2367_v28 }
0x29f3   :  { %v2447_v12 = vpop.permute.xlu0 %2446 }
0x29ff   :  { %v2354_v39 = vpop.xlane.xlu1 %2353 }
0x2a00   :  { %v2358_v43 = vsub.f32 %v2324_v21, %v2354_v39 }
0x2a02   :  { %v2360_v40 = vmul.f32 1.442695, %v2358_v43 }
0x2a04   :  { %3723 = vpow2.f32 %v2360_v40 }
0x2a06   :  { %2485 = vrot.lane.b32.xlu1 %v2484_v23, %s3839_s0 }
0x2a0a   :  { %v3724_v62 = vpop.eup %3723 }
0x2a0b   :  { %v2364_v41 = vsel %vm1573_vm3, %v3724_v62, 0.0 }
0x2a0c   :  { %2365 = vadd.xlane.f32.xlu2 %v2364_v41 }
0x2a60   :  { %v2369_v36 = vpop.xlane.xlu1 %2368 }
0x2a61   :  { %3725 = vrcp.f32 %v2369_v36  ;;  %v2396_v15 = vand.u32 2147483648, %v2369_v36  ;;  %v2394_v51 = vand.u32 2147483647, %v2369_v36  ;;  %vm2390_vm7 = vweird.f32 %v2369_v36 }
0x2a63   :  { %v2397_v59 = vor.u32 1.1754944e-38, %v2396_v15  ;;  %vm2395_vm14 = vcmp.eq.f32.partialorder %v2394_v51, 8.507059e+37 }
0x2a67   :  { %v3726_v49 = vpop.eup %3725 }
0x2a68   :  { %v2386_v42 = vmul.f32 %v3726_v49, %v2369_v36  ;;  %vm2391_vm4 = vweird.f32 %v3726_v49 }
0x2a69   :  { %vm2392_vm11 = vmor %vm2390_vm7, %vm2391_vm4 }
0x2a6a   :  { %v2387_v50 = vsub.f32 1.0, %v2386_v42 }
0x2a6c   :  { %v2388_v45 = vmul.f32 %v3726_v49, %v2387_v50 }
0x2a6e   :  { %v2389_v52 = vadd.f32 %v3726_v49, %v2388_v45 }
0x2a70   :  { %v2393_v33 = vsel %vm2392_vm11, %v3726_v49, %v2389_v52  ;;  %vm2453_vm11 = vcmask 1047559   ;;  %v2534_v49 = vrot.slane %v4641_v9, 6 }
0x2a71   :  { %v2398_v44 = vsel %vm2395_vm14, %v2397_v59, %v2393_v33 }
0x2a72   :  { %v2399_v47 = vmul.f32 %v3722_v18, %v2398_v44 }
0x2a74   :  { %3482 = vmatmul.msk.f32.vlgmr.msrb.gmra.mxu0 %vm1622_vm0, %v2399_v47 }
0x2a75   :  { %2694 = vmatpush.msrb.mxu0 %v4340_v60 }
0x2a78   :  { %v2486_v43 = vpop.permute.xlu1 %2485 }
0x2a7f   :  { %v2366_v55 = vpop.xlane.xlu2 %2365 }
0x2a80   :  { %3727 = vrcp.f32 %v2366_v55  ;;  %v2381_v13 = vand.u32 2147483648, %v2366_v55  ;;  %v2379_v48 = vand.u32 2147483647, %v2366_v55  ;;  %vm2375_vm1 = vweird.f32 %v2366_v55 }
0x2a82   :  { %v2382_v10 = vor.u32 1.1754944e-38, %v2381_v13  ;;  %vm2380_vm7 = vcmp.eq.f32.partialorder %v2379_v48, 8.507059e+37 }
0x2a86   :  { %v3728_v56 = vpop.eup %3727 }
0x2a87   :  { %v2371_v57 = vmul.f32 %v3728_v56, %v2366_v55  ;;  %vm2376_vm15 = vweird.f32 %v3728_v56 }
0x2a88   :  { %vm2377_vm4 = vmor %vm2375_vm1, %vm2376_vm15 }
0x2a89   :  { %v2372_v63 = vsub.f32 1.0, %v2371_v57 }
0x2a8b   :  { %v2373_v0 = vmul.f32 %v3728_v56, %v2372_v63 }
0x2a8d   :  { %v2374_v17 = vadd.f32 %v3728_v56, %v2373_v0 }
0x2a8f   :  { %v2378_v19 = vsel %vm2377_vm4, %v3728_v56, %v2374_v17 }
0x2a90   :  { %v2383_v6 = vsel %vm2380_vm7, %v2382_v10, %v2378_v19 }
0x2a91   :  { %v2384_v8 = vmul.f32 %v3724_v62, %v2383_v6 }
0x2a93   :  { %3481 = vmatmul.msk.f32.vlgmr.msrb.gmra.mxu3 %vm1622_vm0, %v2384_v8 }
0x2a94   :  { %2671 = vmatpush.msrb.mxu3 %v4344_v46 }
0x2af1   :  { %v2443_v20 = vpop.f32.mrf.mxu0 }
0x2af2   :  { %v2452_v24 = vrot.slane %v2443_v20, 1 }
0x2b16   :  { %v2420_v5 = vpop.f32.mrf.mxu3 }
0x2b17   :  { %v2451_v21 = vrot.slane %v2420_v5, 2 }
0x2b19   :  { %v2454_v3 = vsel %vm2453_vm11, %v2452_v24, %v2451_v21 }
0x2b1a   :  { %2455 = vrot.lane.b32.xlu2 %v2454_v3, %s3842_s19 }
0x2b74   :  { %v2456_v16 = vpop.permute.xlu2 %2455 }
0x2b75   :  { %v2458_v53 = vsel %vm1318_vm5, %v2447_v12, %v2456_v16 }
0x2b76   :  { %v2460_v18 = vrot.slane %v2458_v53, 6 }
0x2b78   :  { %3483 = vmatmul.msk.f32.vlgmr.msra.gmra.mxu1 %vm1449_vm6, %v2460_v18 }
0x2b79   :  { %2979 = vmatpush.msra.mxu1 %v4412_v22 }
0x2b7b   :  { %2980 = vmatpush.msra.mxu1 %v4417_v14 }
0x2b7d   :  { %2981 = vmatpush.msra.mxu1 %v4423_v2  ;;  %v3803_v2 = vld [vmem:[%s4874_s11] ss:$0 sm:$0xff] }
0x2b7f   :  { %2982 = vmatpush.msra.mxu1 %v4429_v4  ;;  %v4692_v4 = vadd.f32 %v3803_v2, %v4451_v27 }
0x2b81   :  { %2983 = vmatpush.msra.mxu1 %v4435_v29 }
0x2b83   :  { %2984 = vmatpush.msra.mxu1 %v4441_v25 }
0x2b85   :  { %2985 = vmatpush.msra.mxu1 %v4447_v26 }
0x2b87   :  { %2986 = vmatpush.msra.mxu1 %v4458_v61 }
0x2bf5   :  { %v2480_v28 = vpop.f32.mrf.mxu1 }
0x2bf6   :  { %3729 = vtanh.f32 %v2480_v28 }
0x2bfc   :  { %v3730_v39 = vpop.eup %3729 }
0x2bfd   :  { %v3258_v40 = vrot.slane %v3730_v39, 2  ;;  %v2488_v22 = vsel %vm1318_vm5, %v3730_v39, %v2486_v43 }
0x2bfe   :  { %3484 = vmatmul.msk.f32.vlgmr.msrb.gmra.mxu2 %vm1449_vm6, %v2488_v22 }
0x2bff   :  { %3008 = vmatpush.msrb.mxu2 %v4589_v31  ;;  %v4679_v14 = vsel %vm1303_vm12, %v4593_v32, %v3258_v40 }
0x2c01   :  { %3009 = vmatpush.msrb.mxu2 %v4598_v37 }
0x2c03   :  { %3010 = vmatpush.msrb.mxu2 %v4604_v30 }
0x2c05   :  { %3011 = vmatpush.msrb.mxu2 %v4610_v34 }
0x2c07   :  { %3012 = vmatpush.msrb.mxu2 %v4616_v35 }
0x2c09   :  { %3013 = vmatpush.msrb.mxu2 %v4622_v58 }
0x2c0b   :  { %3014 = vmatpush.msrb.mxu2 %v4628_v38 }
0x2c0d   :  { %3015 = vmatpush.msrb.mxu2 %v4634_v1 }
0x2c81   :  { %v2509_v29 = vpop.f32.mrf.mxu2 }
0x2c82   :  { %v2512_v25 = vadd.f32 %v2509_v29, %v4692_v4 }
0x2c84   :  { %3731 = vtanh.f32 %v2512_v25  ;;  %v3485_v61 = vmul.f32 -1.442695, %v2512_v25 }
0x2c86   :  { %3733 = vpow2.f32 %v3485_v61 }
0x2c8a   :  { %v3732_v26 = vpop.eup %3731 }
0x2c8b   :  { %2538 = vrot.lane.b32.xlu0 %v3732_v26, %s3839_s0 }
0x2c8c   :  { %v3734_v31 = vpop.eup %3733 }
0x2c8d   :  { %v2516_v32 = vadd.f32 1.0, %v3734_v31 }
0x2c8f   :  { %3735 = vrcp.f32 %v2516_v32  ;;  %v2528_v27 = vand.u32 2147483648, %v2516_v32  ;;  %vm2522_vm15 = vweird.f32 %v2516_v32  ;;  %v2526_v38 = vand.u32 2147483647, %v2516_v32 }
0x2c91   :  { %v2529_v23 = vor.u32 1.1754944e-38, %v2528_v27  ;;  %vm2527_vm4 = vcmp.eq.f32.partialorder %v2526_v38, 8.507059e+37 }
0x2c95   :  { %v3736_v37 = vpop.eup %3735 }
0x2c96   :  { %v2518_v30 = vmul.f32 %v3736_v37, %v2516_v32  ;;  %vm2523_vm14 = vweird.f32 %v3736_v37 }
0x2c97   :  { %vm2524_vm1 = vmor %vm2522_vm15, %vm2523_vm14 }
0x2c98   :  { %v2519_v34 = vsub.f32 1.0, %v2518_v30 }
0x2c9a   :  { %v2520_v35 = vmul.f32 %v3736_v37, %v2519_v34 }
0x2c9c   :  { %v2521_v58 = vadd.f32 %v3736_v37, %v2520_v35 }
0x2c9e   :  { %v2525_v1 = vsel %vm2524_vm1, %v3736_v37, %v2521_v58 }
0x2c9f   :  { %v2530_v41 = vsel %vm2527_vm4, %v2529_v23, %v2525_v1 }
0x2ca0   :  { %v2536_v42 = vmul.f32 %v2534_v49, %v2530_v41  ;;  %v3804_v49 = vld [vmem:[%s4876_s13 + $0x38] sm:$0xff] }
0x2cfd   :  { %v2539_v62 = vpop.permute.xlu0 %2538 }
0x2cfe   :  { %v2541_v36 = vmul.f32 %v2539_v62, %v2530_v41 }
0x2d00   :  { %2543 = vrot.lane.b32.xlu2 %v2541_v36, %s3842_s19 }
0x2d5a   :  { %v2544_v50 = vpop.permute.xlu2 %2543 }
0x2d5b   :  { %v4698_v15 = vadd.f32 %v2544_v50, %v2536_v42  ;;  %v3805_v42 = vld [vmem:[%s4876_s13 + $0x30] sm:$0xff]  ;;  %v3806_v50 = vld [vmem:[%s4876_s13 + $0x28] sm:$0xff] }
0x2d5d   :  { %3737 = vtanh.f32 %v4698_v15 }
0x2d63   :  { %v3738_v45 = vpop.eup %3737 }
0x2d64   :  { %2549 = vrot.lane.b32.xlu0 %v3738_v45, %s3839_s0  ;;  %v3807_v45 = vld [vmem:[%s4876_s13 + $0x20] sm:$0xff] }
0x2dd6   :  { %v2550_v51 = vpop.permute.xlu0 %2549 }
0x2dd7   :  { %v2552_v52 = vmul.f32 %v2550_v51, %v2530_v41  ;;  %v3808_v51 = vld [vmem:[%s4876_s13 + $0x18] sm:$0xff] }
0x2dd9   :  { %v2555_v59 = vperm.slane %v2552_v52, 0  ;;  %v2554_v33 = vrot.slane %v2552_v52, 1 }
0x2ddb   :  { %2556 = vrot.lane.b32.xlu1 %v2555_v59, %s3842_s19  ;;  %v2580_v44 = vperm.slane %v2554_v33, 0  ;;  %v3810_v59 = vld [vmem:[%s4876_s13 + $0x8] sm:$0xff]  ;;  %v3811_v33 = vld [vmem:[%s4876_s13] sm:$0xff] }
0x2ddd   :  { %2581 = vrot.lane.b32.xlu2 %v2580_v44, %s3842_s19 }
0x2e37   :  { %v2582_v47 = vpop.permute.xlu2 %2581 }
0x2e38   :  { %3489 = vmatmul.msk.f32.vlgmr.msra.gmra.mxu0 %vm1318_vm5, %v2582_v47 }
0x2e39   :  { %3497 = vmatpush.xpose.msk.msra.mxu0 %vm1318_vm5, %v4362_v11 }
0x2e4d   :  { %v2557_v9 = vpop.permute.xlu1 %2556 }
0x2e4e   :  { %3487 = vmatmul.msk.f32.vlgmr.msra.gmra.mxu3 %vm1318_vm5, %v2557_v9 }
0x2e4f   :  { %3495 = vmatpush.xpose.msk.msra.mxu3 %vm1318_vm5, %v4357_v54 }
0x2eb5   :  { %v2602_v55 = vpop.f32.mrf.mxu0 }
0x2eb6   :  { %v2608_v56 = vsel %vm1573_vm3, %v2602_v55, -inf }
0x2eb7   :  { %2609 = vmax.xlane.f32.xlu1 %v2608_v56 }
0x2ed1   :  { %v2577_v57 = vpop.f32.mrf.mxu3 }
0x2ed2   :  { %v2605_v63 = vsel %vm1573_vm3, %v2577_v57, -inf }
0x2ed3   :  { %2606 = vmax.xlane.f32.xlu0 %v2605_v63 }
0x2f2a   :  { %v2610_v13 = vpop.xlane.xlu1 %2609 }
0x2f2b   :  { %v2612_v0 = vsub.f32 %v2602_v55, %v2610_v13 }
0x2f2d   :  { %v2615_v48 = vmul.f32 1.442695, %v2612_v0 }
0x2f2f   :  { %3739 = vpow2.f32 %v2615_v48 }
0x2f35   :  { %v3740_v17 = vpop.eup %3739 }
0x2f36   :  { %v2620_v10 = vsel %vm1573_vm3, %v3740_v17, 0.0 }
0x2f37   :  { %2621 = vadd.xlane.f32.xlu0 %v2620_v10 }
0x2f46   :  { %v2607_v19 = vpop.xlane.xlu0 %2606 }
0x2f47   :  { %v2611_v6 = vsub.f32 %v2577_v57, %v2607_v19 }
0x2f49   :  { %v2613_v8 = vmul.f32 1.442695, %v2611_v6 }
0x2f4b   :  { %3741 = vpow2.f32 %v2613_v8  ;;  %2734 = vrot.lane.b32.xlu0 %v2552_v52, %s3839_s0 }
0x2f51   :  { %v3742_v20 = vpop.eup %3741 }
0x2f52   :  { %v2617_v5 = vsel %vm1573_vm3, %v3742_v20, 0.0 }
0x2f53   :  { %2618 = vadd.xlane.f32.xlu2 %v2617_v5 }
0x2f6b   :  { %2699 = vrot.lane.b32.xlu2 %v2552_v52, %s3842_s19  ;;  %v3809_v52 = vld [vmem:[%s4876_s13 + $0x10] sm:$0xff] }
0x2faa   :  { %v2622_v24 = vpop.xlane.xlu0 %2621 }
0x2fab   :  { %3743 = vrcp.f32 %v2622_v24  ;;  %v2649_v16 = vand.u32 2147483648, %v2622_v24  ;;  %v2647_v18 = vand.u32 2147483647, %v2622_v24  ;;  %vm2643_vm11 = vweird.f32 %v2622_v24 }
0x2fad   :  { %v2650_v39 = vor.u32 1.1754944e-38, %v2649_v16  ;;  %vm2648_vm15 = vcmp.eq.f32.partialorder %v2647_v18, 8.507059e+37  ;;  %v2786_v18 = vrot.slane %v4698_v15, 6 }
0x2fb1   :  { %v3744_v21 = vpop.eup %3743 }
0x2fb2   :  { %v2639_v3 = vmul.f32 %v3744_v21, %v2622_v24  ;;  %vm2644_vm7 = vweird.f32 %v3744_v21 }
0x2fb3   :  { %vm2645_vm14 = vmor %vm2643_vm11, %vm2644_vm7 }
0x2fb4   :  { %v2640_v12 = vsub.f32 1.0, %v2639_v3 }
0x2fb6   :  { %v2641_v53 = vmul.f32 %v3744_v21, %v2640_v12 }
0x2fb8   :  { %v2642_v28 = vadd.f32 %v3744_v21, %v2641_v53 }
0x2fba   :  { %v2646_v43 = vsel %vm2645_vm14, %v3744_v21, %v2642_v28 }
0x2fbb   :  { %v2651_v40 = vsel %vm2648_vm15, %v2650_v39, %v2646_v43 }
0x2fbc   :  { %v2652_v22 = vmul.f32 %v3740_v17, %v2651_v40 }
0x2fbd   :  { %v2735_v9 = vpop.permute.xlu0 %2734 }
0x2fbe   :  { %3491 = vmatmul.msk.f32.vlgmr.msrb.gmra.mxu0 %vm1622_vm0, %v2652_v22 }
0x2fbf   :  { %2950 = vmatpush.msrb.mxu0 %v4340_v60 }
0x2fc6   :  { %v2619_v2 = vpop.xlane.xlu2 %2618 }
0x2fc7   :  { %3745 = vrcp.f32 %v2619_v2  ;;  %v2634_v61 = vand.u32 2147483648, %v2619_v2  ;;  %v2632_v32 = vand.u32 2147483647, %v2619_v2  ;;  %vm2628_vm4 = vweird.f32 %v2619_v2 }
0x2fc9   :  { %v2635_v30 = vor.u32 1.1754944e-38, %v2634_v61  ;;  %vm2633_vm11 = vcmp.eq.f32.partialorder %v2632_v32, 8.507059e+37 }
0x2fcd   :  { %v3746_v29 = vpop.eup %3745 }
0x2fce   :  { %v2624_v25 = vmul.f32 %v3746_v29, %v2619_v2  ;;  %vm2629_vm1 = vweird.f32 %v3746_v29  ;;  %v2700_v62 = vpop.permute.xlu2 %2699 }
0x2fcf   :  { %vm2630_vm7 = vmor %vm2628_vm4, %vm2629_vm1 }
0x2fd0   :  { %v2625_v26 = vsub.f32 1.0, %v2624_v25 }
0x2fd2   :  { %v2626_v31 = vmul.f32 %v3746_v29, %v2625_v26 }
0x2fd4   :  { %v2627_v37 = vadd.f32 %v3746_v29, %v2626_v31 }
0x2fd6   :  { %v2631_v34 = vsel %vm2630_vm7, %v3746_v29, %v2627_v37 }
0x2fd7   :  { %v2636_v35 = vsel %vm2633_vm11, %v2635_v30, %v2631_v34 }
0x2fd8   :  { %v2637_v58 = vmul.f32 %v3742_v20, %v2636_v35 }
0x2fda   :  { %3490 = vmatmul.msk.f32.vlgmr.msrb.gmra.mxu3 %vm1622_vm0, %v2637_v58 }
0x2fdb   :  { %2927 = vmatpush.msrb.mxu3 %v4344_v46 }
0x303b   :  { %v2696_v27 = vpop.f32.mrf.mxu0 }
0x303c   :  { %v2704_v38 = vrot.slane %v2696_v27, 7 }
0x305d   :  { %v2673_v1 = vpop.f32.mrf.mxu3 }
0x305e   :  { %v2705_v23 = vsel %vm1675_vm2, %v2704_v38, %v2673_v1 }
0x305f   :  { %2706 = vrot.lane.b32.xlu1 %v2705_v23, %s3842_s19 }
0x30d1   :  { %v2707_v41 = vpop.permute.xlu1 %2706 }
0x30d2   :  { %v2709_v36 = vsel %vm1318_vm5, %v2700_v62, %v2707_v41 }
0x30d3   :  { %3492 = vmatmul.msk.f32.vlgmr.msrb.gmra.mxu1 %vm1449_vm6, %v2709_v36 }
0x30d4   :  { %3238 = vmatpush.msrb.mxu1 %v3804_v49 }
0x30d6   :  { %3239 = vmatpush.msrb.mxu1 %v3805_v42 }
0x30d8   :  { %3240 = vmatpush.msrb.mxu1 %v3806_v50 }
0x30da   :  { %3241 = vmatpush.msrb.mxu1 %v3807_v45 }
0x30dc   :  { %3242 = vmatpush.msrb.mxu1 %v3808_v51 }
0x30de   :  { %3243 = vmatpush.msrb.mxu1 %v3809_v52 }
0x30e0   :  { %3244 = vmatpush.msrb.mxu1 %v3810_v59 }
0x30e2   :  { %3245 = vmatpush.msrb.mxu1 %v3811_v33 }
0x3150   :  { %v2730_v44 = vpop.f32.mrf.mxu1 }
0x3151   :  { %3747 = vtanh.f32 %v2730_v44 }
0x3157   :  { %v4748_v47 = vpop.eup %3747 }
0x3158   :  { %v2737_v55 = vsel %vm1318_vm5, %v4748_v47, %v2735_v9 }
0x3159   :  { %3493 = vmatmul.msk.f32.vlgmr.msra.gmra.mxu2 %vm1449_vm6, %v2737_v55 }
0x31dc   :  { %v2758_v56 = vpop.f32.mrf.mxu2 }
0x31dd   :  { %v2762_v57 = vrot.slane %v2758_v56, 6 }
0x31df   :  { %v2764_v63 = vadd.f32 %v2762_v57, %v4692_v4 }
0x31e1   :  { %3749 = vtanh.f32 %v2764_v63  ;;  %v3494_v0 = vmul.f32 -1.442695, %v2764_v63 }
0x31e3   :  { %3751 = vpow2.f32 %v3494_v0 }
0x31e7   :  { %v3750_v13 = vpop.eup %3749 }
0x31e8   :  { %2790 = vrot.lane.b32.xlu2 %v3750_v13, %s3839_s0 }
0x31e9   :  { %v3752_v48 = vpop.eup %3751 }
0x31ea   :  { %v2768_v17 = vadd.f32 1.0, %v3752_v48 }
0x31ec   :  { %3753 = vrcp.f32 %v2768_v17  ;;  %v2780_v5 = vand.u32 2147483648, %v2768_v17  ;;  %vm2774_vm14 = vweird.f32 %v2768_v17  ;;  %v2778_v24 = vand.u32 2147483647, %v2768_v17 }
0x31ee   :  { %v2781_v3 = vor.u32 1.1754944e-38, %v2780_v5  ;;  %vm2779_vm1 = vcmp.eq.f32.partialorder %v2778_v24, 8.507059e+37 }
0x31f2   :  { %v3754_v10 = vpop.eup %3753 }
0x31f3   :  { %v2770_v19 = vmul.f32 %v3754_v10, %v2768_v17  ;;  %vm2775_vm2 = vweird.f32 %v3754_v10 }
0x31f4   :  { %vm2776_vm15 = vmor %vm2774_vm14, %vm2775_vm2 }
0x31f5   :  { %v2771_v6 = vsub.f32 1.0, %v2770_v19 }
0x31f7   :  { %v2772_v8 = vmul.f32 %v3754_v10, %v2771_v6 }
0x31f9   :  { %v2773_v20 = vadd.f32 %v3754_v10, %v2772_v8 }
0x31fb   :  { %v2777_v21 = vsel %vm2776_vm15, %v3754_v10, %v2773_v20 }
0x31fc   :  { %v2782_v16 = vsel %vm2779_vm1, %v2781_v3, %v2777_v21 }
0x31fd   :  { %v2788_v28 = vmul.f32 %v2786_v18, %v2782_v16 }
0x3242   :  { %v2791_v12 = vpop.permute.xlu2 %2790 }
0x3243   :  { %v2793_v53 = vmul.f32 %v2791_v12, %v2782_v16 }
0x3245   :  { %2795 = vrot.lane.b32.xlu0 %v2793_v53, %s3842_s19 }
0x32b7   :  { %v2796_v39 = vpop.permute.xlu0 %2795 }
0x32b8   :  { %v4757_v43 = vadd.f32 %v2796_v39, %v2788_v28  ;;  %v3274_v39 = vld [vmem:[%s4877_s14 + $0x18] sm:$0xff] }
0x32b9   :  { %3293 = vmatpush.msra.mxu2 %v3274_v39 }
0x32ba   :  { %3755 = vtanh.f32 %v4757_v43 }
0x32c0   :  { %v3756_v40 = vpop.eup %3755 }
0x32c1   :  { %2801 = vrot.lane.b32.xlu1 %v3756_v40, %s3839_s0  ;;  %v3272_v40 = vld [vmem:[%s4877_s14 + $0x8] sm:$0xff] }
0x3333   :  { %v2802_v22 = vpop.permute.xlu1 %2801 }
0x3334   :  { %v2804_v2 = vmul.f32 %v2802_v22, %v2782_v16  ;;  %v3271_v22 = vld [vmem:[%s4877_s14] sm:$0xff] }
0x3336   :  { %2806 = vst [vmem:[#allocation1] sm:$0xff] %v2804_v2  ;;  %v2992_v36 = vrot.slane %v2804_v2, 2 }
0x333d   :  { %v2810_v29 = vld [vmem:[#allocation1 + $0x3] ss:$9 sm:$0xff] }
0x333e   :  { %v2808_v25 = vld [vmem:[#allocation1 + $0x2] ss:$9 sm:$0xff]  ;;  %v2836_v26 = vperm.slane %v2810_v29, 0 }
0x333f   :  { %v2811_v61 = vperm.slane %v2808_v25, 0 }
0x3340   :  { %2837 = vrot.lane.b32.xlu0 %v2836_v26, %s3842_s19 }
0x3341   :  { %2812 = vrot.lane.b32.xlu2 %v2811_v61, %s3842_s19 }
0x339b   :  { %v2813_v15 = vpop.permute.xlu2 %2812 }
0x339c   :  { %3496 = vmatmul.msk.f32.vlgmr.msra.gmra.mxu3 %vm1318_vm5, %v2813_v15 }
0x339d   :  { %3504 = vmatpush.xpose.msk.msra.mxu3 %vm1318_vm5, %v4357_v54 }
0x33b2   :  { %v2838_v31 = vpop.permute.xlu0 %2837 }
0x33b3   :  { %3498 = vmatmul.msk.f32.vlgmr.msra.gmra.mxu0 %vm1318_vm5, %v2838_v31 }
0x33b4   :  { %3506 = vmatpush.xpose.msk.msra.mxu0 %vm1318_vm5, %v4362_v11 }
0x341f   :  { %v2833_v32 = vpop.f32.mrf.mxu3 }
0x3420   :  { %v2861_v37 = vsel %vm1573_vm3, %v2833_v32, -inf }
0x3421   :  { %2862 = vmax.xlane.f32.xlu1 %v2861_v37 }
0x3430   :  { %v2858_v30 = vpop.f32.mrf.mxu0 }
0x3431   :  { %v2864_v34 = vsel %vm1573_vm3, %v2858_v30, -inf }
0x3432   :  { %2865 = vmax.xlane.f32.xlu2 %v2864_v34 }
0x344a   :  { %2955 = vrot.lane.b32.xlu2 %v2804_v2, %s3842_s19 }
0x3494   :  { %v2863_v35 = vpop.xlane.xlu1 %2862 }
0x3495   :  { %v2867_v58 = vsub.f32 %v2833_v32, %v2863_v35 }
0x3497   :  { %v2869_v27 = vmul.f32 1.442695, %v2867_v58 }
0x3499   :  { %3757 = vpow2.f32 %v2869_v27 }
0x349f   :  { %v3758_v54 = vpop.eup %3757 }
0x34a0   :  { %v2873_v38 = vsel %vm1573_vm3, %v3758_v54, 0.0 }
0x34a1   :  { %2874 = vadd.xlane.f32.xlu0 %v2873_v38 }
0x34a5   :  { %v2866_v1 = vpop.xlane.xlu2 %2865 }
0x34a6   :  { %v2868_v11 = vsub.f32 %v2858_v30, %v2866_v1 }
0x34a8   :  { %v2871_v23 = vmul.f32 1.442695, %v2868_v11 }
0x34aa   :  { %3759 = vpow2.f32 %v2871_v23 }
0x34ad   :  { %v2956_v16 = vpop.permute.xlu2 %2955 }
0x34b0   :  { %v3760_v62 = vpop.eup %3759 }
0x34b1   :  { %v2876_v41 = vsel %vm1573_vm3, %v3760_v62, 0.0 }
0x34b2   :  { %2877 = vadd.xlane.f32.xlu1 %v2876_v41 }
0x34cb   :  { %2993 = vrot.lane.b32.xlu1 %v2992_v36, %s3839_s0  ;;  %v3045_v36 = vrot.slane %v4757_v43, 6 }
0x3514   :  { %v2875_v49 = vpop.xlane.xlu0 %2874 }
0x3515   :  { %3761 = vrcp.f32 %v2875_v49  ;;  %v2890_v51 = vand.u32 2147483648, %v2875_v49  ;;  %v2888_v59 = vand.u32 2147483647, %v2875_v49  ;;  %vm2884_vm7 = vweird.f32 %v2875_v49 }
0x3517   :  { %v2891_v44 = vor.u32 1.1754944e-38, %v2890_v51  ;;  %vm2889_vm2 = vcmp.eq.f32.partialorder %v2888_v59, 8.507059e+37 }
0x351b   :  { %v3762_v42 = vpop.eup %3761 }
0x351c   :  { %v2880_v50 = vmul.f32 %v3762_v42, %v2875_v49  ;;  %vm2885_vm4 = vweird.f32 %v3762_v42 }
0x351d   :  { %vm2886_vm11 = vmor %vm2884_vm7, %vm2885_vm4 }
0x351e   :  { %v2881_v45 = vsub.f32 1.0, %v2880_v50 }
0x3520   :  { %v2882_v52 = vmul.f32 %v3762_v42, %v2881_v45 }
0x3522   :  { %v2883_v33 = vadd.f32 %v3762_v42, %v2882_v52 }
0x3524   :  { %v2887_v9 = vsel %vm2886_vm11, %v3762_v42, %v2883_v33 }
0x3525   :  { %v2892_v55 = vsel %vm2889_vm2, %v2891_v44, %v2887_v9  ;;  %v2878_v56 = vpop.xlane.xlu1 %2877 }
0x3526   :  { %v2893_v57 = vmul.f32 %v3758_v54, %v2892_v55  ;;  %3763 = vrcp.f32 %v2878_v56  ;;  %v2905_v48 = vand.u32 2147483648, %v2878_v56  ;;  %v2903_v10 = vand.u32 2147483647, %v2878_v56 }
0x3527   :  { %vm2899_vm15 = vweird.f32 %v2878_v56 }
0x3528   :  { %3499 = vmatmul.msk.f32.vlgmr.msrb.gmra.mxu3 %vm1622_vm0, %v2893_v57  ;;  %v2906_v6 = vor.u32 1.1754944e-38, %v2905_v48  ;;  %vm2904_vm4 = vcmp.eq.f32.partialorder %v2903_v10, 8.507059e+37  ;;  %v3304_v10 = vlaneseq }
0x3529   :  { %3186 = vmatpush.msrb.mxu3 %v4344_v46 }
0x352c   :  { %v3764_v63 = vpop.eup %3763 }
0x352d   :  { %v2895_v13 = vmul.f32 %v3764_v63, %v2878_v56  ;;  %vm2900_vm14 = vweird.f32 %v3764_v63 }
0x352e   :  { %vm2901_vm1 = vmor %vm2899_vm15, %vm2900_vm14 }
0x352f   :  { %v2896_v0 = vsub.f32 1.0, %v2895_v13 }
0x3531   :  { %v2897_v17 = vmul.f32 %v3764_v63, %v2896_v0 }
0x3533   :  { %v2898_v19 = vadd.f32 %v3764_v63, %v2897_v17 }
0x3535   :  { %v2902_v8 = vsel %vm2901_vm1, %v3764_v63, %v2898_v19 }
0x3536   :  { %v2907_v20 = vsel %vm2904_vm4, %v2906_v6, %v2902_v8  ;;  %v4815_v8 = vand.u32 127, %v3304_v10 }
0x3537   :  { %v2908_v5 = vmul.f32 %v3760_v62, %v2907_v20 }
0x3538   :  { %vm3306_vm14 = vcmp.lt.s32.totalorder %v4815_v8, 32 }
0x3539   :  { %3500 = vmatmul.msk.f32.vlgmr.msrb.gmra.mxu0 %vm1622_vm0, %v2908_v5 }
0x353a   :  { %3209 = vmatpush.msrb.mxu0 %v4340_v60  ;;  %v3273_v60 = vld [vmem:[%s4877_s14 + $0x10] sm:$0xff] }
0x353b   :  { %3294 = vmatpush.msra.mxu2 %v3273_v60 }
0x353d   :  { %3295 = vmatpush.msra.mxu2 %v3272_v40  ;;  %v2994_v25 = vpop.permute.xlu1 %2993 }
0x353f   :  { %3296 = vmatpush.msra.mxu2 %v3271_v22 }
0x35ab   :  { %v2929_v46 = vpop.f32.mrf.mxu3 }
0x35ac   :  { %v2960_v21 = vrot.slane %v2929_v46, 6 }
0x35b6   :  { %v2952_v24 = vpop.f32.mrf.mxu0 }
0x35b7   :  { %v2961_v3 = vrot.slane %v2952_v24, 5 }
0x35b9   :  { %v2962_v12 = vsel %vm1933_vm13, %v2961_v3, %v2960_v21 }
0x35ba   :  { %2963 = vrot.lane.b32.xlu0 %v2962_v12, %s3842_s19 }
0x362c   :  { %v2964_v53 = vpop.permute.xlu0 %2963 }
0x362d   :  { %v2966_v18 = vsel %vm1318_vm5, %v2956_v16, %v2964_v53 }
0x362e   :  { %v2968_v28 = vrot.slane %v2966_v18, 2 }
0x3630   :  { %3501 = vmatmul.msk.f32.vlgmr.msra.gmra.mxu1 %vm1449_vm6, %v2968_v28 }
0x36ad   :  { %v2988_v2 = vpop.f32.mrf.mxu1 }
0x36ae   :  { %3765 = vtanh.f32 %v2988_v2 }
0x36b4   :  { %v4795_v29 = vpop.eup %3765 }
0x36b5   :  { %v2996_v26 = vsel %vm1318_vm5, %v4795_v29, %v2994_v25 }
0x36b6   :  { %3502 = vmatmul.msk.f32.vlgmr.msrb.gmra.mxu2 %vm1449_vm6, %v2996_v26 }
0x36be   :  { %3511 = vmatmul.msk.f32.vlgmr.msra.gmra.mxu2 %vm1318_vm5, %v4679_v14 }
0x3739   :  { %v3017_v61 = vpop.f32.mrf.mxu2 }
0x373a   :  { %v3021_v15 = vrot.slane %v3017_v61, 4 }
0x373c   :  { %v3023_v31 = vadd.f32 %v3021_v15, %v4692_v4 }
0x373e   :  { %3767 = vtanh.f32 %v3023_v31  ;;  %v3503_v37 = vmul.f32 -1.442695, %v3023_v31 }
0x3740   :  { %3769 = vpow2.f32 %v3503_v37 }
0x3741   :  { %v3298_v20 = vpop.f32.mrf.mxu2 }
0x3742   :  { %v4820_v5 = vsel %vm3306_vm14, %v3298_v20, -1e+30 }
0x3744   :  { %v3768_v32 = vpop.eup %3767 }
0x3745   :  { %3049 = vrot.lane.b32.xlu0 %v3768_v32, %s3839_s0 }
0x3746   :  { %v3770_v30 = vpop.eup %3769 }
0x3747   :  { %v3027_v34 = vadd.f32 1.0, %v3770_v30 }
0x3749   :  { %3771 = vrcp.f32 %v3027_v34  ;;  %v3039_v14 = vand.u32 2147483648, %v3027_v34  ;;  %vm3033_vm7 = vweird.f32 %v3027_v34  ;;  %v3037_v1 = vand.u32 2147483647, %v3027_v34 }
0x374b   :  { %v3040_v11 = vor.u32 1.1754944e-38, %v3039_v14  ;;  %vm3038_vm2 = vcmp.eq.f32.partialorder %v3037_v1, 8.507059e+37 }
0x374f   :  { %v3772_v35 = vpop.eup %3771 }
0x3750   :  { %v3029_v58 = vmul.f32 %v3772_v35, %v3027_v34  ;;  %vm3034_vm13 = vweird.f32 %v3772_v35 }
0x3751   :  { %vm3035_vm11 = vmor %vm3033_vm7, %vm3034_vm13 }
0x3752   :  { %v3030_v27 = vsub.f32 1.0, %v3029_v58 }
0x3754   :  { %v3031_v54 = vmul.f32 %v3772_v35, %v3030_v27 }
0x3756   :  { %v3032_v38 = vadd.f32 %v3772_v35, %v3031_v54 }
0x3758   :  { %v3036_v4 = vsel %vm3035_vm11, %v3772_v35, %v3032_v38 }
0x3759   :  { %v3041_v62 = vsel %vm3038_vm2, %v3040_v11, %v3036_v4 }
0x375a   :  { %v3047_v49 = vmul.f32 %v3045_v36, %v3041_v62 }
0x37b7   :  { %v3050_v23 = vpop.permute.xlu0 %3049 }
0x37b8   :  { %v3052_v41 = vmul.f32 %v3050_v23, %v3041_v62 }
0x37ba   :  { %3054 = vrot.lane.b32.xlu2 %v3052_v41, %s3842_s19 }
0x3814   :  { %v3055_v42 = vpop.permute.xlu2 %3054 }
0x3815   :  { %v3057_v50 = vadd.f32 %v3055_v42, %v3047_v49 }
0x3817   :  { %3773 = vtanh.f32 %v3057_v50 }
0x381d   :  { %v3774_v45 = vpop.eup %3773 }
0x381e   :  { %3060 = vrot.lane.b32.xlu1 %v3774_v45, %s3839_s0 }
0x3890   :  { %v3061_v51 = vpop.permute.xlu1 %3060 }
0x3891   :  { %v3063_v52 = vmul.f32 %v3061_v51, %v3041_v62 }
0x3893   :  { %3065 = vst [vmem:[#allocation1] sm:$0xff] %v3063_v52 }
0x389a   :  { %v3069_v59 = vld [vmem:[#allocation1 + $0x5] ss:$9 sm:$0xff] }
0x389b   :  { %v3067_v33 = vld [vmem:[#allocation1 + $0x4] ss:$9 sm:$0xff]  ;;  %v3095_v44 = vperm.slane %v3069_v59, 0 }
0x389c   :  { %v3070_v9 = vperm.slane %v3067_v33, 0  ;;  %v3332_v59 = vld [vmem:[%s4865_s2 + $0x8] sm:$0x3f]  ;;  %v3845_v33 = vmov 0  }
0x389d   :  { %3096 = vrot.lane.b32.xlu2 %v3095_v44, %s3842_s19  ;;  %3524 = vset.pattern.permute.xlu0 %v3845_v33 }
0x389e   :  { %3071 = vrot.lane.b32.xlu0 %v3070_v9, %s3842_s19  ;;  %3525 = vset.pattern.permute.xlu1 %v3845_v33  ;;  %v3261_v9 = vrot.slane %v4795_v29, 6 }
0x38f7   :  { %v3097_v55 = vpop.permute.xlu2 %3096 }
0x38f8   :  { %3507 = vmatmul.msk.f32.vlgmr.msra.gmra.mxu0 %vm1318_vm5, %v3097_v55 }
0x3910   :  { %v3072_v43 = vpop.permute.xlu0 %3071 }
0x3911   :  { %3505 = vmatmul.msk.f32.vlgmr.msra.gmra.mxu3 %vm1318_vm5, %v3072_v43 }
0x3975   :  { %v3117_v56 = vpop.f32.mrf.mxu0 }
0x3976   :  { %v3123_v57 = vsel %vm1573_vm3, %v3117_v56, -inf }
0x3977   :  { %3124 = vmax.xlane.f32.xlu0 %v3123_v57 }
0x398b   :  { %3214 = vrot.lane.b32.xlu0 %v3063_v52, %s3842_s19 }
0x3993   :  { %3337 = vperm.xlu0 %3524, %v3332_v59  }
0x3994   :  { %v3092_v63 = vpop.f32.mrf.mxu3 }
0x3995   :  { %v3120_v13 = vsel %vm1573_vm3, %v3092_v63, -inf }
0x3996   :  { %3121 = vmax.xlane.f32.xlu1 %v3120_v13 }
0x39ea   :  { %v3125_v0 = vpop.xlane.xlu0 %3124 }
0x39eb   :  { %v3127_v48 = vsub.f32 %v3117_v56, %v3125_v0  ;;  %v3269_v56 = vsel %vm1295_vm8, %v4748_v47, %v3261_v9  ;;  %v3331_v47 = vld [vmem:[%s4865_s2] sm:$0xff]  ;;  %vm3349_vm8 = vcmp.ne.s32.totalorder %v3332_v59, 0  ;;  %s3846_s2 = smov [#allocation2]  }
0x39ec   :  { %s3400_s30 = sshll.u32 %s3846_s2, 4  ;;  %s3401_s30 = int_to_ptr.vmem [resolvable:$true] %s3400_s30 }
0x39ed   :  { %v3130_v17 = vmul.f32 1.442695, %v3127_v48 }
0x39ef   :  { %3775 = vpow2.f32 %v3130_v17 }
0x39f5   :  { %v3776_v19 = vpop.eup %3775 }
0x39f6   :  { %v3135_v6 = vsel %vm1573_vm3, %v3776_v19, 0.0 }
0x39f7   :  { %3136 = vadd.xlane.f32.xlu1 %v3135_v6 }
0x39fd   :  { %v3215_v50 = vpop.permute.xlu0 %3214 }
0x39ff   :  { %3309 = vmax.xlane.f32.xlu1 %v4820_v5 }
0x3a09   :  { %v3122_v46 = vpop.xlane.xlu1 %3121 }
0x3a0a   :  { %v3126_v24 = vsub.f32 %v3092_v63, %v3122_v46  ;;  %v3338_v63 = vpop.permute.xlu0 %3337 }
0x3a0c   :  { %v3128_v21 = vmul.f32 1.442695, %v3126_v24 }
0x3a0e   :  { %3777 = vpow2.f32 %v3128_v21 }
0x3a14   :  { %v3778_v3 = vpop.eup %3777 }
0x3a15   :  { %v3132_v12 = vsel %vm1573_vm3, %v3778_v3, 0.0 }
0x3a16   :  { %3133 = vadd.xlane.f32.xlu2 %v3132_v12 }
0x3a6a   :  { %v3137_v16 = vpop.xlane.xlu1 %3136 }
0x3a6b   :  { %3779 = vrcp.f32 %v3137_v16  ;;  %v3164_v39 = vand.u32 2147483648, %v3137_v16  ;;  %v3162_v40 = vand.u32 2147483647, %v3137_v16  ;;  %vm3158_vm1 = vweird.f32 %v3137_v16 }
0x3a6d   :  { %v3165_v2 = vor.u32 1.1754944e-38, %v3164_v39  ;;  %vm3163_vm13 = vcmp.eq.f32.partialorder %v3162_v40, 8.507059e+37 }
0x3a71   :  { %v3780_v53 = vpop.eup %3779 }
0x3a72   :  { %v3154_v18 = vmul.f32 %v3780_v53, %v3137_v16  ;;  %vm3159_vm15 = vweird.f32 %v3780_v53  ;;  %v4828_v41 = vpop.xlane.xlu1 %3309 }
0x3a73   :  { %vm3160_vm4 = vmor %vm3158_vm1, %vm3159_vm15  ;;  %v3314_v36 = vsub.f32 %v4820_v5, %v4828_v41 }
0x3a74   :  { %v3155_v28 = vsub.f32 1.0, %v3154_v18 }
0x3a75   :  { %v3316_v49 = vmul.f32 1.442695, %v3314_v36 }
0x3a76   :  { %v3156_v60 = vmul.f32 %v3780_v53, %v3155_v28 }
0x3a78   :  { %v3157_v22 = vadd.f32 %v3780_v53, %v3156_v60 }
0x3a7a   :  { %v3161_v25 = vsel %vm3160_vm4, %v3780_v53, %v3157_v22  ;;  %vm3393_vm4 = vcmask 0  }
0x3a7b   :  { %v3166_v26 = vsel %vm3163_vm13, %v3165_v2, %v3161_v25 }
0x3a7c   :  { %v3167_v61 = vmul.f32 %v3776_v19, %v3166_v26 }
0x3a7e   :  { %3509 = vmatmul.msk.f32.vlgmr.msrb.gmra.mxu0 %vm1622_vm0, %v3167_v61 }
0x3a89   :  { %v3134_v15 = vpop.xlane.xlu2 %3133 }
0x3a8a   :  { %3781 = vrcp.f32 %v3134_v15  ;;  %v3149_v30 = vand.u32 2147483648, %v3134_v15  ;;  %v3147_v35 = vand.u32 2147483647, %v3134_v15  ;;  %vm3143_vm7 = vweird.f32 %v3134_v15 }
0x3a8b   :  { %3783 = vpow2.f32 %v3316_v49 }
0x3a8c   :  { %v3150_v27 = vor.u32 1.1754944e-38, %v3149_v30  ;;  %vm3148_vm2 = vcmp.eq.f32.partialorder %v3147_v35, 8.507059e+37 }
0x3a90   :  { %v3782_v31 = vpop.eup %3781 }
0x3a91   :  { %v3139_v32 = vmul.f32 %v3782_v31, %v3134_v15  ;;  %vm3144_vm3 = vweird.f32 %v3782_v31  ;;  %v3784_v42 = vpop.eup %3783 }
0x3a92   :  { %vm3145_vm11 = vmor %vm3143_vm7, %vm3144_vm3 }
0x3a93   :  { %v3140_v37 = vsub.f32 1.0, %v3139_v32 }
0x3a95   :  { %v3141_v34 = vmul.f32 %v3782_v31, %v3140_v37 }
0x3a97   :  { %v3142_v58 = vadd.f32 %v3782_v31, %v3141_v34 }
0x3a99   :  { %v3146_v54 = vsel %vm3145_vm11, %v3782_v31, %v3142_v58 }
0x3a9a   :  { %v3151_v38 = vsel %vm3148_vm2, %v3150_v27, %v3146_v54 }
0x3a9b   :  { %v3152_v14 = vmul.f32 %v3778_v3, %v3151_v38  ;;  %v3514_v3 = vsel %vm3349_vm8, 1.0, %v3838_v7 }
0x3a9d   :  { %3508 = vmatmul.msk.f32.vlgmr.msrb.gmra.mxu3 %vm1622_vm0, %v3152_v14  ;;  %vm3358_vm0 = vcmask 7168  }
0x3afb   :  { %v3211_v1 = vpop.f32.mrf.mxu0 }
0x3afc   :  { %v3220_v11 = vrot.slane %v3211_v1, 3 }
0x3b20   :  { %v3188_v4 = vpop.f32.mrf.mxu3 }
0x3b21   :  { %v3219_v23 = vrot.slane %v3188_v4, 4 }
0x3b23   :  { %v3221_v62 = vsel %vm2193_vm9, %v3220_v11, %v3219_v23  ;;  %vm3360_vm9 = vcmask 5120  }
0x3b24   :  { %3222 = vrot.lane.b32.xlu2 %v3221_v62, %s3842_s19  ;;  %v3370_v53 = vsel %vm3360_vm9, %v3514_v3, 0.0 }
0x3b4d   :  { %3320 = vadd.xlane.f32.xlu2 %v3784_v42 }
0x3b7e   :  { %v3223_v45 = vpop.permute.xlu2 %3222 }
0x3b7f   :  { %v3225_v51 = vsel %vm1318_vm5, %v3215_v50, %v3223_v45 }
0x3b80   :  { %v3227_v52 = vrot.slane %v3225_v51, 4 }
0x3b82   :  { %3510 = vmatmul.msk.f32.vlgmr.msrb.gmra.mxu1 %vm1449_vm6, %v3227_v52  ;;  %vm3340_vm6 = vcmp.eq.s32.totalorder %v4815_v8, %v3338_v63 }
0x3bff   :  { %v3247_v44 = vpop.f32.mrf.mxu1 }
0x3c00   :  { %3785 = vtanh.f32 %v3247_v44 }
0x3c06   :  { %v3786_v55 = vpop.eup %3785 }
0x3c07   :  { %v3264_v43 = vrot.slane %v3786_v55, 4 }
0x3c09   :  { %v3270_v57 = vsel %vm1299_vm10, %v3269_v56, %v3264_v43  ;;  %vm3348_vm10 = vcmp.ne.s32.totalorder %v3331_v47, 0 }
0x3c0a   :  { %3512 = vmatmul.msk.f32.gmra.mxu2 %vm1318_vm5, %v3270_v57  ;;  %v3513_v12 = vsel %vm3348_vm10, 1.0, %v3838_v7 }
0x3c0b   :  { %v3369_v16 = vsel %vm3358_vm0, %v3513_v12, 0.0 }
0x3c0c   :  { %v3371_v18 = vadd.f32 %v3370_v53, %v3369_v16 }
0x3c0e   :  { %v3372_v28 = vrot.slane %v3371_v18, 4 }
0x3c10   :  { %v3373_v39 = vadd.f32 %v3372_v28, %v3371_v18 }
0x3c12   :  { %v3374_v60 = vrot.slane %v3373_v39, 2 }
0x3c8d   :  { %v3301_v13 = vpop.f32.mrf.mxu2 }
0x3c8e   :  { %v3308_v0 = vsel %vm3306_vm14, %v3301_v13, -1e+30 }
0x3c8f   :  { %v3342_v48 = vsel %vm3340_vm6, %v3308_v0, 0.0  ;;  %v3311_v17 = vsel %vm1303_vm12, %v3308_v0, -inf }
0x3c90   :  { %3312 = vmax.xlane.f32.xlu1 %v3311_v17  ;;  %v3345_v29 = vsel %vm1303_vm12, %v3342_v48, 0.0 }
0x3c91   :  { %3346 = vadd.xlane.f32.xlu2 %v3345_v29 }
0x3ca9   :  { %3334 = vperm.xlu1 %3525, %v3331_v47  }
0x3d03   :  { %v3313_v10 = vpop.xlane.xlu1 %3312 }
0x3d04   :  { %v3315_v19 = vsub.f32 %v3308_v0, %v3313_v10 }
0x3d06   :  { %v3318_v6 = vmul.f32 1.442695, %v3315_v19 }
0x3d08   :  { %3787 = vpow2.f32 %v3318_v6 }
0x3d0e   :  { %v3788_v20 = vpop.eup %3787 }
0x3d0f   :  { %v3322_v46 = vsel %vm1303_vm12, %v3788_v20, 0.0 }
0x3d10   :  { %3323 = vadd.xlane.f32.xlu0 %v3322_v46 }
0x3d1b   :  { %v3335_v24 = vpop.permute.xlu1 %3334 }
0x3d1c   :  { %vm3339_vm5 = vcmp.eq.s32.totalorder %v4815_v8, %v3335_v24  ;;  %v3375_v8 = vadd.f32 %v3374_v60, %v3373_v39 }
0x3d1d   :  { %v3341_v21 = vsel %vm3339_vm5, %v4820_v5, 0.0  ;;  %v3321_v5 = vpop.xlane.xlu2 %3320 }
0x3d1e   :  { %3343 = vadd.xlane.f32.xlu1 %v3341_v21  ;;  %v3376_v40 = vrot.slane %v3375_v8, 1  ;;  %3789 = vlog2.f32 %v3321_v5 }
0x3d20   :  { %v3377_v22 = vadd.f32 %v3376_v40, %v3375_v8 }
0x3d22   :  { %vm3383_vm12 = vweird.f32 %v3377_v22  ;;  %v3389_v62 = vand.u32 2147483648, %v3377_v22  ;;  %v3387_v42 = vand.u32 2147483647, %v3377_v22 }
0x3d24   :  { %v3790_v25 = vpop.eup %3789  ;;  %v3390_v50 = vor.u32 1.1754944e-38, %v3389_v62  ;;  %vm3388_vm1 = vcmp.eq.f32.partialorder %v3387_v42, 8.507059e+37 }
0x3d25   :  { %v3326_v15 = vmul.f32 0.6931472, %v3790_v25  ;;  %v3347_v32 = vpop.xlane.xlu2 %3346 }
0x3d27   :  { %v3329_v34 = vadd.f32 %v3326_v15, %v4828_v41 }
0x3d83   :  { %v3324_v2 = vpop.xlane.xlu0 %3323 }
0x3d84   :  { %3791 = vlog2.f32 %v3324_v2 }
0x3d85   :  { %3793 = vrcp.f32 %v3377_v22 }
0x3d8a   :  { %v3792_v7 = vpop.eup %3791 }
0x3d8b   :  { %v3328_v26 = vmul.f32 0.6931472, %v3792_v7  ;;  %v3794_v61 = vpop.eup %3793 }
0x3d8c   :  { %v3379_v30 = vmul.f32 %v3794_v61, %v3377_v22  ;;  %vm3384_vm14 = vweird.f32 %v3794_v61 }
0x3d8d   :  { %v3330_v31 = vadd.f32 %v3328_v26, %v3313_v10  ;;  %vm3385_vm15 = vmor %vm3383_vm12, %vm3384_vm14 }
0x3d8e   :  { %v3380_v54 = vsub.f32 1.0, %v3379_v30 }
0x3d8f   :  { %v3355_v37 = vsub.f32 %v3330_v31, %v3347_v32 }
0x3d90   :  { %v3381_v11 = vmul.f32 %v3794_v61, %v3380_v54 }
0x3d91   :  { %v3344_v35 = vpop.xlane.xlu1 %3343  ;;  %v3357_v58 = vmul.f32 %v3514_v3, %v3355_v37 }
0x3d92   :  { %v3354_v27 = vsub.f32 %v3329_v34, %v3344_v35  ;;  %v3382_v49 = vadd.f32 %v3794_v61, %v3381_v11 }
0x3d93   :  { %v3361_v1 = vsel %vm3360_vm9, %v3357_v58, 0.0 }
0x3d94   :  { %v3356_v38 = vmul.f32 %v3513_v12, %v3354_v27  ;;  %v3386_v51 = vsel %vm3385_vm15, %v3794_v61, %v3382_v49 }
0x3d95   :  { %v3391_v59 = vsel %vm3388_vm1, %v3390_v50, %v3386_v51 }
0x3d96   :  { %v3359_v14 = vsel %vm3358_vm0, %v3356_v38, 0.0 }
0x3d97   :  { %v3362_v4 = vadd.f32 %v3361_v1, %v3359_v14 }
0x3d99   :  { %v3363_v23 = vrot.slane %v3362_v4, 4 }
0x3d9b   :  { %v3364_v36 = vadd.f32 %v3363_v23, %v3362_v4 }
0x3d9d   :  { %v3365_v41 = vrot.slane %v3364_v36, 2 }
0x3d9f   :  { %v3366_v45 = vadd.f32 %v3365_v41, %v3364_v36 }
0x3da1   :  { %v3367_v52 = vrot.slane %v3366_v45, 1 }
0x3da3   :  { %v3368_v33 = vadd.f32 %v3367_v52, %v3366_v45 }
0x3da5   :  { %v3392_v44 = vmul.f32 %v3391_v59, %v3368_v33 }
0x3da7   :  { %3394 = vst.msk [vmem:[#allocation2] sm:$0x1] %vm3393_vm4, %v3392_v44 }
0x3da8   :  { %3405 = dma.vmem_to_hbm [thread:$0]  %s3401_s30, 16, %s3403_s5, [#allocation3]  }
0x3da9   :  { %3836 = dma.done.wait [#allocation3], 16  }
0x3daa   :  { %3837 = vsyncadd [#allocation3], 4294967280 }
0x3dab   :  { %3410 = vsyncpa [#allocation3], 1 }

</bundles_post_ra>
